<compile_context>
chip_gen: v5e
topology: v5e:2x2
jax: 0.10.0
libtpu: 0.0.40
codegen_flags: <defaults>
</compile_context>

<pallas_src>
import jax
import jax.numpy as jnp
from jax.experimental import pallas as pl
from jax.experimental.pallas import tpu as pltpu

HIDDEN = 800              # nn.Linear hidden width from the module definition
_LEAKY_SLOPE = 0.01       # PyTorch nn.LeakyReLU default negative_slope


def _round_up(x, m):
    return (x + m - 1) // m * m


def _pick_n_tile(n_padded, max_tile=1024):
    """Largest multiple of 128 that divides n_padded and is <= max_tile."""
    t = (min(n_padded, max_tile) // 128) * 128
    while n_padded % t != 0:
        t -= 128
    return t


def _decoderc_kernel(z_ref, w1_ref, b1_ref, w2_ref, b2_ref, w3_ref, b3_ref,
                     o_ref, h2_ref):
    """Fused 3-layer MLP on one (batch tile, output-column tile).

    All matmuls run on the MXU with bf16 inputs / f32 accumulation. The fc2
    activation is computed once per batch tile (n == 0) and cached in the
    VMEM scratch `h2_ref`; each n-step only runs the fc3 slab.
    """
    # fc1 + fc2 (Linear + LeakyReLU; Dropout = identity in eval mode).
    @pl.when(pl.program_id(1) == 0)
    def _():
        h = jnp.dot(z_ref[...].astype(jnp.bfloat16), w1_ref[...],
                    preferred_element_type=jnp.float32) + b1_ref[...]
        h = jnp.maximum(h, _LEAKY_SLOPE * h)
        h = jnp.dot(h.astype(jnp.bfloat16), w2_ref[...],
                    preferred_element_type=jnp.float32) + b2_ref[...]
        h = jnp.maximum(h, _LEAKY_SLOPE * h)
        h2_ref[...] = h.astype(jnp.bfloat16)

    # fc3: Linear + ReLU for the current output-column tile.
    o = jnp.dot(h2_ref[...], w3_ref[...],
                preferred_element_type=jnp.float32) + b3_ref[...]
    o_ref[...] = jnp.maximum(o, 0.0).astype(o_ref.dtype)


def prepare_decoderc_params(raw, *, output_dim=None):
    """One-time weight prep: bf16 weights, f32 biases, out_dim padded to 128.

    `raw` holds f32 weights w1 (z_dim,800), w2 (800,800), w3 (800,out_dim)
    and biases b1/b2/b3 of matching output width (any leading-1 shape).
    """
    if output_dim is None:
        output_dim = int(raw["w3"].shape[1])
    out_dim_padded = _round_up(output_dim, 128)

    w3 = raw["w3"].astype(jnp.bfloat16)
    b3 = raw["b3"].astype(jnp.float32).reshape(1, -1)
    if out_dim_padded != output_dim:
        # Lane-dense output: pad w3/b3 columns with zeros; extra output columns
        # are exactly ReLU(0) = 0 and are sliced off in the wrapper.
        w3 = jnp.pad(w3, ((0, 0), (0, out_dim_padded - output_dim)))
        b3 = jnp.pad(b3, ((0, 0), (0, out_dim_padded - output_dim)))

    return dict(
        w1=raw["w1"].astype(jnp.bfloat16),
        b1=raw["b1"].astype(jnp.float32).reshape(1, -1),
        w2=raw["w2"].astype(jnp.bfloat16),
        b2=raw["b2"].astype(jnp.float32).reshape(1, -1),
        w3=w3,
        b3=b3,
        out_dim=int(output_dim),
    )


def init_decoderc_params(key, z_dim, output_dim):
    """Deterministic init matching nn.Linear's U(-1/sqrt(fan_in), 1/sqrt(fan_in))."""
    ks = jax.random.split(key, 6)

    def linear(kw, kb, fan_in, fan_out):
        bound = 1.0 / float(fan_in) ** 0.5
        w = jax.random.uniform(kw, (fan_in, fan_out), jnp.float32, -bound, bound)
        b = jax.random.uniform(kb, (1, fan_out), jnp.float32, -bound, bound)
        return w, b

    w1, b1 = linear(ks[0], ks[1], z_dim, HIDDEN)
    w2, b2 = linear(ks[2], ks[3], HIDDEN, HIDDEN)
    w3, b3 = linear(ks[4], ks[5], HIDDEN, output_dim)
    return prepare_decoderc_params(
        dict(w1=w1, b1=b1, w2=w2, b2=b2, w3=w3, b3=b3), output_dim=output_dim)


def decoderc_forward(z, params, *, batch_tile=None, n_tile=None):
    """Run the Decoderc forward pass via pallas_call.

    z:      (B, z_dim) float
    params: dict from prepare_decoderc_params / init_decoderc_params
            (bf16 weights, f32 (1, width) biases, out_dim padded to 128).
    """
    w1, b1 = params["w1"], params["b1"]
    w2, b2 = params["w2"], params["b2"]
    w3, b3 = params["w3"], params["b3"]
    out_dim = params["out_dim"]

    B, z_dim = z.shape
    out_dim_padded = w3.shape[1]
    z = z.astype(jnp.float32)

    # --- batch tiling ------------------------------------------------------
    if batch_tile is None:
        if B <= 256:
            # Weight-DMA-bound regime: one grid step, rows rounded to sublanes.
            batch_tile = max(8, _round_up(B, 8))
        elif B <= 1024:
            # Two batch steps so both megacore TensorCores get equal work.
            batch_tile = _round_up((B + 1) // 2, 8)
        else:
            # Large batch: amortize per-step (~0.35us) overhead; fills MXU rows.
            batch_tile = 512
    assert batch_tile % 8 == 0, "batch_tile must be a multiple of 8 (sublane)"

    padded_B = _round_up(B, batch_tile)
    if padded_B != B:
        # TODO(synk): replace pad+slice with a masked trailing block to avoid the
        # extra O(B*out_dim) output copy for very large ragged batches.
        z = jnp.pad(z, ((0, padded_B - B), (0, 0)))

    # --- output-column tiling ----------------------------------------------
    if n_tile is None:
        n_tile = _pick_n_tile(out_dim_padded)
    assert out_dim_padded % n_tile == 0 and n_tile % 128 == 0

    grid = (padded_B // batch_tile, out_dim_padded // n_tile)

    # Grid-invariant weights/biases: fully resident, single-buffered.
    invariant = lambda shape: pl.BlockSpec(
        shape, lambda i, n: (0, 0), pipeline_mode=pl.Buffered(1))

    flops = 2 * B * (z_dim * HIDDEN + HIDDEN * HIDDEN + HIDDEN * out_dim_padded)
    bytes_accessed = (
        int(z.size) * 4
        + (int(w1.size) + int(w2.size) + int(w3.size)) * 2
        + (int(b1.size) + int(b2.size) + int(b3.size)) * 4
        + padded_B * out_dim_padded * 4)

    out = pl.pallas_call(
        _decoderc_kernel,
        out_shape=jax.ShapeDtypeStruct((padded_B, out_dim_padded), jnp.float32),
        grid_spec=pltpu.PrefetchScalarGridSpec(
            num_scalar_prefetch=0,
            grid=grid,
            in_specs=[
                pl.BlockSpec((batch_tile, z_dim), lambda i, n: (i, 0)),   # z tile
                invariant(w1.shape), invariant(b1.shape),                  # fc1
                invariant(w2.shape), invariant(b2.shape),                  # fc2
                pl.BlockSpec((HIDDEN, n_tile), lambda i, n: (0, n)),       # fc3 W tile
                pl.BlockSpec((1, n_tile), lambda i, n: (0, n)),            # fc3 b tile
            ],
            out_specs=pl.BlockSpec((batch_tile, n_tile), lambda i, n: (i, n)),
            scratch_shapes=[pltpu.VMEM((batch_tile, HIDDEN), jnp.bfloat16)],
        ),
        compiler_params=pltpu.CompilerParams(
            dimension_semantics=("parallel", "arbitrary"),
        ),
        cost_estimate=pl.CostEstimate(
            flops=flops, transcendentals=0, bytes_accessed=bytes_accessed),
    )(z, w1, b1, w2, b2, w3, b3)

    if padded_B != B:
        out = out[:B]
    if out_dim_padded != out_dim:
        out = out[:, :out_dim]
    return out


def decoderc_reference(z, params):
    """Pure-JAX reference mirroring the kernel's bf16-weight / f32-accumulate math."""
    h = jnp.dot(z.astype(jnp.bfloat16), params["w1"],
                preferred_element_type=jnp.float32) + params["b1"]
    h = jnp.maximum(h, _LEAKY_SLOPE * h)
    h = jnp.dot(h.astype(jnp.bfloat16), params["w2"],
                preferred_element_type=jnp.float32) + params["b2"]
    h = jnp.maximum(h, _LEAKY_SLOPE * h)
    h = jnp.dot(h.astype(jnp.bfloat16), params["w3"],
                preferred_element_type=jnp.float32) + params["b3"]
    return jnp.maximum(h, 0.0)[:, :params["out_dim"]]


if __name__ == "__main__":
    key = jax.random.PRNGKey(0)
    k_param, k_z1, k_z2 = jax.random.split(key, 3)

    z_dim, output_dim = 32, 128
    params = init_decoderc_params(k_param, z_dim, output_dim)

    # Small ragged batch -> single grid step, rows padded 10 -> 16.
    z_small = jax.random.normal(k_z1, (10, z_dim), jnp.float32)
    out_small = jax.block_until_ready(decoderc_forward(z_small, params))
    ref_small = decoderc_reference(z_small, params)
    assert out_small.shape == (10, output_dim)
    assert jnp.allclose(out_small, ref_small, atol=2e-2, rtol=2e-2), "small-batch mismatch"

    # Larger batch (multiple of 8) -> single 136-row tile, no padding needed.
    z_big = jax.random.normal(k_z2, (136, z_dim), jnp.float32)
    out_big = jax.block_until_ready(decoderc_forward(z_big, params))
    ref_big = decoderc_reference(z_big, params)
    assert out_big.shape == (136, output_dim)
    assert jnp.allclose(out_big, ref_big, atol=2e-2, rtol=2e-2), "big-batch mismatch"

    print("KERNEL_OK")
</pallas_src>

<mosaic_0001>
module attributes {stable_mosaic.version = 11 : i64} {
  func.func @_decoderc_kernel(%arg0: i32, %arg1: i32, %arg2: memref<16x32xf32, #tpu.memory_space<vmem>>, %arg3: memref<32x800xbf16, #tpu.memory_space<vmem>>, %arg4: memref<1x800xf32, #tpu.memory_space<vmem>>, %arg5: memref<800x800xbf16, #tpu.memory_space<vmem>>, %arg6: memref<1x800xf32, #tpu.memory_space<vmem>>, %arg7: memref<800x128xbf16, #tpu.memory_space<vmem>>, %arg8: memref<1x128xf32, #tpu.memory_space<vmem>>, %arg9: memref<16x128xf32, #tpu.memory_space<vmem>>, %arg10: memref<16x800xbf16, #tpu.memory_space<vmem>>) attributes {dimension_semantics = [#tpu.dimension_semantics<parallel>, #tpu.dimension_semantics<arbitrary>], iteration_bounds = array<i64: 1, 1>, scalar_prefetch = 0 : i64, scratch_operands = 1 : i64, tpu.core_type = #tpu.core_type<tc>, window_params = [{transform_indices = @transform_0, window_bounds = array<i64: 16, 32>}, {pipeline_mode = #tpu.pipeline_mode<synchronous>, transform_indices = @transform_1, window_bounds = array<i64: 32, 800>}, {pipeline_mode = #tpu.pipeline_mode<synchronous>, transform_indices = @transform_2, window_bounds = array<i64: 1, 800>}, {pipeline_mode = #tpu.pipeline_mode<synchronous>, transform_indices = @transform_3, window_bounds = array<i64: 800, 800>}, {pipeline_mode = #tpu.pipeline_mode<synchronous>, transform_indices = @transform_4, window_bounds = array<i64: 1, 800>}, {transform_indices = @transform_5, window_bounds = array<i64: 800, 128>}, {transform_indices = @transform_6, window_bounds = array<i64: 1, 128>}, {transform_indices = @transform_7, window_bounds = array<i64: 16, 128>}]} {
    %c0_i32 = arith.constant 0 : i32
    %0 = arith.cmpi eq, %arg1, %c0_i32 : i32
    %1 = arith.extui %0 : i1 to i32
    %c0_i32_0 = arith.constant 0 : i32
    %2 = arith.cmpi ne, %1, %c0_i32_0 : i32
    scf.if %2 {
      %c0_9 = arith.constant 0 : index
      %c0_10 = arith.constant 0 : index
      %12 = vector.load %arg2[%c0_9, %c0_10] : memref<16x32xf32, #tpu.memory_space<vmem>>, vector<16x32xf32>
      %13 = arith.truncf %12 : vector<16x32xf32> to vector<16x32xbf16>
      %c0_11 = arith.constant 0 : index
      %c0_12 = arith.constant 0 : index
      %14 = vector.load %arg3[%c0_11, %c0_12] : memref<32x800xbf16, #tpu.memory_space<vmem>>, vector<32x800xbf16>
      %cst_13 = arith.constant dense<0.000000e+00> : vector<16x800xf32>
      %15 = tpu.matmul %13, %14, %cst_13 {dimension_numbers = #tpu.dot_dimension_numbers<[1], [0], [0], [1], [0, 0, 1, 1], [], []>} : vector<16x32xbf16>, vector<32x800xbf16>, vector<16x800xf32> -> vector<16x800xf32>
      %c0_14 = arith.constant 0 : index
      %c0_15 = arith.constant 0 : index
      %16 = vector.load %arg4[%c0_14, %c0_15] : memref<1x800xf32, #tpu.memory_space<vmem>>, vector<1x800xf32>
      %17 = vector.broadcast %16 : vector<1x800xf32> to vector<16x800xf32>
      %18 = arith.addf %15, %17 : vector<16x800xf32>
      %cst_16 = arith.constant 0.00999999977 : f32
      %19 = vector.broadcast %cst_16 : f32 to vector<16x800xf32>
      %20 = arith.mulf %19, %18 : vector<16x800xf32>
      %21 = arith.maximumf %18, %20 : vector<16x800xf32>
      %22 = arith.truncf %21 : vector<16x800xf32> to vector<16x800xbf16>
      %c0_17 = arith.constant 0 : index
      %c0_18 = arith.constant 0 : index
      %23 = vector.load %arg5[%c0_17, %c0_18] : memref<800x800xbf16, #tpu.memory_space<vmem>>, vector<800x800xbf16>
      %cst_19 = arith.constant dense<0.000000e+00> : vector<16x800xf32>
      %24 = tpu.matmul %22, %23, %cst_19 {dimension_numbers = #tpu.dot_dimension_numbers<[1], [0], [0], [1], [0, 0, 1, 1], [], []>} : vector<16x800xbf16>, vector<800x800xbf16>, vector<16x800xf32> -> vector<16x800xf32>
      %c0_20 = arith.constant 0 : index
      %c0_21 = arith.constant 0 : index
      %25 = vector.load %arg6[%c0_20, %c0_21] : memref<1x800xf32, #tpu.memory_space<vmem>>, vector<1x800xf32>
      %26 = vector.broadcast %25 : vector<1x800xf32> to vector<16x800xf32>
      %27 = arith.addf %24, %26 : vector<16x800xf32>
      %cst_22 = arith.constant 0.00999999977 : f32
      %28 = vector.broadcast %cst_22 : f32 to vector<16x800xf32>
      %29 = arith.mulf %28, %27 : vector<16x800xf32>
      %30 = arith.maximumf %27, %29 : vector<16x800xf32>
      %31 = arith.truncf %30 : vector<16x800xf32> to vector<16x800xbf16>
      %c0_23 = arith.constant 0 : index
      %c0_24 = arith.constant 0 : index
      %32 = vector.load %arg10[%c0_23, %c0_24] : memref<16x800xbf16, #tpu.memory_space<vmem>>, vector<16x800xbf16>
      tpu.vector_store %arg10[%c0_23, %c0_24], %31 {strides = array<i32>} : memref<16x800xbf16, #tpu.memory_space<vmem>>, vector<16x800xbf16>,
    } else {
    }
    %c0 = arith.constant 0 : index
    %c0_1 = arith.constant 0 : index
    %3 = vector.load %arg10[%c0, %c0_1] : memref<16x800xbf16, #tpu.memory_space<vmem>>, vector<16x800xbf16>
    %c0_2 = arith.constant 0 : index
    %c0_3 = arith.constant 0 : index
    %4 = vector.load %arg7[%c0_2, %c0_3] : memref<800x128xbf16, #tpu.memory_space<vmem>>, vector<800x128xbf16>
    %cst = arith.constant dense<0.000000e+00> : vector<16x128xf32>
    %5 = tpu.matmul %3, %4, %cst {dimension_numbers = #tpu.dot_dimension_numbers<[1], [0], [0], [1], [0, 0, 1, 1], [], []>} : vector<16x800xbf16>, vector<800x128xbf16>, vector<16x128xf32> -> vector<16x128xf32>
    %c0_4 = arith.constant 0 : index
    %c0_5 = arith.constant 0 : index
    %6 = vector.load %arg8[%c0_4, %c0_5] : memref<1x128xf32, #tpu.memory_space<vmem>>, vector<1x128xf32>
    %7 = vector.broadcast %6 : vector<1x128xf32> to vector<16x128xf32>
    %8 = arith.addf %5, %7 : vector<16x128xf32>
    %cst_6 = arith.constant 0.000000e+00 : f32
    %9 = vector.broadcast %cst_6 : f32 to vector<16x128xf32>
    %10 = arith.maximumf %8, %9 : vector<16x128xf32>
    %c0_7 = arith.constant 0 : index
    %c0_8 = arith.constant 0 : index
    %11 = vector.load %arg9[%c0_7, %c0_8] : memref<16x128xf32, #tpu.memory_space<vmem>>, vector<16x128xf32>
    tpu.vector_store %arg9[%c0_7, %c0_8], %10 {strides = array<i32>} : memref<16x128xf32, #tpu.memory_space<vmem>>, vector<16x128xf32>,
    return
  }
  func.func @transform_0(%arg0: i32, %arg1: i32) -> (i32, i32) {
    %c0_i32 = arith.constant 0 : i32
    %c0_i32_0 = arith.constant 0 : i32
    return %arg0, %c0_i32 : i32, i32
  }
  func.func @transform_1(%arg0: i32, %arg1: i32) -> (i32, i32) {
    %c0_i32 = arith.constant 0 : i32
    %c0_i32_0 = arith.constant 0 : i32
    %c0_i32_1 = arith.constant 0 : i32
    return %c0_i32, %c0_i32_0 : i32, i32
  }
  func.func @transform_2(%arg0: i32, %arg1: i32) -> (i32, i32) {
    %c0_i32 = arith.constant 0 : i32
    %c0_i32_0 = arith.constant 0 : i32
    %c0_i32_1 = arith.constant 0 : i32
    return %c0_i32, %c0_i32_0 : i32, i32
  }
  func.func @transform_3(%arg0: i32, %arg1: i32) -> (i32, i32) {
    %c0_i32 = arith.constant 0 : i32
    %c0_i32_0 = arith.constant 0 : i32
    %c0_i32_1 = arith.constant 0 : i32
    return %c0_i32, %c0_i32_0 : i32, i32
  }
  func.func @transform_4(%arg0: i32, %arg1: i32) -> (i32, i32) {
    %c0_i32 = arith.constant 0 : i32
    %c0_i32_0 = arith.constant 0 : i32
    %c0_i32_1 = arith.constant 0 : i32
    return %c0_i32, %c0_i32_0 : i32, i32
  }
  func.func @transform_5(%arg0: i32, %arg1: i32) -> (i32, i32) {
    %c0_i32 = arith.constant 0 : i32
    %c0_i32_0 = arith.constant 0 : i32
    return %c0_i32, %arg1 : i32, i32
  }
  func.func @transform_6(%arg0: i32, %arg1: i32) -> (i32, i32) {
    %c0_i32 = arith.constant 0 : i32
    %c0_i32_0 = arith.constant 0 : i32
    return %c0_i32, %arg1 : i32, i32
  }
  func.func @transform_7(%arg0: i32, %arg1: i32) -> (i32, i32) {
    %c0_i32 = arith.constant 0 : i32
    return %arg0, %arg1 : i32, i32
  }
}

</mosaic_0001>

<bundles_post_ra>
// kernel: tpu_custom_call.1
= control target key start
LH: loop header
LB: loop body
LE: loop exit
PB: predicated region body
PF: predicated region fallthrough
CT: control target
= control target key end

     0   :  { %12 = vsyncpa [#allocation4], 0  ;;  %s6557_s0 = inlined_call_operand.hbm [shape: f32[16,32], index: 0, kind: input, shape index: {}]   ;;  %s6558_s1 = inlined_call_operand.hbm [shape: bf16[32,800], index: 1, kind: input, shape index: {}]   ;;  %s6559_s2 = inlined_call_operand.hbm [shape: f32[1,800], index: 2, kind: input, shape index: {}]   ;;  %s6560_s3 = inlined_call_operand.hbm [shape: bf16[800,800], index: 3, kind: input, shape index: {}]   ;;  %s6561_s4 = inlined_call_operand.hbm [shape: f32[1,800], index: 4, kind: input, shape index: {}]   ;;  %s6562_s5 = inlined_call_operand.hbm [shape: bf16[800,128], index: 5, kind: input, shape index: {}]   ;;  %s6563_s6 = inlined_call_operand.hbm [shape: f32[1,128], index: 6, kind: input, shape index: {}]   ;;  %s6564_s7 = inlined_call_operand.hbm [shape: f32[16,128], index: 7, kind: output, shape index: {}]  }
   0x1   :  { %13 = vsyncpa [#allocation7], 0 }
   0x2   :  { %14 = vsyncpa [#allocation10], 0 }
   0x3   :  { %15 = vsyncpa [#allocation13], 0  ;;  %s34_s26 = sshll.u32 %s6558_s1, 4  ;;  %s35_s26 = int_to_ptr.hbm [resolvable:$true] %s34_s26 }
   0x4   :  { %16 = vsyncpa [#allocation5], 0  ;;  %s6242_s27 = smov [#allocation6]   ;;  %s58_s8 = sshll.u32 %s6560_s3, 4  ;;  %s59_s8 = int_to_ptr.hbm [resolvable:$true] %s58_s8 }
   0x5   :  { %s36_s28 = sshll.u32 %s6242_s27, 4  ;;  %s6243_s9 = smov 448   ;;  %s37_s28 = int_to_ptr.vmem [resolvable:$true] %s36_s28 }
   0x6   :  { %s6244_s10 = smov 28   ;;  %s6245_s11 = smov [#allocation9]  }
   0x7   :  { %42 = dma.hbm_to_vmem [thread:$0]  %s35_s26, 1792, %s37_s28, [#allocation7], %s6243_s9, %s6243_s9, %s6244_s10  }
   0x8   :  { %s60_s12 = sshll.u32 %s6245_s11, 4  ;;  %s82_s15 = sshll.u32 %s6562_s5, 4  ;;  %s61_s12 = int_to_ptr.vmem [resolvable:$true] %s60_s12  ;;  %s83_s15 = int_to_ptr.hbm [resolvable:$true] %s82_s15 }
   0x9   :  { %66 = dma.hbm_to_vmem [thread:$0]  %s59_s8, 44800, %s61_s12, [#allocation10], %s6243_s9, %s6243_s9, %s6244_s10  }
   0xa   :  { %s6246_s1 = smov [#allocation12]   ;;  %s21_s3 = sshll.u32 %s6557_s0, 4  ;;  %s22_s3 = int_to_ptr.hbm [resolvable:$true] %s21_s3 }
   0xb   :  { %s84_s16 = sshll.u32 %s6246_s1, 4  ;;  %s6247_s19 = smov 64   ;;  %s85_s16 = int_to_ptr.vmem [resolvable:$true] %s84_s16 }
   0xc   :  { %s6248_s20 = smov 4   ;;  %s6249_s21 = smov [#allocation3]  }
   0xd   :  { %90 = dma.hbm_to_vmem [thread:$0]  %s83_s15, 6400, %s85_s16, [#allocation13], %s6247_s19, %s6247_s19, %s6248_s20  }
   0xe   :  { %s23_s22 = sshll.u32 %s6249_s21, 4  ;;  %s6250_s23 = smov 128   ;;  %s24_s22 = int_to_ptr.vmem [resolvable:$true] %s23_s22 }
   0xf   :  { %s6251_s24 = smov 8   ;;  %s48_s26 = sshll.u32 %s6559_s2, 4  ;;  %s49_s26 = int_to_ptr.hbm [resolvable:$true] %s48_s26 }
  0x10   :  { %29 = dma.hbm_to_vmem [thread:$0]  %s22_s3, 256, %s24_s22, [#allocation4], %s6250_s23, %s6250_s23, %s6251_s24  }
  0x11   :  { %s6252_s27 = smov [#allocation8]   ;;  %s72_s30 = sshll.u32 %s6561_s4, 4  ;;  %s73_s30 = int_to_ptr.hbm [resolvable:$true] %s72_s30 }
  0x12   :  { %s50_s0 = sshll.u32 %s6252_s27, 4  ;;  %s6253_s8 = smov [#allocation11]   ;;  %s51_s0 = int_to_ptr.vmem [resolvable:$true] %s50_s0 }
  0x13   :  { %53 = dma.hbm_to_vmem [thread:$0]  %s49_s26, 112, %s51_s0, [#allocation7]  }
  0x14   :  { %s74_s9 = sshll.u32 %s6253_s8, 4  ;;  %s96_s12 = sshll.u32 %s6563_s6, 4  ;;  %s75_s9 = int_to_ptr.vmem [resolvable:$true] %s74_s9  ;;  %s97_s12 = int_to_ptr.hbm [resolvable:$true] %s96_s12 }
  0x15   :  { %77 = dma.hbm_to_vmem [thread:$0]  %s73_s30, 112, %s75_s9, [#allocation10]  }
  0x16   :  { %s6254_s2 = smov [#allocation14]  }
  0x17   :  { %s98_s13 = sshll.u32 %s6254_s2, 4  ;;  %s99_s13 = int_to_ptr.vmem [resolvable:$true] %s98_s13 }
  0x18   :  { %101 = dma.hbm_to_vmem [thread:$0]  %s97_s12, 16, %s99_s13, [#allocation13]  }
  0x19   :  { %6232 = dma.done.wait [#allocation4], 256  }
  0x1a   :  { %6233 = vsyncadd [#allocation4], 4294967040 }
  0x1b   :  { %6234 = dma.done.wait [#allocation7], 1904  }
  0x1c   :  { %6235 = vsyncadd [#allocation7], 4294965392 }
  0x1d   :  { %6236 = dma.done.wait [#allocation10], 44912  }
  0x1e   :  { %6237 = vsyncadd [#allocation10], 4294922384 }
  0x1f   :  { %6238 = dma.done.wait [#allocation13], 6416  }
  0x20   :  { %6239 = vsyncadd [#allocation13], 4294960880  ;;  %v3934_v0 = vld [vmem:[#allocation6 + $0x38] sm:$0xf]  ;;  %v5613_v1 = vld [vmem:[#allocation6 + $0x50] sm:$0xf0] }
  0x21   :  { %v5610_v2 = vld [vmem:[#allocation6 + $0x3c] sm:$0xf]  ;;  %v3935_v3 = vor.u32 %v5613_v1, %v3934_v0  ;;  %v3936_v4 = vld [vmem:[#allocation6 + $0x54] sm:$0xf0]  ;;  %v3942_v5 = vld [vmem:[#allocation6 + $0x40] sm:$0xf] }
  0x22   :  { %v5614_v6 = vld [vmem:[#allocation6 + $0x58] sm:$0xf0]  ;;  %v3939_v7 = vor.u32 %v5610_v2, %v3936_v4  ;;  %v5611_v9 = vld [vmem:[#allocation6 + $0x44] sm:$0xf]  ;;  %v3944_v10 = vld [vmem:[#allocation6 + $0x5c] sm:$0xf0] }
  0x23   :  { %v3943_v8 = vor.u32 %v5614_v6, %v3942_v5  ;;  %v3906_v11 = vld [vmem:[#allocation6] sm:$0xf]  ;;  %252 = vmatpush.bf16.msra.mxu0 %v3935_v3  ;;  %v3947_v12 = vor.u32 %v5611_v9, %v3944_v10  ;;  %v5606_v13 = vld [vmem:[#allocation6 + $0x18] sm:$0xf0]  ;;  %v5603_v14 = vld [vmem:[#allocation6 + $0x4] sm:$0xf] }
  0x24   :  { %v3908_v15 = vld [vmem:[#allocation6 + $0x1c] sm:$0xf0]  ;;  %266 = vmatpush.bf16.msra.mxu1 %v3939_v7  ;;  %v3907_v16 = vor.u32 %v5606_v13, %v3906_v11  ;;  %v3914_v18 = vld [vmem:[#allocation6 + $0x8] sm:$0xf]  ;;  %v5607_v19 = vld [vmem:[#allocation6 + $0x20] sm:$0xf0] }
  0x25   :  { %280 = vmatpush.bf16.msra.mxu2 %v3943_v8  ;;  %v3911_v17 = vor.u32 %v5603_v14, %v3908_v15  ;;  %v5604_v20 = vld [vmem:[#allocation6 + $0xc] sm:$0xf]  ;;  %294 = vmatpush.bf16.msra.mxu3 %v3947_v12  ;;  %v3915_v21 = vor.u32 %v5607_v19, %v3914_v18  ;;  %v3916_v22 = vld [vmem:[#allocation6 + $0x24] sm:$0xf0]  ;;  %v135_v23 = vld [vmem:[#allocation3] sm:$0xff]  ;;  %vm242_vm0 = vcmask 261120  }
  0x26   :  { %v136_v24 = vld [vmem:[#allocation3 + $0x8] sm:$0xff]  ;;  %v3919_v25 = vor.u32 %v5604_v20, %v3916_v22  ;;  %v3950_v27 = vld [vmem:[#allocation6 + $0x48] sm:$0xf]  ;;  %v5615_v28 = vld [vmem:[#allocation6 + $0x60] sm:$0xf0]  ;;  %vm3323_vm1 = vcmask 257024  }
  0x27   :  { %v6320_v26 = vpack.c.bf16 %v136_v24, %v135_v23  ;;  %v5612_v29 = vld [vmem:[#allocation6 + $0x4c] sm:$0xf]  ;;  %253 = vmatpush.bf16.msra.mxu0 %v3907_v16  ;;  %v3951_v30 = vor.u32 %v5615_v28, %v3950_v27  ;;  %v3952_v31 = vld [vmem:[#allocation6 + $0x64] sm:$0xf0]  ;;  %v3958_v32 = vld [vmem:[#allocation6 + $0x50] sm:$0xf] }
  0x28   :  { %v5616_v33 = vld [vmem:[#allocation6 + $0x68] sm:$0xf0]  ;;  %267 = vmatpush.bf16.msra.mxu1 %v3911_v17  ;;  %v3955_v34 = vor.u32 %v5612_v29, %v3952_v31  ;;  %v3922_v36 = vld [vmem:[#allocation6 + $0x10] sm:$0xf]  ;;  %v5605_v38 = vld [vmem:[#allocation6 + $0x14] sm:$0xf] }
  0x29   :  { %281 = vmatpush.bf16.msra.mxu2 %v3915_v21  ;;  %v3959_v35 = vor.u32 %v5616_v33, %v3958_v32  ;;  %v5608_v37 = vld [vmem:[#allocation6 + $0x28] sm:$0xf0]  ;;  %295 = vmatpush.bf16.msra.mxu3 %v3919_v25  ;;  %v3924_v40 = vld [vmem:[#allocation6 + $0x2c] sm:$0xf0]  ;;  %v3930_v41 = vld [vmem:[#allocation6 + $0x18] sm:$0xf] }
  0x2a   :  { %v3923_v39 = vor.u32 %v5608_v37, %v3922_v36  ;;  %v5609_v42 = vld [vmem:[#allocation6 + $0x30] sm:$0xf0]  ;;  %3960 = vmatmul.msk.bf16.vlgmr.msra.gmra.mxu0 %vm242_vm0, %v6320_v26  ;;  %v3927_v43 = vor.u32 %v5605_v38, %v3924_v40  ;;  %v4165_v44 = vld [vmem:[#allocation9 + $0x188] sm:$0xf]  ;;  %v5669_v45 = vld [vmem:[#allocation9 + $0x1a0] sm:$0xf0] }
  0x2b   :  { %308 = vmatpush.bf16.msrb.mxu0 %v3951_v30  ;;  %v4389_v46 = vld [vmem:[#allocation9 + $0x348] sm:$0xf]  ;;  %3961 = vmatmul.msk.bf16.vlgmr.msra.gmra.mxu1 %vm242_vm0, %v6320_v26  ;;  %v4166_v47 = vor.u32 %v5669_v45, %v4165_v44  ;;  %v5725_v48 = vld [vmem:[#allocation9 + $0x360] sm:$0xf0]  ;;  %v4137_v49 = vld [vmem:[#allocation9 + $0x150] sm:$0xf]  ;;  %v3931_v51 = vor.u32 %v5609_v42, %v3930_v41 }
  0x2c   :  { %322 = vmatpush.bf16.msrb.mxu1 %v3955_v34  ;;  %3962 = vmatmul.msk.bf16.vlgmr.msra.gmra.mxu2 %vm242_vm0, %v6320_v26  ;;  %v5662_v50 = vld [vmem:[#allocation9 + $0x168] sm:$0xf0]  ;;  %v4390_v52 = vor.u32 %v5725_v48, %v4389_v46  ;;  %v4361_v53 = vld [vmem:[#allocation9 + $0x310] sm:$0xf]  ;;  %v4837_v55 = vld [vmem:[#allocation9 + $0x6c8] sm:$0xf] }
  0x2d   :  { %3963 = vmatmul.msk.bf16.vlgmr.msra.gmra.mxu3 %vm242_vm0, %v6320_v26  ;;  %336 = vmatpush.bf16.msrb.mxu2 %v3959_v35  ;;  %v5718_v54 = vld [vmem:[#allocation9 + $0x328] sm:$0xf0]  ;;  %v4138_v56 = vor.u32 %v5662_v50, %v4137_v49  ;;  %v5837_v57 = vld [vmem:[#allocation9 + $0x6e0] sm:$0xf0]  ;;  %v4109_v60 = vld [vmem:[#allocation9 + $0x118] sm:$0xf] }
  0x2e   :  { %2598 = vmatpush.bf16.msrb.mxu3 %v4166_v47  ;;  %v4362_v58 = vor.u32 %v5718_v54, %v4361_v53  ;;  %v4838_v59 = vor.u32 %v5837_v57, %v4837_v55  ;;  %v5655_v61 = vld [vmem:[#allocation9 + $0x130] sm:$0xf0]  ;;  %v4809_v62 = vld [vmem:[#allocation9 + $0x690] sm:$0xf]  ;;  %v4333_v63 = vld [vmem:[#allocation9 + $0x2d8] sm:$0xf] }
  0x2f   :  { %309 = vmatpush.bf16.msrb.mxu0 %v3923_v39  ;;  %v5711_v0 = vld [vmem:[#allocation9 + $0x2f0] sm:$0xf0]  ;;  %v5830_v1 = vld [vmem:[#allocation9 + $0x6a8] sm:$0xf0]  ;;  %v4110_v2 = vor.u32 %v5655_v61, %v4109_v60  ;;  %v4081_v4 = vld [vmem:[#allocation9 + $0xe0] sm:$0xf] }
  0x30   :  { %323 = vmatpush.bf16.msrb.mxu1 %v3927_v43  ;;  %v4810_v3 = vor.u32 %v5830_v1, %v4809_v62  ;;  %v4334_v5 = vor.u32 %v5711_v0, %v4333_v63  ;;  %v5648_v6 = vld [vmem:[#allocation9 + $0xf8] sm:$0xf0]  ;;  %v4781_v7 = vld [vmem:[#allocation9 + $0x658] sm:$0xf]  ;;  %v5823_v8 = vld [vmem:[#allocation9 + $0x670] sm:$0xf0] }
  0x31   :  { %337 = vmatpush.bf16.msrb.mxu2 %v3931_v51  ;;  %v4082_v9 = vor.u32 %v5648_v6, %v4081_v4  ;;  %v4305_v10 = vld [vmem:[#allocation9 + $0x2a0] sm:$0xf]  ;;  %v5704_v11 = vld [vmem:[#allocation9 + $0x2b8] sm:$0xf0]  ;;  %v4782_v12 = vor.u32 %v5823_v8, %v4781_v7  ;;  %v4053_v13 = vld [vmem:[#allocation9 + $0xa8] sm:$0xf] }
  0x32   :  { %2599 = vmatpush.bf16.msrb.mxu3 %v4138_v56  ;;  %v5641_v14 = vld [vmem:[#allocation9 + $0xc0] sm:$0xf0]  ;;  %v4753_v15 = vld [vmem:[#allocation9 + $0x620] sm:$0xf]  ;;  %v5816_v16 = vld [vmem:[#allocation9 + $0x638] sm:$0xf0]  ;;  %v4306_v17 = vor.u32 %v5704_v11, %v4305_v10 }
  0x33   :  { %2612 = vmatpush.bf16.msra.mxu0 %v4390_v52  ;;  %v4277_v18 = vld [vmem:[#allocation9 + $0x268] sm:$0xf]  ;;  %v5697_v19 = vld [vmem:[#allocation9 + $0x280] sm:$0xf0]  ;;  %v4054_v20 = vor.u32 %v5641_v14, %v4053_v13  ;;  %v4754_v21 = vor.u32 %v5816_v16, %v4753_v15  ;;  %v4025_v22 = vld [vmem:[#allocation9 + $0x70] sm:$0xf] }
  0x34   :  { %v5634_v23 = vld [vmem:[#allocation9 + $0x88] sm:$0xf0]  ;;  %v4725_v24 = vld [vmem:[#allocation9 + $0x5e8] sm:$0xf]  ;;  %v5809_v25 = vld [vmem:[#allocation9 + $0x600] sm:$0xf0]  ;;  %v4278_v30 = vor.u32 %v5697_v19, %v4277_v18 }
  0x35   :  { %2640 = vmatpush.bf16.msra.mxu2 %v4838_v59  ;;  %v4613_v27 = vld [vmem:[#allocation9 + $0x508] sm:$0xf]  ;;  %v5781_v28 = vld [vmem:[#allocation9 + $0x520] sm:$0xf0]  ;;  %v4249_v31 = vld [vmem:[#allocation9 + $0x230] sm:$0xf]  ;;  %v4026_v33 = vor.u32 %v5634_v23, %v4025_v22  ;;  %v4726_v35 = vor.u32 %v5809_v25, %v4725_v24 }
  0x36   :  { %2600 = vmatpush.bf16.msrb.mxu3 %v4110_v2  ;;  %v4614_v29 = vor.u32 %v5781_v28, %v4613_v27  ;;  %v4585_v32 = vld [vmem:[#allocation9 + $0x4d0] sm:$0xf]  ;;  %v5690_v34 = vld [vmem:[#allocation9 + $0x248] sm:$0xf0]  ;;  %v3997_v36 = vld [vmem:[#allocation9 + $0x38] sm:$0xf] }
  0x37   :  { %2613 = vmatpush.bf16.msra.mxu0 %v4362_v58  ;;  %v5774_v37 = vld [vmem:[#allocation9 + $0x4e8] sm:$0xf0]  ;;  %v5627_v38 = vld [vmem:[#allocation9 + $0x50] sm:$0xf0]  ;;  %v4697_v39 = vld [vmem:[#allocation9 + $0x5b0] sm:$0xf]  ;;  %v4250_v42 = vor.u32 %v5690_v34, %v4249_v31 }
  0x38   :  { %v5802_v40 = vld [vmem:[#allocation9 + $0x5c8] sm:$0xf0]  ;;  %2626 = vmatpush.bf16.msra.mxu1 %v4614_v29  ;;  %v4586_v41 = vor.u32 %v5774_v37, %v4585_v32  ;;  %v4557_v43 = vld [vmem:[#allocation9 + $0x498] sm:$0xf]  ;;  %v5767_v44 = vld [vmem:[#allocation9 + $0x4b0] sm:$0xf0]  ;;  %v3998_v45 = vor.u32 %v5627_v38, %v3997_v36 }
  0x39   :  { %2641 = vmatpush.bf16.msra.mxu2 %v4810_v3  ;;  %v5683_v46 = vld [vmem:[#allocation9 + $0x210] sm:$0xf0]  ;;  %v4698_v47 = vor.u32 %v5802_v40, %v4697_v39  ;;  %v3969_v48 = vld [vmem:[#allocation9] sm:$0xf]  ;;  %v5620_v49 = vld [vmem:[#allocation9 + $0x18] sm:$0xf0]  ;;  %v4558_v52 = vor.u32 %v5767_v44, %v4557_v43 }
  0x3a   :  { %2601 = vmatpush.bf16.msrb.mxu3 %v4082_v9  ;;  %3964 = vmatmul.msk.bf16.vlgmr.msrb.gmra.mxu0 %vm242_vm0, %v6320_v26  ;;  %v4669_v50 = vld [vmem:[#allocation9 + $0x578] sm:$0xf]  ;;  %v5795_v51 = vld [vmem:[#allocation9 + $0x590] sm:$0xf0]  ;;  %v5061_v53 = vld [vmem:[#allocation9 + $0x888] sm:$0xf]  ;;  %v3970_v57 = vor.u32 %v5620_v49, %v3969_v48 }
  0x3b   :  { %2614 = vmatpush.bf16.msra.mxu0 %v4334_v5  ;;  %3965 = vmatmul.msk.bf16.vlgmr.msrb.gmra.mxu1 %vm242_vm0, %v6320_v26  ;;  %v5893_v54 = vld [vmem:[#allocation9 + $0x8a0] sm:$0xf0]  ;;  %v4193_v56 = vld [vmem:[#allocation9 + $0x1c0] sm:$0xf]  ;;  %v5676_v58 = vld [vmem:[#allocation9 + $0x1d8] sm:$0xf0]  ;;  %v4670_v61 = vor.u32 %v5795_v51, %v4669_v50 }
  0x3c   :  { %3966 = vmatmul.msk.bf16.vlgmr.msrb.gmra.mxu2 %vm242_vm0, %v6320_v26  ;;  %v4221_v26 = vld [vmem:[#allocation9 + $0x1f8] sm:$0xf]  ;;  %2627 = vmatpush.bf16.msra.mxu1 %v4586_v41  ;;  %v5285_v59 = vld [vmem:[#allocation9 + $0xa48] sm:$0xf]  ;;  %v5949_v60 = vld [vmem:[#allocation9 + $0xa60] sm:$0xf0]  ;;  %v5062_v62 = vor.u32 %v5893_v54, %v5061_v53  ;;  %v4194_v5 = vor.u32 %v5676_v58, %v4193_v56 }
  0x3d   :  { %2642 = vmatpush.bf16.msra.mxu2 %v4782_v12  ;;  %v4222_v55 = vor.u32 %v5683_v46, %v4221_v26  ;;  %v5033_v63 = vld [vmem:[#allocation9 + $0x850] sm:$0xf]  ;;  %v4641_v0 = vld [vmem:[#allocation9 + $0x540] sm:$0xf]  ;;  %v5788_v1 = vld [vmem:[#allocation9 + $0x558] sm:$0xf0]  ;;  %v5286_v6 = vor.u32 %v5949_v60, %v5285_v59 }
  0x3e   :  { %2602 = vmatpush.bf16.msrb.mxu3 %v4054_v20  ;;  %v5886_v2 = vld [vmem:[#allocation9 + $0x868] sm:$0xf0]  ;;  %v4167_v4 = vld [vmem:[#allocation9 + $0x1a4] sm:$0xf0]  ;;  %v4642_v7 = vor.u32 %v5788_v1, %v4641_v0  ;;  %v5257_v9 = vld [vmem:[#allocation9 + $0xa10] sm:$0xf] }
  0x3f   :  { %2615 = vmatpush.bf16.msra.mxu0 %v4306_v17  ;;  %v5666_v3 = vld [vmem:[#allocation9 + $0x18c] sm:$0xf]  ;;  %v5034_v8 = vor.u32 %v5886_v2, %v5033_v63  ;;  %v5005_v12 = vld [vmem:[#allocation9 + $0x818] sm:$0xf]  ;;  %v5879_v13 = vld [vmem:[#allocation9 + $0x830] sm:$0xf0] }
  0x40   :  { %2628 = vmatpush.bf16.msra.mxu1 %v4558_v52  ;;  %v5942_v10 = vld [vmem:[#allocation9 + $0xa28] sm:$0xf0]  ;;  %v4170_v11 = vor.u32 %v5666_v3, %v4167_v4  ;;  %v5659_v14 = vld [vmem:[#allocation9 + $0x154] sm:$0xf]  ;;  %v4139_v15 = vld [vmem:[#allocation9 + $0x16c] sm:$0xf0]  ;;  %v5006_v17 = vor.u32 %v5879_v13, %v5005_v12 }
  0x41   :  { %2643 = vmatpush.bf16.msra.mxu2 %v4754_v21  ;;  %v5258_v16 = vor.u32 %v5942_v10, %v5257_v9  ;;  %v5229_v18 = vld [vmem:[#allocation9 + $0x9d8] sm:$0xf]  ;;  %v5935_v19 = vld [vmem:[#allocation9 + $0x9f0] sm:$0xf0]  ;;  %v4142_v20 = vor.u32 %v5659_v14, %v4139_v15  ;;  %v4977_v22 = vld [vmem:[#allocation9 + $0x7e0] sm:$0xf] }
  0x42   :  { %2603 = vmatpush.bf16.msrb.mxu3 %v4026_v33  ;;  %v5230_v21 = vor.u32 %v5935_v19, %v5229_v18  ;;  %v5872_v23 = vld [vmem:[#allocation9 + $0x7f8] sm:$0xf0]  ;;  %v5201_v24 = vld [vmem:[#allocation9 + $0x9a0] sm:$0xf]  ;;  %v4111_v33 = vld [vmem:[#allocation9 + $0x134] sm:$0xf0] }
  0x43   :  { %2616 = vmatpush.bf16.msra.mxu0 %v4278_v30  ;;  %v4978_v25 = vor.u32 %v5872_v23, %v4977_v22  ;;  %v5928_v27 = vld [vmem:[#allocation9 + $0x9b8] sm:$0xf0]  ;;  %v4529_v28 = vld [vmem:[#allocation9 + $0x460] sm:$0xf]  ;;  %v5865_v36 = vld [vmem:[#allocation9 + $0x7c0] sm:$0xf0] }
  0x44   :  { %v5760_v29 = vld [vmem:[#allocation9 + $0x478] sm:$0xf0]  ;;  %v5202_v30 = vor.u32 %v5928_v27, %v5201_v24  ;;  %v5173_v37 = vld [vmem:[#allocation9 + $0x968] sm:$0xf]  ;;  %v5921_v39 = vld [vmem:[#allocation9 + $0x980] sm:$0xf0] }
  0x45   :  { %2644 = vmatpush.bf16.msra.mxu2 %v4726_v35  ;;  %v4530_v31 = vor.u32 %v5760_v29, %v4529_v28  ;;  %v5652_v32 = vld [vmem:[#allocation9 + $0x11c] sm:$0xf]  ;;  %v4949_v35 = vld [vmem:[#allocation9 + $0x7a8] sm:$0xf]  ;;  %v5753_v41 = vld [vmem:[#allocation9 + $0x440] sm:$0xf0] }
  0x46   :  { %2604 = vmatpush.bf16.msrb.mxu3 %v3998_v45  ;;  %v4114_v34 = vor.u32 %v5652_v32, %v4111_v33  ;;  %v4950_v38 = vor.u32 %v5865_v36, %v4949_v35  ;;  %v4501_v40 = vld [vmem:[#allocation9 + $0x428] sm:$0xf]  ;;  %v5645_v43 = vld [vmem:[#allocation9 + $0xe4] sm:$0xf]  ;;  %v4083_v44 = vld [vmem:[#allocation9 + $0xfc] sm:$0xf0] }
  0x47   :  { %2617 = vmatpush.bf16.msra.mxu0 %v4250_v42  ;;  %2629 = vmatpush.bf16.msra.mxu1 %v4530_v31  ;;  %v5174_v42 = vor.u32 %v5921_v39, %v5173_v37  ;;  %v4502_v26 = vor.u32 %v5753_v41, %v4501_v40  ;;  %v4086_v45 = vor.u32 %v5645_v43, %v4083_v44  ;;  %v4921_v46 = vld [vmem:[#allocation9 + $0x770] sm:$0xf]  ;;  %v5914_v50 = vld [vmem:[#allocation9 + $0x948] sm:$0xf0]  ;;  %v4893_v58 = vld [vmem:[#allocation9 + $0x738] sm:$0xf] }
  0x48   :  { %v5145_v49 = vld [vmem:[#allocation9 + $0x930] sm:$0xf]  ;;  %v5746_v53 = vld [vmem:[#allocation9 + $0x408] sm:$0xf0]  ;;  %v5851_v59 = vld [vmem:[#allocation9 + $0x750] sm:$0xf0] }
  0x49   :  { %2645 = vmatpush.bf16.msra.mxu2 %v4698_v47  ;;  %v5858_v47 = vld [vmem:[#allocation9 + $0x788] sm:$0xf0]  ;;  %v4473_v51 = vld [vmem:[#allocation9 + $0x3f0] sm:$0xf]  ;;  %v5146_v52 = vor.u32 %v5914_v50, %v5145_v49  ;;  %v5117_v60 = vld [vmem:[#allocation9 + $0x8f8] sm:$0xf] }
  0x4a   :  { %2605 = vmatpush.bf16.msrb.mxu3 %v3970_v57  ;;  %v4922_v48 = vor.u32 %v5858_v47, %v4921_v46  ;;  %v5638_v54 = vld [vmem:[#allocation9 + $0xac] sm:$0xf]  ;;  %v4474_v56 = vor.u32 %v5746_v53, %v4473_v51  ;;  %v4445_v63 = vld [vmem:[#allocation9 + $0x3b8] sm:$0xf]  ;;  %v5739_v0 = vld [vmem:[#allocation9 + $0x3d0] sm:$0xf0] }
  0x4b   :  { %2618 = vmatpush.bf16.msra.mxu0 %v4222_v55  ;;  %2630 = vmatpush.bf16.msra.mxu1 %v4502_v26  ;;  %v4055_v55 = vld [vmem:[#allocation9 + $0xc4] sm:$0xf0]  ;;  %v4446_v2 = vor.u32 %v5739_v0, %v4445_v63  ;;  %v5631_v3 = vld [vmem:[#allocation9 + $0x74] sm:$0xf]  ;;  %v4027_v4 = vld [vmem:[#allocation9 + $0x8c] sm:$0xf0] }
  0x4c   :  { %v4058_v57 = vor.u32 %v5638_v54, %v4055_v55  ;;  %v5900_v10 = vld [vmem:[#allocation9 + $0x8d8] sm:$0xf0]  ;;  %v5341_v15 = vld [vmem:[#allocation9 + $0xab8] sm:$0xf]  ;;  %v5617_v24 = vld [vmem:[#allocation9 + $0x4] sm:$0xf] }
  0x4d   :  { %2646 = vmatpush.bf16.msra.mxu2 %v4670_v61  ;;  %v4894_v61 = vor.u32 %v5851_v59, %v4893_v58  ;;  %v5732_v12 = vld [vmem:[#allocation9 + $0x398] sm:$0xf0]  ;;  %v3999_v19 = vld [vmem:[#allocation9 + $0x54] sm:$0xf0]  ;;  %v5778_v46 = vld [vmem:[#allocation9 + $0x50c] sm:$0xf] }
  0x4e   :  { %2654 = vmatpush.bf16.msra.mxu3 %v5062_v62  ;;  %v5907_v62 = vld [vmem:[#allocation9 + $0x910] sm:$0xf0]  ;;  %v5624_v18 = vld [vmem:[#allocation9 + $0x3c] sm:$0xf]  ;;  %v4615_v47 = vld [vmem:[#allocation9 + $0x524] sm:$0xf0] }
  0x4f   :  { %2619 = vmatpush.bf16.msra.mxu0 %v4194_v5  ;;  %2631 = vmatpush.bf16.msra.mxu1 %v4474_v56  ;;  %v5118_v1 = vor.u32 %v5907_v62, %v5117_v60  ;;  %v4030_v5 = vor.u32 %v5631_v3, %v4027_v4  ;;  %v5956_v22 = vld [vmem:[#allocation9 + $0xa98] sm:$0xf0]  ;;  %v5834_v51 = vld [vmem:[#allocation9 + $0x6cc] sm:$0xf]  ;;  %v4618_v56 = vor.u32 %v5778_v46, %v4615_v47  ;;  %v4587_v62 = vld [vmem:[#allocation9 + $0x4ec] sm:$0xf0] }
  0x50   :  { %v6336_v28 = vld [vmem:[#allocation8] sm:$0x7f]  ;;  %v5827_v63 = vld [vmem:[#allocation9 + $0x694] sm:$0xf]  ;;  %v5813_v46 = vld [vmem:[#allocation9 + $0x624] sm:$0xf] }
  0x51   :  { %2647 = vmatpush.bf16.msra.mxu2 %v4642_v7  ;;  %v5844_v7 = vld [vmem:[#allocation9 + $0x718] sm:$0xf0]  ;;  %v156_v29 = vperm.slane %v6336_v28, 0  ;;  %v157_v31 = vperm.slane %v6336_v28, 1  ;;  %v159_v41 = vperm.slane %v6336_v28, 3  ;;  %v160_v60 = vperm.slane %v6336_v28, 4 }
  0x52   :  { %2655 = vmatpush.bf16.msra.mxu3 %v5034_v8  ;;  %v5089_v8 = vld [vmem:[#allocation9 + $0x8c0] sm:$0xf]  ;;  %s6255_s4 = smov [#allocation15]   ;;  %s3888_s1 = sshll.u32 %s6564_s7, 4  ;;  %s3889_s1 = int_to_ptr.hbm [resolvable:$true] %s3888_s1 }
  0x53   :  { %2668 = vmatpush.bf16.msrb.mxu0 %v5286_v6  ;;  %v4865_v6 = vld [vmem:[#allocation9 + $0x700] sm:$0xf]  ;;  %2632 = vmatpush.bf16.msra.mxu1 %v4446_v2  ;;  %v5090_v13 = vor.u32 %v5900_v10, %v5089_v8  ;;  %v5722_v10 = vld [vmem:[#allocation9 + $0x34c] sm:$0xf]  ;;  %s3886_s6 = sshll.u32 %s6255_s4, 4  ;;  %s3887_s6 = int_to_ptr.vmem [resolvable:$true] %s3886_s6 }
  0x54   :  { %v4866_v9 = vor.u32 %v5844_v7, %v4865_v6  ;;  %v4811_v6 = vld [vmem:[#allocation9 + $0x6ac] sm:$0xf0]  ;;  %v4755_v47 = vld [vmem:[#allocation9 + $0x63c] sm:$0xf0] }
  0x55   :  { %2696 = vmatpush.bf16.msrb.mxu2 %v4170_v11  ;;  %v4417_v11 = vld [vmem:[#allocation9 + $0x380] sm:$0xf] }
  0x56   :  { %2656 = vmatpush.bf16.msra.mxu3 %v5006_v17  ;;  %v4418_v14 = vor.u32 %v5732_v12, %v4417_v11  ;;  %v4391_v11 = vld [vmem:[#allocation9 + $0x364] sm:$0xf0] }
  0x57   :  { %2669 = vmatpush.bf16.msrb.mxu0 %v5258_v16  ;;  %v5963_v16 = vld [vmem:[#allocation9 + $0xad0] sm:$0xf0] }
  0x58   :  { %v5342_v17 = vor.u32 %v5963_v16, %v5341_v15  ;;  %2633 = vmatpush.bf16.msra.mxu1 %v4418_v14  ;;  %v5890_v14 = vld [vmem:[#allocation9 + $0x88c] sm:$0xf]  ;;  %v5063_v15 = vld [vmem:[#allocation9 + $0x8a4] sm:$0xf0] }
  0x59   :  { %2697 = vmatpush.bf16.msrb.mxu2 %v4142_v20  ;;  %v4002_v20 = vor.u32 %v5624_v18, %v3999_v19  ;;  %v4814_v18 = vor.u32 %v5827_v63, %v4811_v6  ;;  %v5764_v19 = vld [vmem:[#allocation9 + $0x49c] sm:$0xf]  ;;  %v5750_v63 = vld [vmem:[#allocation9 + $0x42c] sm:$0xf]  ;;  %v4727_v6 = vld [vmem:[#allocation9 + $0x604] sm:$0xf0] }
  0x5a   :  { %2657 = vmatpush.bf16.msra.mxu3 %v4978_v25  ;;  %v3971_v25 = vld [vmem:[#allocation9 + $0x1c] sm:$0xf0] }
  0x5b   :  { %2670 = vmatpush.bf16.msrb.mxu0 %v5230_v21  ;;  %v5313_v21 = vld [vmem:[#allocation9 + $0xa80] sm:$0xf]  ;;  %v3974_v27 = vor.u32 %v5617_v24, %v3971_v25  ;;  %v5820_v24 = vld [vmem:[#allocation9 + $0x65c] sm:$0xf]  ;;  %v4783_v25 = vld [vmem:[#allocation9 + $0x674] sm:$0xf0] }
  0x5c   :  { %2688 = vmatpush.bf16.msrb.mxu1 %v5342_v17  ;;  %v5314_v23 = vor.u32 %v5956_v22, %v5313_v21 }
  0x5d   :  { %2698 = vmatpush.bf16.msrb.mxu2 %v4114_v34 }
  0x5e   :  { %2658 = vmatpush.bf16.msra.mxu3 %v4950_v38  ;;  %v158_v38 = vperm.slane %v6336_v28, 2 }
  0x5f   :  { %2671 = vmatpush.bf16.msrb.mxu0 %v5202_v30 }
  0x60   :  { %2689 = vmatpush.bf16.msrb.mxu1 %v5314_v23 }
  0x61   :  { %2699 = vmatpush.bf16.msrb.mxu2 %v4086_v45 }
  0x62   :  { %2659 = vmatpush.bf16.msra.mxu3 %v4922_v48 }
  0x63   :  { %2672 = vmatpush.bf16.msrb.mxu0 %v5174_v42 }
  0x65   :  { %2700 = vmatpush.bf16.msrb.mxu2 %v4058_v57  ;;  %v5771_v57 = vld [vmem:[#allocation9 + $0x4d4] sm:$0xf] }
  0x66   :  { %2660 = vmatpush.bf16.msra.mxu3 %v4894_v61 }
  0x67   :  { %2673 = vmatpush.bf16.msrb.mxu0 %v5146_v52  ;;  %v4839_v52 = vld [vmem:[#allocation9 + $0x6e4] sm:$0xf0] }
  0x68   :  { %v4842_v61 = vor.u32 %v5834_v51, %v4839_v52  ;;  %v5708_v52 = vld [vmem:[#allocation9 + $0x2dc] sm:$0xf] }
  0x69   :  { %2701 = vmatpush.bf16.msrb.mxu2 %v4030_v5  ;;  %v161_v5 = vperm.slane %v6336_v28, 5 }
  0x6a   :  { %2661 = vmatpush.bf16.msra.mxu3 %v4866_v9 }
  0x6b   :  { %2674 = vmatpush.bf16.msrb.mxu0 %v5118_v1 }
  0x6d   :  { %2702 = vmatpush.bf16.msrb.mxu2 %v4002_v20  ;;  %v4559_v20 = vld [vmem:[#allocation9 + $0x4b4] sm:$0xf0] }
  0x6f   :  { %2675 = vmatpush.bf16.msrb.mxu0 %v5090_v13  ;;  %v4590_v13 = vor.u32 %v5771_v57, %v4587_v62  ;;  %v5876_v57 = vld [vmem:[#allocation9 + $0x81c] sm:$0xf] }
  0x71   :  { %2703 = vmatpush.bf16.msrb.mxu2 %v3974_v27 }
  0xa7   :  { %v255_v30 = vpop.f32.mrf.mxu0 }
  0xa8   :  { %v269_v32 = vpop.f32.mrf.mxu1  ;;  %v256_v33 = vadd.f32 %v255_v30, %v156_v29  ;;  %v162_v30 = vperm.slane %v6336_v28, 6 }
  0xa9   :  { %v270_v34 = vadd.f32 %v269_v32, %v157_v31  ;;  %v5715_v32 = vld [vmem:[#allocation9 + $0x314] sm:$0xf] }
  0xaa   :  { %v344_v35 = vmul.f32 0.01, %v256_v33 }
  0xab   :  { %v345_v37 = vmul.f32 0.01, %v270_v34 }
  0xac   :  { %v358_v44 = vmax.f32 %v256_v33, %v344_v35  ;;  %v4562_v35 = vor.u32 %v5764_v19, %v4559_v20  ;;  %v5743_v19 = vld [vmem:[#allocation9 + $0x3f4] sm:$0xf] }
  0xad   :  { %v359_v48 = vmax.f32 %v270_v34, %v345_v37  ;;  %v5066_v34 = vor.u32 %v5890_v14, %v5063_v15  ;;  %v5883_v37 = vld [vmem:[#allocation9 + $0x854] sm:$0xf] }
  0xaf   :  { %v283_v36 = vpop.f32.mrf.mxu2  ;;  %v257_v40 = vpop.f32.mrf.mxu0 }
  0xb0   :  { %v297_v39 = vpop.f32.mrf.mxu3  ;;  %v258_v42 = vadd.f32 %v257_v40, %v156_v29  ;;  %v271_v26 = vpop.f32.mrf.mxu1  ;;  %v284_v49 = vadd.f32 %v283_v36, %v158_v38  ;;  %v4363_v36 = vld [vmem:[#allocation9 + $0x32c] sm:$0xf0] }
  0xb1   :  { %v272_v43 = vadd.f32 %v271_v26, %v157_v31  ;;  %v298_v53 = vadd.f32 %v297_v39, %v159_v41  ;;  %v4394_v31 = vor.u32 %v5722_v10, %v4391_v11  ;;  %v5757_v26 = vld [vmem:[#allocation9 + $0x464] sm:$0xf] }
  0xb2   :  { %v351_v45 = vmul.f32 0.01, %v258_v42  ;;  %v346_v0 = vmul.f32 0.01, %v284_v49  ;;  %v5701_v11 = vld [vmem:[#allocation9 + $0x2a4] sm:$0xf] }
  0xb3   :  { %v352_v50 = vmul.f32 0.01, %v272_v43  ;;  %v347_v7 = vmul.f32 0.01, %v298_v53 }
  0xb4   :  { %v365_v54 = vmax.f32 %v258_v42, %v351_v45  ;;  %v360_v21 = vmax.f32 %v284_v49, %v346_v0  ;;  %v4786_v42 = vor.u32 %v5820_v24, %v4783_v25  ;;  %v4503_v0 = vld [vmem:[#allocation9 + $0x444] sm:$0xf0]  ;;  %v4699_v24 = vld [vmem:[#allocation9 + $0x5cc] sm:$0xf0] }
  0xb5   :  { %v366_v55 = vmax.f32 %v272_v43, %v352_v50  ;;  %v361_v27 = vmax.f32 %v298_v53, %v347_v7  ;;  %v4531_v43 = vld [vmem:[#allocation9 + $0x47c] sm:$0xf0]  ;;  %v4366_v50 = vor.u32 %v5715_v32, %v4363_v36  ;;  %v4506_v15 = vor.u32 %v5750_v63, %v4503_v0  ;;  %v5694_v32 = vld [vmem:[#allocation9 + $0x26c] sm:$0xf]  ;;  %v4951_v36 = vld [vmem:[#allocation9 + $0x7c4] sm:$0xf0] }
  0xb6   :  { %v6342_v58 = vpack.c.bf16 %v365_v54, %v358_v44  ;;  %v4223_v63 = vld [vmem:[#allocation9 + $0x214] sm:$0xf0] }
  0xb7   :  { %v285_v59 = vpop.f32.mrf.mxu2  ;;  %v6345_v1 = vpack.c.bf16 %v366_v55, %v359_v48  ;;  %v311_v4 = vpop.f32.mrf.mxu0  ;;  %v4534_v55 = vor.u32 %v5757_v26, %v4531_v43 }
  0xb8   :  { %v286_v2 = vadd.f32 %v285_v59, %v158_v38  ;;  %v299_v3 = vpop.f32.mrf.mxu3  ;;  %v325_v9 = vpop.f32.mrf.mxu1  ;;  %2606 = vmatmul.bf16.vlgmr.msrb.gmra.mxu3 %v6342_v58  ;;  %v6350_v17 = vadd.f32 %v311_v4, %v160_v60  ;;  %v5035_v38 = vld [vmem:[#allocation9 + $0x86c] sm:$0xf0]  ;;  %v5007_v59 = vld [vmem:[#allocation9 + $0x834] sm:$0xf0]  ;;  %v5806_v4 = vld [vmem:[#allocation9 + $0x5ec] sm:$0xf] }
  0xb9   :  { %v300_v8 = vadd.f32 %v299_v3, %v159_v41  ;;  %2620 = vmatmul.bf16.vlgmr.msra.gmra.mxu0 %v6345_v1  ;;  %2724 = vmatpush.bf16.msrb.mxu3 %v4618_v56  ;;  %v6352_v23 = vadd.f32 %v325_v9, %v161_v5  ;;  %v5038_v51 = vor.u32 %v5883_v37, %v5035_v38  ;;  %v4335_v56 = vld [vmem:[#allocation9 + $0x2f4] sm:$0xf0]  ;;  %v5736_v37 = vld [vmem:[#allocation9 + $0x3bc] sm:$0xf] }
  0xba   :  { %v353_v12 = vmul.f32 0.01, %v286_v2  ;;  %2738 = vmatpush.bf16.msra.mxu0 %v4842_v61  ;;  %v348_v40 = vmul.f32 0.01, %v6350_v17  ;;  %v5010_v10 = vor.u32 %v5876_v57, %v5007_v59  ;;  %v5343_v57 = vld [vmem:[#allocation9 + $0xad4] sm:$0xf0] }
  0xbb   :  { %v354_v16 = vmul.f32 0.01, %v300_v8  ;;  %v349_v44 = vmul.f32 0.01, %v6352_v23  ;;  %v4173_v59 = vld [vmem:[#allocation9 + $0x190] sm:$0xf] }
  0xbc   :  { %v367_v22 = vmax.f32 %v286_v2, %v353_v12  ;;  %v362_v61 = vmax.f32 %v6350_v17, %v348_v40  ;;  %v4307_v12 = vld [vmem:[#allocation9 + $0x2bc] sm:$0xf0]  ;;  %v5869_v17 = vld [vmem:[#allocation9 + $0x7e4] sm:$0xf]  ;;  %v4447_v40 = vld [vmem:[#allocation9 + $0x3d4] sm:$0xf0] }
  0xbd   :  { %v368_v29 = vmax.f32 %v300_v8, %v354_v16  ;;  %2725 = vmatpush.bf16.msrb.mxu3 %v4590_v13  ;;  %v363_v2 = vmax.f32 %v6352_v23, %v349_v44  ;;  %v4730_v16 = vor.u32 %v5806_v4, %v4727_v6  ;;  %v5799_v23 = vld [vmem:[#allocation9 + $0x5b4] sm:$0xf]  ;;  %v4310_v25 = vor.u32 %v5701_v11, %v4307_v12  ;;  %v4895_v4 = vld [vmem:[#allocation9 + $0x754] sm:$0xf0]  ;;  %v5673_v12 = vld [vmem:[#allocation9 + $0x1c4] sm:$0xf] }
  0xbe   :  { %v6355_v33 = vpack.c.bf16 %v367_v22, %v360_v21  ;;  %2739 = vmatpush.bf16.msra.mxu0 %v4814_v18  ;;  %v4979_v18 = vld [vmem:[#allocation9 + $0x7fc] sm:$0xf0]  ;;  %v4475_v22 = vld [vmem:[#allocation9 + $0x40c] sm:$0xf0]  ;;  %v5663_v11 = vld [vmem:[#allocation9 + $0x170] sm:$0xf0] }
  0xbf   :  { %v6357_v39 = vpack.c.bf16 %v368_v29, %v361_v27  ;;  %v339_v41 = vpop.f32.mrf.mxu2  ;;  %v313_v45 = vpop.f32.mrf.mxu0  ;;  %v4478_v28 = vor.u32 %v5743_v19, %v4475_v22  ;;  %v4867_v19 = vld [vmem:[#allocation9 + $0x71c] sm:$0xf0]  ;;  %v5287_v22 = vld [vmem:[#allocation9 + $0xa64] sm:$0xf0] }
  0xc0   :  { %2634 = vmatmul.bf16.vlgmr.msra.gmra.mxu1 %v6355_v33  ;;  %v314_v48 = vadd.f32 %v313_v45, %v160_v60  ;;  %v327_v49 = vpop.f32.mrf.mxu1  ;;  %v6365_v53 = vadd.f32 %v339_v41, %v162_v30  ;;  %v4758_v60 = vor.u32 %v5813_v46, %v4755_v47  ;;  %v5792_v41 = vld [vmem:[#allocation9 + $0x57c] sm:$0xf]  ;;  %v5687_v45 = vld [vmem:[#allocation9 + $0x234] sm:$0xf]  ;;  %v4251_v46 = vld [vmem:[#allocation9 + $0x24c] sm:$0xf0] }
  0xc1   :  { %2648 = vmatmul.bf16.vlgmr.msra.gmra.mxu2 %v6357_v39  ;;  %2710 = vmatpush.bf16.msra.mxu1 %v4394_v31  ;;  %v328_v54 = vadd.f32 %v327_v49, %v161_v5  ;;  %v4338_v5 = vor.u32 %v5708_v52, %v4335_v56  ;;  %v4982_v31 = vor.u32 %v5869_v17, %v4979_v18  ;;  %v5855_v47 = vld [vmem:[#allocation9 + $0x774] sm:$0xf]  ;;  %v4419_v52 = vld [vmem:[#allocation9 + $0x39c] sm:$0xf0]  ;;  %v4621_v17 = vld [vmem:[#allocation9 + $0x510] sm:$0xf] }
  0xc2   :  { %2752 = vmatpush.bf16.msra.mxu2 %v5066_v34  ;;  %2726 = vmatpush.bf16.msrb.mxu3 %v4562_v35  ;;  %v355_v62 = vmul.f32 0.01, %v314_v48  ;;  %v350_v8 = vmul.f32 0.01, %v6365_v53  ;;  %v4279_v34 = vld [vmem:[#allocation9 + $0x284] sm:$0xf0]  ;;  %v4254_v56 = vor.u32 %v5687_v45, %v4251_v46 }
  0xc3   :  { %2740 = vmatpush.bf16.msra.mxu0 %v4786_v42  ;;  %v356_v3 = vmul.f32 0.01, %v328_v54  ;;  %v5862_v35 = vld [vmem:[#allocation9 + $0x7ac] sm:$0xf]  ;;  %v4671_v42 = vld [vmem:[#allocation9 + $0x594] sm:$0xf0]  ;;  %v4282_v26 = vor.u32 %v5694_v32, %v4279_v34 }
  0xc4   :  { %v369_v7 = vmax.f32 %v314_v48, %v355_v62  ;;  %v364_v27 = vmax.f32 %v6365_v53, %v350_v8  ;;  %v4954_v44 = vor.u32 %v5862_v35, %v4951_v36  ;;  %v4450_v48 = vor.u32 %v5736_v37, %v4447_v40  ;;  %v5785_v53 = vld [vmem:[#allocation9 + $0x544] sm:$0xf]  ;;  %v5315_v8 = vld [vmem:[#allocation9 + $0xa9c] sm:$0xf0]  ;;  %v5782_v18 = vld [vmem:[#allocation9 + $0x528] sm:$0xf0] }
  0xc5   :  { %2711 = vmatpush.bf16.msra.mxu1 %v4366_v50  ;;  %v370_v9 = vmax.f32 %v328_v54, %v356_v3  ;;  %v4674_v49 = vor.u32 %v5792_v41, %v4671_v42  ;;  %v4923_v50 = vld [vmem:[#allocation9 + $0x78c] sm:$0xf0]  ;;  %v4643_v54 = vld [vmem:[#allocation9 + $0x55c] sm:$0xf0]  ;;  %v5848_v3 = vld [vmem:[#allocation9 + $0x73c] sm:$0xf] }
  0xc6   :  { %2753 = vmatpush.bf16.msra.mxu2 %v5038_v51  ;;  %2727 = vmatpush.bf16.msrb.mxu3 %v4534_v55  ;;  %v6370_v13 = vpack.c.bf16 %v369_v7, %v362_v61  ;;  %v5729_v51 = vld [vmem:[#allocation9 + $0x384] sm:$0xf]  ;;  %v5960_v55 = vld [vmem:[#allocation9 + $0xabc] sm:$0xf]  ;;  %v5670_v61 = vld [vmem:[#allocation9 + $0x1a8] sm:$0xf0]  ;;  %v4926_v62 = vor.u32 %v5855_v47, %v4923_v50 }
  0xc7   :  { %2741 = vmatpush.bf16.msra.mxu0 %v4758_v60  ;;  %v341_v14 = vpop.f32.mrf.mxu2  ;;  %v6372_v20 = vpack.c.bf16 %v370_v9, %v363_v2  ;;  %v5680_v60 = vld [vmem:[#allocation9 + $0x1fc] sm:$0xf]  ;;  %v4422_v0 = vor.u32 %v5729_v51, %v4419_v52  ;;  %v4646_v2 = vor.u32 %v5785_v53, %v4643_v54  ;;  %v5346_v6 = vor.u32 %v5960_v55, %v5343_v57  ;;  %v4145_v9 = vld [vmem:[#allocation9 + $0x158] sm:$0xf]  ;;  %v4117_v32 = vld [vmem:[#allocation9 + $0x120] sm:$0xf] }
  0xc8   :  { %v342_v21 = vadd.f32 %v341_v14, %v162_v30  ;;  %2662 = vmatmul.bf16.vlgmr.msra.gmra.mxu3 %v6370_v13  ;;  %v4702_v30 = vor.u32 %v5799_v23, %v4699_v24  ;;  %v4174_v7 = vor.u32 %v5670_v61, %v4173_v59  ;;  %v4195_v14 = vld [vmem:[#allocation9 + $0x1dc] sm:$0xf0]  ;;  %v4146_v24 = vor.u32 %v5663_v11, %v4145_v9  ;;  %v5656_v34 = vld [vmem:[#allocation9 + $0x138] sm:$0xf0]  ;;  %v4593_v35 = vld [vmem:[#allocation9 + $0x4d8] sm:$0xf] }
  0xc9   :  { %2712 = vmatpush.bf16.msra.mxu1 %v4338_v5  ;;  %2676 = vmatmul.bf16.vlgmr.msrb.gmra.mxu0 %v6372_v20  ;;  %v5953_v5 = vld [vmem:[#allocation9 + $0xa84] sm:$0xf]  ;;  %v5775_v36 = vld [vmem:[#allocation9 + $0x4f0] sm:$0xf0]  ;;  %v5259_v40 = vld [vmem:[#allocation9 + $0xa2c] sm:$0xf0]  ;;  %v4118_v41 = vor.u32 %v5656_v34, %v4117_v32 }
  0xca   :  { %v357_v29 = vmul.f32 0.01, %v342_v21  ;;  %2754 = vmatpush.bf16.msra.mxu2 %v5010_v10  ;;  %2728 = vmatpush.bf16.msrb.mxu3 %v4506_v15  ;;  %v4226_v10 = vor.u32 %v5680_v60, %v4223_v63  ;;  %v4898_v15 = vor.u32 %v5848_v3, %v4895_v4  ;;  %v5318_v23 = vor.u32 %v5953_v5, %v5315_v8  ;;  %v4369_v42 = vld [vmem:[#allocation9 + $0x318] sm:$0xf]  ;;  %v4089_v45 = vld [vmem:[#allocation9 + $0xe8] sm:$0xf] }
  0xcb   :  { %2742 = vmatpush.bf16.msra.mxu0 %v4730_v16  ;;  %v5841_v16 = vld [vmem:[#allocation9 + $0x704] sm:$0xf]  ;;  %v5932_v51 = vld [vmem:[#allocation9 + $0x9dc] sm:$0xf]  ;;  %v5231_v52 = vld [vmem:[#allocation9 + $0x9f4] sm:$0xf0] }
  0xcc   :  { %v371_v38 = vmax.f32 %v342_v21, %v357_v29  ;;  %v5946_v21 = vld [vmem:[#allocation9 + $0xa4c] sm:$0xf]  ;;  %v4198_v29 = vor.u32 %v5673_v12, %v4195_v14  ;;  %v5649_v46 = vld [vmem:[#allocation9 + $0x100] sm:$0xf0]  ;;  %v4341_v54 = vld [vmem:[#allocation9 + $0x2e0] sm:$0xf]  ;;  %v5234_v61 = vor.u32 %v5932_v51, %v5231_v52 }
  0xcd   :  { %2713 = vmatpush.bf16.msra.mxu1 %v4310_v25  ;;  %v4397_v25 = vld [vmem:[#allocation9 + $0x350] sm:$0xf]  ;;  %v4090_v53 = vor.u32 %v5649_v46, %v4089_v45  ;;  %v5712_v55 = vld [vmem:[#allocation9 + $0x2f8] sm:$0xf0]  ;;  %v5642_v59 = vld [vmem:[#allocation9 + $0xc8] sm:$0xf0] }
  0xce   :  { %v6379_v43 = vpack.c.bf16 %v371_v38, %v364_v27  ;;  %2755 = vmatpush.bf16.msra.mxu2 %v4982_v31  ;;  %2729 = vmatpush.bf16.msrb.mxu3 %v4478_v28  ;;  %v5726_v27 = vld [vmem:[#allocation9 + $0x368] sm:$0xf0]  ;;  %v4622_v31 = vor.u32 %v5782_v18, %v4621_v17  ;;  %v4870_v28 = vor.u32 %v5841_v16, %v4867_v19  ;;  %v5939_v38 = vld [vmem:[#allocation9 + $0xa14] sm:$0xf]  ;;  %v4061_v57 = vld [vmem:[#allocation9 + $0xb0] sm:$0xf] }
  0xcf   :  { %2743 = vmatpush.bf16.msra.mxu0 %v4702_v30  ;;  %v5290_v30 = vor.u32 %v5946_v21, %v5287_v22  ;;  %v4398_v37 = vor.u32 %v5726_v27, %v4397_v25  ;;  %v5262_v47 = vor.u32 %v5939_v38, %v5259_v40  ;;  %v5761_v60 = vld [vmem:[#allocation9 + $0x480] sm:$0xf0]  ;;  %v4342_v63 = vor.u32 %v5712_v55, %v4341_v54  ;;  %v4313_v4 = vld [vmem:[#allocation9 + $0x2a8] sm:$0xf]  ;;  %v4033_v5 = vld [vmem:[#allocation9 + $0x78] sm:$0xf] }
  0xd0   :  { %5367 = vmatmul.msk.bf16.vlgmr.msrb.gmra.mxu1 %vm242_vm0, %v6379_v43  ;;  %v4062_v3 = vor.u32 %v5642_v59, %v4061_v57  ;;  %v5635_v8 = vld [vmem:[#allocation9 + $0x90] sm:$0xf0]  ;;  %v5754_v11 = vld [vmem:[#allocation9 + $0x448] sm:$0xf0]  ;;  %v4285_v17 = vld [vmem:[#allocation9 + $0x270] sm:$0xf] }
  0xd1   :  { %2704 = vmatmul.bf16.vlgmr.msrb.gmra.mxu2 %v6342_v58  ;;  %2714 = vmatpush.bf16.msra.mxu1 %v4282_v26  ;;  %v5719_v26 = vld [vmem:[#allocation9 + $0x330] sm:$0xf0]  ;;  %v5918_v14 = vld [vmem:[#allocation9 + $0x96c] sm:$0xf]  ;;  %v4034_v16 = vor.u32 %v5635_v8, %v4033_v5  ;;  %v4005_v21 = vld [vmem:[#allocation9 + $0x40] sm:$0xf] }
  0xd2   :  { %2756 = vmatpush.bf16.msra.mxu2 %v4954_v44  ;;  %2730 = vmatpush.bf16.msrb.mxu3 %v4450_v48  ;;  %v4594_v44 = vor.u32 %v5775_v36, %v4593_v35  ;;  %v4565_v48 = vld [vmem:[#allocation9 + $0x4a0] sm:$0xf]  ;;  %v4370_v50 = vor.u32 %v5719_v26, %v4369_v42  ;;  %v5698_v18 = vld [vmem:[#allocation9 + $0x288] sm:$0xf0]  ;;  %v5628_v22 = vld [vmem:[#allocation9 + $0x58] sm:$0xf0] }
  0xd3   :  { %2744 = vmatpush.bf16.msra.mxu0 %v4674_v49  ;;  %v5768_v49 = vld [vmem:[#allocation9 + $0x4b8] sm:$0xf0]  ;;  %v5747_v25 = vld [vmem:[#allocation9 + $0x410] sm:$0xf0]  ;;  %v4286_v27 = vor.u32 %v5698_v18, %v4285_v17  ;;  %v4006_v32 = vor.u32 %v5628_v22, %v4005_v21  ;;  %v4257_v34 = vld [vmem:[#allocation9 + $0x238] sm:$0xf] }
  0xd4   :  { %v3977_v35 = vld [vmem:[#allocation9 + $0x8] sm:$0xf]  ;;  %v5621_v36 = vld [vmem:[#allocation9 + $0x20] sm:$0xf0]  ;;  %v5740_v40 = vld [vmem:[#allocation9 + $0x3d8] sm:$0xf0] }
  0xd5   :  { %2715 = vmatpush.bf16.msra.mxu1 %v4254_v56  ;;  %v4566_v56 = vor.u32 %v5768_v49, %v4565_v48  ;;  %v5894_v42 = vld [vmem:[#allocation9 + $0x8a8] sm:$0xf0]  ;;  %v5119_v45 = vld [vmem:[#allocation9 + $0x914] sm:$0xf0]  ;;  %v3978_v46 = vor.u32 %v5621_v36, %v3977_v35  ;;  %v5684_v48 = vld [vmem:[#allocation9 + $0x218] sm:$0xf0] }
  0xd6   :  { %2757 = vmatpush.bf16.msra.mxu2 %v4926_v62  ;;  %2731 = vmatpush.bf16.msrb.mxu3 %v4422_v0  ;;  %v4537_v62 = vld [vmem:[#allocation9 + $0x468] sm:$0xf]  ;;  %v5925_v0 = vld [vmem:[#allocation9 + $0x9a4] sm:$0xf]  ;;  %v5887_v55 = vld [vmem:[#allocation9 + $0x870] sm:$0xf0] }
  0xd7   :  { %2745 = vmatpush.bf16.msra.mxu0 %v4646_v2  ;;  %v5203_v2 = vld [vmem:[#allocation9 + $0x9bc] sm:$0xf0]  ;;  %v4425_v51 = vld [vmem:[#allocation9 + $0x388] sm:$0xf]  ;;  %v5733_v52 = vld [vmem:[#allocation9 + $0x3a0] sm:$0xf0] }
  0xd8   :  { %v5206_v9 = vor.u32 %v5925_v0, %v5203_v2  ;;  %v5091_v57 = vld [vmem:[#allocation9 + $0x8dc] sm:$0xf0]  ;;  %v4845_v0 = vld [vmem:[#allocation9 + $0x6d0] sm:$0xf]  ;;  %v5838_v2 = vld [vmem:[#allocation9 + $0x6e8] sm:$0xf0] }
  0xd9   :  { %2716 = vmatpush.bf16.msra.mxu1 %v4226_v10  ;;  %2732 = vmatmul.bf16.vlgmr.msrb.gmra.mxu3 %v6355_v33  ;;  %v4509_v10 = vld [vmem:[#allocation9 + $0x430] sm:$0xf]  ;;  %v5831_v18 = vld [vmem:[#allocation9 + $0x6b0] sm:$0xf0]  ;;  %v5716_v35 = vld [vmem:[#allocation9 + $0x31c] sm:$0xf] }
  0xda   :  { %2786 = vmatpush.bf16.msra.mxu3 %v5346_v6  ;;  %2758 = vmatpush.bf16.msra.mxu2 %v4898_v15  ;;  %v5705_v6 = vld [vmem:[#allocation9 + $0x2c0] sm:$0xf0]  ;;  %v5175_v15 = vld [vmem:[#allocation9 + $0x984] sm:$0xf0]  ;;  %v4510_v19 = vor.u32 %v5754_v11, %v4509_v10  ;;  %v5880_v10 = vld [vmem:[#allocation9 + $0x838] sm:$0xf0] }
  0xdb   :  { %2794 = vmatpush.bf16.msrb.mxu0 %v4174_v7  ;;  %v4538_v7 = vor.u32 %v5761_v60, %v4537_v62  ;;  %v4314_v12 = vor.u32 %v5705_v6, %v4313_v4  ;;  %v5349_v62 = vld [vmem:[#allocation9 + $0xac0] sm:$0xf]  ;;  %v5964_v60 = vld [vmem:[#allocation9 + $0xad8] sm:$0xf0]  ;;  %v5293_v6 = vld [vmem:[#allocation9 + $0xa50] sm:$0xf] }
  0xdc   :  { %2746 = vmatmul.bf16.vlgmr.msra.gmra.mxu0 %v6357_v39  ;;  %v5350_v8 = vor.u32 %v5964_v60, %v5349_v62  ;;  %v4399_v21 = vld [vmem:[#allocation9 + $0x36c] sm:$0xf0]  ;;  %v4371_v36 = vld [vmem:[#allocation9 + $0x334] sm:$0xf0]  ;;  %v5702_v62 = vld [vmem:[#allocation9 + $0x2ac] sm:$0xf] }
  0xdd   :  { %2717 = vmatpush.bf16.msra.mxu1 %v4198_v29  ;;  %v5911_v29 = vld [vmem:[#allocation9 + $0x934] sm:$0xf]  ;;  %v4315_v60 = vld [vmem:[#allocation9 + $0x2c4] sm:$0xf0] }
  0xde   :  { %2787 = vmatpush.bf16.msra.mxu3 %v5318_v23  ;;  %2759 = vmatpush.bf16.msra.mxu2 %v4870_v28  ;;  %v5178_v23 = vor.u32 %v5918_v14, %v5175_v15  ;;  %v5691_v28 = vld [vmem:[#allocation9 + $0x250] sm:$0xf0]  ;;  %v5321_v14 = vld [vmem:[#allocation9 + $0xa88] sm:$0xf]  ;;  %v5957_v15 = vld [vmem:[#allocation9 + $0xaa0] sm:$0xf0] }
  0xdf   :  { %2795 = vmatpush.bf16.msrb.mxu0 %v4146_v24  ;;  %v4481_v24 = vld [vmem:[#allocation9 + $0x3f8] sm:$0xf]  ;;  %v4258_v26 = vor.u32 %v5691_v28, %v4257_v34  ;;  %v4789_v34 = vld [vmem:[#allocation9 + $0x660] sm:$0xf] }
  0xe0   :  { %2718 = vmatmul.bf16.vlgmr.msra.gmra.mxu1 %v6345_v1 }
  0xe1   :  { %2766 = vmatpush.bf16.msrb.mxu1 %v5290_v30  ;;  %2760 = vmatmul.bf16.vlgmr.msra.gmra.mxu2 %v6370_v13  ;;  %v4482_v30 = vor.u32 %v5747_v25, %v4481_v24  ;;  %v5943_v24 = vld [vmem:[#allocation9 + $0xa30] sm:$0xf0]  ;;  %v5322_v25 = vor.u32 %v5957_v15, %v5321_v14  ;;  %v5153_v14 = vld [vmem:[#allocation9 + $0x938] sm:$0xf] }
  0xe2   :  { %2822 = vmatpush.bf16.msrb.mxu3 %v4622_v31  ;;  %2808 = vmatpush.bf16.msrb.mxu2 %v4398_v37  ;;  %v5147_v31 = vld [vmem:[#allocation9 + $0x94c] sm:$0xf0]  ;;  %v4453_v37 = vld [vmem:[#allocation9 + $0x3c0] sm:$0xf]  ;;  %v5915_v15 = vld [vmem:[#allocation9 + $0x950] sm:$0xf0] }
  0xe3   :  { %2796 = vmatpush.bf16.msrb.mxu0 %v4118_v41  ;;  %v5150_v38 = vor.u32 %v5911_v29, %v5147_v31  ;;  %v5069_v41 = vld [vmem:[#allocation9 + $0x890] sm:$0xf]  ;;  %v4454_v49 = vor.u32 %v5740_v40, %v4453_v37  ;;  %v5873_v29 = vld [vmem:[#allocation9 + $0x800] sm:$0xf0]  ;;  %v5936_v40 = vld [vmem:[#allocation9 + $0x9f8] sm:$0xf0] }
  0xe5   :  { %2767 = vmatpush.bf16.msrb.mxu1 %v5262_v47  ;;  %v4229_v47 = vld [vmem:[#allocation9 + $0x200] sm:$0xf] }
  0xe6   :  { %2823 = vmatpush.bf16.msrb.mxu3 %v4594_v44  ;;  %2809 = vmatpush.bf16.msrb.mxu2 %v4370_v50  ;;  %v5904_v44 = vld [vmem:[#allocation9 + $0x8fc] sm:$0xf]  ;;  %v5070_v50 = vor.u32 %v5894_v42, %v5069_v41  ;;  %v4230_v59 = vor.u32 %v5684_v48, %v4229_v47  ;;  %v4957_v41 = vld [vmem:[#allocation9 + $0x7b0] sm:$0xf]  ;;  %v5866_v42 = vld [vmem:[#allocation9 + $0x7c8] sm:$0xf0] }
  0xe7   :  { %2797 = vmatpush.bf16.msrb.mxu0 %v4090_v53  ;;  %v5041_v53 = vld [vmem:[#allocation9 + $0x858] sm:$0xf]  ;;  %v5122_v54 = vor.u32 %v5904_v44, %v5119_v45  ;;  %v4374_v44 = vor.u32 %v5716_v35, %v4371_v36  ;;  %v4761_v45 = vld [vmem:[#allocation9 + $0x628] sm:$0xf]  ;;  %v5817_v47 = vld [vmem:[#allocation9 + $0x640] sm:$0xf0] }
  0xe8   :  { %v5042_v4 = vor.u32 %v5887_v55, %v5041_v53  ;;  %v5709_v48 = vld [vmem:[#allocation9 + $0x2e4] sm:$0xf]  ;;  %v4929_v53 = vld [vmem:[#allocation9 + $0x778] sm:$0xf]  ;;  %v4762_v55 = vor.u32 %v5817_v47, %v4761_v45  ;;  %v4175_v47 = vld [vmem:[#allocation9 + $0x1ac] sm:$0xf0] }
  0xe9   :  { %2768 = vmatpush.bf16.msrb.mxu1 %v5234_v61  ;;  %5368 = vmatmul.msk.bf16.vlgmr.msra.gmra.mxu3 %vm242_vm0, %v6379_v43  ;;  %v4201_v61 = vld [vmem:[#allocation9 + $0x1c8] sm:$0xf]  ;;  %v5901_v45 = vld [vmem:[#allocation9 + $0x8e0] sm:$0xf0] }
  0xea   :  { %2824 = vmatpush.bf16.msrb.mxu3 %v4566_v56  ;;  %2810 = vmatpush.bf16.msrb.mxu2 %v4342_v63  ;;  %v5897_v56 = vld [vmem:[#allocation9 + $0x8c4] sm:$0xf] }
  0xeb   :  { %2798 = vmatpush.bf16.msrb.mxu0 %v4062_v3  ;;  %v5677_v63 = vld [vmem:[#allocation9 + $0x1e0] sm:$0xf0]  ;;  %v4426_v3 = vor.u32 %v5733_v52, %v4425_v51  ;;  %v5094_v5 = vor.u32 %v5897_v56, %v5091_v57  ;;  %v5209_v51 = vld [vmem:[#allocation9 + $0x9a8] sm:$0xf]  ;;  %v4733_v57 = vld [vmem:[#allocation9 + $0x5f0] sm:$0xf] }
  0xec   :  { %v4202_v11 = vor.u32 %v5677_v63, %v4201_v61  ;;  %v5929_v52 = vld [vmem:[#allocation9 + $0x9c0] sm:$0xf0]  ;;  %v5810_v61 = vld [vmem:[#allocation9 + $0x608] sm:$0xf0] }
  0xed   :  { %2769 = vmatpush.bf16.msrb.mxu1 %v5206_v9  ;;  %v5013_v9 = vld [vmem:[#allocation9 + $0x820] sm:$0xf] }
  0xee   :  { %2825 = vmatpush.bf16.msrb.mxu3 %v4538_v7  ;;  %2811 = vmatpush.bf16.msrb.mxu2 %v4314_v12  ;;  %v5950_v7 = vld [vmem:[#allocation9 + $0xa68] sm:$0xf0]  ;;  %v4846_v12 = vor.u32 %v5838_v2, %v4845_v0  ;;  %v5014_v22 = vor.u32 %v5880_v10, %v5013_v9  ;;  %v5181_v0 = vld [vmem:[#allocation9 + $0x970] sm:$0xf]  ;;  %v5803_v9 = vld [vmem:[#allocation9 + $0x5d0] sm:$0xf0] }
  0xef   :  { %2799 = vmatpush.bf16.msrb.mxu0 %v4034_v16  ;;  %v4817_v16 = vld [vmem:[#allocation9 + $0x698] sm:$0xf]  ;;  %v5294_v17 = vor.u32 %v5950_v7, %v5293_v6  ;;  %v5922_v2 = vld [vmem:[#allocation9 + $0x988] sm:$0xf0]  ;;  %v4734_v6 = vor.u32 %v5810_v61, %v4733_v57  ;;  %v4318_v7 = vor.u32 %v5702_v62, %v4315_v60  ;;  %v5695_v10 = vld [vmem:[#allocation9 + $0x274] sm:$0xf] }
  0xf0   :  { %v4818_v31 = vor.u32 %v5831_v18, %v4817_v16  ;;  %v4873_v16 = vld [vmem:[#allocation9 + $0x708] sm:$0xf]  ;;  %v5674_v57 = vld [vmem:[#allocation9 + $0x1cc] sm:$0xf]  ;;  %v5660_v61 = vld [vmem:[#allocation9 + $0x15c] sm:$0xf] }
  0xf1   :  { %2770 = vmatpush.bf16.msrb.mxu1 %v5178_v23  ;;  %v5265_v23 = vld [vmem:[#allocation9 + $0xa18] sm:$0xf] }
  0xf2   :  { %2826 = vmatpush.bf16.msrb.mxu3 %v4510_v19  ;;  %2812 = vmatpush.bf16.msrb.mxu2 %v4286_v27  ;;  %v5723_v19 = vld [vmem:[#allocation9 + $0x354] sm:$0xf]  ;;  %v4985_v27 = vld [vmem:[#allocation9 + $0x7e8] sm:$0xf]  ;;  %v5266_v28 = vor.u32 %v5943_v24, %v5265_v23  ;;  %v4677_v23 = vld [vmem:[#allocation9 + $0x580] sm:$0xf]  ;;  %v5154_v24 = vor.u32 %v5915_v15, %v5153_v14 }
  0xf3   :  { %2800 = vmatpush.bf16.msrb.mxu0 %v4006_v32  ;;  %v4402_v32 = vor.u32 %v5723_v19, %v4399_v21  ;;  %v4986_v37 = vor.u32 %v5873_v29, %v4985_v27  ;;  %v5779_v21 = vld [vmem:[#allocation9 + $0x514] sm:$0xf]  ;;  %v5688_v27 = vld [vmem:[#allocation9 + $0x23c] sm:$0xf]  ;;  %v4259_v29 = vld [vmem:[#allocation9 + $0x254] sm:$0xf0] }
  0xf4   :  { %v4262_v36 = vor.u32 %v5688_v27, %v4259_v29  ;;  %v4147_v60 = vld [vmem:[#allocation9 + $0x174] sm:$0xf0]  ;;  %v5940_v14 = vld [vmem:[#allocation9 + $0xa1c] sm:$0xf]  ;;  %v4091_v27 = vld [vmem:[#allocation9 + $0x104] sm:$0xf0] }
  0xf5   :  { %2771 = vmatpush.bf16.msrb.mxu1 %v5150_v38  ;;  %v5237_v38 = vld [vmem:[#allocation9 + $0x9e0] sm:$0xf]  ;;  %v5267_v15 = vld [vmem:[#allocation9 + $0xa34] sm:$0xf0]  ;;  %v5933_v29 = vld [vmem:[#allocation9 + $0x9e4] sm:$0xf] }
  0xf6   :  { %2827 = vmatpush.bf16.msrb.mxu3 %v4482_v30  ;;  %2813 = vmatpush.bf16.msrb.mxu2 %v4258_v26  ;;  %v5824_v30 = vld [vmem:[#allocation9 + $0x678] sm:$0xf0] }
  0xf7   :  { %2801 = vmatpush.bf16.msrb.mxu0 %v3978_v46  ;;  %v4790_v26 = vor.u32 %v5824_v30, %v4789_v34  ;;  %v5238_v46 = vor.u32 %v5936_v40, %v5237_v38  ;;  %v5908_v34 = vld [vmem:[#allocation9 + $0x918] sm:$0xf0]  ;;  %v4649_v38 = vld [vmem:[#allocation9 + $0x548] sm:$0xf]  ;;  %v5789_v40 = vld [vmem:[#allocation9 + $0x560] sm:$0xf0] }
  0xf8   :  { %v5772_v30 = vld [vmem:[#allocation9 + $0x4dc] sm:$0xf] }
  0xf9   :  { %2772 = vmatpush.bf16.msrb.mxu1 %v5122_v54  ;;  %v5859_v54 = vld [vmem:[#allocation9 + $0x790] sm:$0xf0] }
  0xfa   :  { %2828 = vmatpush.bf16.msrb.mxu3 %v4454_v49  ;;  %2814 = vmatpush.bf16.msrb.mxu2 %v4230_v59  ;;  %v4343_v49 = vld [vmem:[#allocation9 + $0x2fc] sm:$0xf0]  ;;  %v5210_v59 = vor.u32 %v5929_v52, %v5209_v51  ;;  %v4930_v63 = vor.u32 %v5859_v54, %v4929_v53  ;;  %v4650_v51 = vor.u32 %v5789_v40, %v4649_v38  ;;  %v5765_v53 = vld [vmem:[#allocation9 + $0x4a4] sm:$0xf]  ;;  %v5639_v38 = vld [vmem:[#allocation9 + $0xb4] sm:$0xf] }
  0xfb   :  { %2850 = vmatpush.bf16.msra.mxu0 %v5070_v50  ;;  %v4958_v50 = vor.u32 %v5866_v42, %v4957_v41  ;;  %v4346_v56 = vor.u32 %v5709_v48, %v4343_v49  ;;  %v5097_v42 = vld [vmem:[#allocation9 + $0x8c8] sm:$0xf]  ;;  %v5835_v49 = vld [vmem:[#allocation9 + $0x6d4] sm:$0xf]  ;;  %v4567_v54 = vld [vmem:[#allocation9 + $0x4bc] sm:$0xf0] }
  0xfc   :  { %2802 = vmatmul.bf16.vlgmr.msrb.gmra.mxu0 %v6342_v58 }
  0xfd   :  { %2773 = vmatpush.bf16.msrb.mxu1 %v5094_v5  ;;  %v4705_v5 = vld [vmem:[#allocation9 + $0x5b8] sm:$0xf] }
  0xfe   :  { %2829 = vmatpush.bf16.msrb.mxu3 %v4426_v3  ;;  %2815 = vmatpush.bf16.msrb.mxu2 %v4202_v11  ;;  %v4901_v3 = vld [vmem:[#allocation9 + $0x740] sm:$0xf]  ;;  %v4287_v11 = vld [vmem:[#allocation9 + $0x28c] sm:$0xf0]  ;;  %v4706_v18 = vor.u32 %v5803_v9, %v4705_v5  ;;  %v4539_v5 = vld [vmem:[#allocation9 + $0x484] sm:$0xf0] }
  0xff   :  { %2851 = vmatpush.bf16.msra.mxu0 %v5042_v4  ;;  %v5852_v4 = vld [vmem:[#allocation9 + $0x758] sm:$0xf0]  ;;  %v4290_v19 = vor.u32 %v5695_v10, %v4287_v11  ;;  %v5653_v10 = vld [vmem:[#allocation9 + $0x124] sm:$0xf] }
 0x100   :  { %2774 = vmatmul.bf16.vlgmr.msrb.gmra.mxu1 %v6372_v20 }
 0x101   :  { %2836 = vmatpush.bf16.msra.mxu1 %v4846_v12  ;;  %2830 = vmatmul.bf16.vlgmr.msrb.gmra.mxu3 %v6355_v33  ;;  %v4902_v12 = vor.u32 %v5852_v4, %v4901_v3  ;;  %v5828_v3 = vld [vmem:[#allocation9 + $0x69c] sm:$0xf]  ;;  %v4819_v4 = vld [vmem:[#allocation9 + $0x6b4] sm:$0xf0] }
 0x102   :  { %2884 = vmatpush.bf16.msra.mxu3 %v5350_v8  ;;  %2864 = vmatpush.bf16.msra.mxu2 %v5294_v17  ;;  %v5182_v8 = vor.u32 %v5922_v2, %v5181_v0  ;;  %v5845_v17 = vld [vmem:[#allocation9 + $0x720] sm:$0xf0]  ;;  %v5295_v0 = vld [vmem:[#allocation9 + $0xa6c] sm:$0xf0]  ;;  %v4570_v2 = vor.u32 %v5765_v53, %v4567_v54  ;;  %v4822_v11 = vor.u32 %v5828_v3, %v4819_v4  ;;  %v4035_v53 = vld [vmem:[#allocation9 + $0x94] sm:$0xf0] }
 0x103   :  { %2852 = vmatpush.bf16.msra.mxu0 %v5014_v22  ;;  %2816 = vmatmul.bf16.vlgmr.msrb.gmra.mxu2 %v6345_v1  ;;  %v4623_v22 = vld [vmem:[#allocation9 + $0x52c] sm:$0xf0]  ;;  %v5919_v54 = vld [vmem:[#allocation9 + $0x974] sm:$0xf]  ;;  %v5625_v3 = vld [vmem:[#allocation9 + $0x44] sm:$0xf] }
 0x105   :  { %2837 = vmatpush.bf16.msra.mxu1 %v4818_v31  ;;  %v4874_v31 = vor.u32 %v5845_v17, %v4873_v16  ;;  %v5821_v17 = vld [vmem:[#allocation9 + $0x664] sm:$0xf] }
 0x106   :  { %2885 = vmatpush.bf16.msra.mxu3 %v5322_v25  ;;  %2865 = vmatpush.bf16.msra.mxu2 %v5266_v28  ;;  %v5796_v25 = vld [vmem:[#allocation9 + $0x598] sm:$0xf0]  ;;  %v4626_v28 = vor.u32 %v5779_v21, %v4623_v22  ;;  %v4511_v21 = vld [vmem:[#allocation9 + $0x44c] sm:$0xf0] }
 0x107   :  { %2853 = vmatpush.bf16.msra.mxu0 %v4986_v37  ;;  %v4678_v35 = vor.u32 %v5796_v25, %v4677_v23  ;;  %v4595_v37 = vld [vmem:[#allocation9 + $0x4f4] sm:$0xf0]  ;;  %v5270_v23 = vor.u32 %v5940_v14, %v5267_v15  ;;  %v5323_v14 = vld [vmem:[#allocation9 + $0xaa4] sm:$0xf0] }
 0x108   :  { %v4598_v48 = vor.u32 %v5772_v30, %v4595_v37  ;;  %v5744_v30 = vld [vmem:[#allocation9 + $0x3fc] sm:$0xf] }
 0x109   :  { %2838 = vmatpush.bf16.msra.mxu1 %v4790_v26  ;;  %v5681_v26 = vld [vmem:[#allocation9 + $0x204] sm:$0xf] }
 0x10a   :  { %2906 = vmatpush.bf16.msrb.mxu3 %v4402_v32  ;;  %2866 = vmatpush.bf16.msra.mxu2 %v5238_v46  ;;  %v5125_v32 = vld [vmem:[#allocation9 + $0x900] sm:$0xf]  ;;  %v5667_v46 = vld [vmem:[#allocation9 + $0x194] sm:$0xf] }
 0x10b   :  { %2854 = vmatpush.bf16.msra.mxu0 %v4958_v50  ;;  %v5126_v41 = vor.u32 %v5908_v34, %v5125_v32  ;;  %v4847_v50 = vld [vmem:[#allocation9 + $0x6ec] sm:$0xf0]  ;;  %v5814_v34 = vld [vmem:[#allocation9 + $0x62c] sm:$0xf] }
 0x10c   :  { %v4850_v62 = vor.u32 %v5835_v49, %v4847_v50 }
 0x10d   :  { %2839 = vmatpush.bf16.msra.mxu1 %v4762_v55  ;;  %v5098_v55 = vor.u32 %v5901_v45, %v5097_v42  ;;  %v5926_v42 = vld [vmem:[#allocation9 + $0x9ac] sm:$0xf]  ;;  %v5807_v45 = vld [vmem:[#allocation9 + $0x5f4] sm:$0xf] }
 0x10e   :  { %2907 = vmatpush.bf16.msrb.mxu3 %v4374_v44  ;;  %2867 = vmatpush.bf16.msra.mxu2 %v5210_v59  ;;  %v4231_v44 = vld [vmem:[#allocation9 + $0x21c] sm:$0xf0]  ;;  %v4203_v59 = vld [vmem:[#allocation9 + $0x1e4] sm:$0xf0] }
 0x10f   :  { %2855 = vmatpush.bf16.msra.mxu0 %v4930_v63  ;;  %v4234_v52 = vor.u32 %v5681_v26, %v4231_v44  ;;  %v5947_v63 = vld [vmem:[#allocation9 + $0xa54] sm:$0xf]  ;;  %v5211_v26 = vld [vmem:[#allocation9 + $0x9c4] sm:$0xf0] }
 0x110   :  { %v5298_v9 = vor.u32 %v5947_v63, %v5295_v0  ;;  %v5214_v50 = vor.u32 %v5926_v42, %v5211_v26  ;;  %v5961_v0 = vld [vmem:[#allocation9 + $0xac4] sm:$0xf]  ;;  %v5720_v42 = vld [vmem:[#allocation9 + $0x338] sm:$0xf0] }
 0x111   :  { %2840 = vmatpush.bf16.msra.mxu1 %v4734_v6  ;;  %5369 = vmatmul.msk.bf16.vlgmr.msra.gmra.mxu3 %vm242_vm0, %v6379_v43  ;;  %v4206_v6 = vor.u32 %v5674_v57, %v4203_v59  ;;  %v5800_v57 = vld [vmem:[#allocation9 + $0x5bc] sm:$0xf]  ;;  %v4707_v59 = vld [vmem:[#allocation9 + $0x5d4] sm:$0xf0] }
 0x112   :  { %2908 = vmatpush.bf16.msrb.mxu3 %v4346_v56  ;;  %2868 = vmatpush.bf16.msra.mxu2 %v5182_v8  ;;  %v4178_v56 = vor.u32 %v5667_v46, %v4175_v47  ;;  %v4150_v8 = vor.u32 %v5660_v61, %v4147_v60  ;;  %v4735_v46 = vld [vmem:[#allocation9 + $0x60c] sm:$0xf0]  ;;  %v5737_v47 = vld [vmem:[#allocation9 + $0x3c4] sm:$0xf]  ;;  %v5730_v61 = vld [vmem:[#allocation9 + $0x38c] sm:$0xf]  ;;  %v4710_v4 = vor.u32 %v5800_v57, %v4707_v59 }
 0x113   :  { %2856 = vmatpush.bf16.msra.mxu0 %v4902_v12  ;;  %v4119_v12 = vld [vmem:[#allocation9 + $0x13c] sm:$0xf0]  ;;  %v5877_v59 = vld [vmem:[#allocation9 + $0x824] sm:$0xf] }
 0x114   :  { %v4122_v22 = vor.u32 %v5653_v10, %v4119_v12  ;;  %v4679_v10 = vld [vmem:[#allocation9 + $0x59c] sm:$0xf0]  ;;  %v5954_v12 = vld [vmem:[#allocation9 + $0xa8c] sm:$0xf] }
 0x115   :  { %2841 = vmatpush.bf16.msra.mxu1 %v4706_v18  ;;  %v4791_v18 = vld [vmem:[#allocation9 + $0x67c] sm:$0xf0] }
 0x116   :  { %2909 = vmatpush.bf16.msrb.mxu3 %v4318_v7  ;;  %2869 = vmatpush.bf16.msra.mxu2 %v5154_v24  ;;  %v5758_v7 = vld [vmem:[#allocation9 + $0x46c] sm:$0xf]  ;;  %v4794_v25 = vor.u32 %v5821_v17, %v4791_v18  ;;  %v3979_v18 = vld [vmem:[#allocation9 + $0x24] sm:$0xf0] }
 0x117   :  { %2857 = vmatpush.bf16.msra.mxu0 %v4874_v31  ;;  %v4542_v16 = vor.u32 %v5758_v7, %v4539_v5  ;;  %v5646_v24 = vld [vmem:[#allocation9 + $0xec] sm:$0xf]  ;;  %v5239_v31 = vld [vmem:[#allocation9 + $0x9fc] sm:$0xf0]  ;;  %v5912_v7 = vld [vmem:[#allocation9 + $0x93c] sm:$0xf] }
 0x118   :  { %v5242_v37 = vor.u32 %v5933_v29, %v5239_v31  ;;  %v5155_v5 = vld [vmem:[#allocation9 + $0x954] sm:$0xf0]  ;;  %v5618_v17 = vld [vmem:[#allocation9 + $0xc] sm:$0xf]  ;;  %v5891_v29 = vld [vmem:[#allocation9 + $0x894] sm:$0xf]  ;;  %v5326_v31 = vor.u32 %v5954_v12, %v5323_v14 }
 0x119   :  { %2842 = vmatpush.bf16.msra.mxu1 %v4678_v35  ;;  %v4483_v35 = vld [vmem:[#allocation9 + $0x414] sm:$0xf0]  ;;  %v4097_v12 = vld [vmem:[#allocation9 + $0xf0] sm:$0xf]  ;;  %v5650_v14 = vld [vmem:[#allocation9 + $0x108] sm:$0xf0] }
 0x11a   :  { %2910 = vmatpush.bf16.msrb.mxu3 %v4290_v19  ;;  %2870 = vmatpush.bf16.msra.mxu2 %v5126_v41  ;;  %v5751_v19 = vld [vmem:[#allocation9 + $0x434] sm:$0xf]  ;;  %v4063_v41 = vld [vmem:[#allocation9 + $0xcc] sm:$0xf0]  ;;  %v4486_v44 = vor.u32 %v5744_v30, %v4483_v35  ;;  %v3982_v30 = vor.u32 %v5618_v17, %v3979_v18  ;;  %v4293_v17 = vld [vmem:[#allocation9 + $0x278] sm:$0xf] }
 0x11b   :  { %2920 = vmatpush.bf16.msrb.mxu0 %v4626_v28  ;;  %v4514_v32 = vor.u32 %v5751_v19, %v4511_v21  ;;  %v4763_v28 = vld [vmem:[#allocation9 + $0x644] sm:$0xf0]  ;;  %v4066_v49 = vor.u32 %v5639_v38, %v4063_v41  ;;  %v5786_v19 = vld [vmem:[#allocation9 + $0x54c] sm:$0xf]  ;;  %v4377_v41 = vld [vmem:[#allocation9 + $0x320] sm:$0xf] }
 0x11c   :  { %2858 = vmatmul.bf16.vlgmr.msra.gmra.mxu0 %v6370_v13  ;;  %v4766_v40 = vor.u32 %v5814_v34, %v4763_v28  ;;  %v4181_v34 = vld [vmem:[#allocation9 + $0x198] sm:$0xf]  ;;  %v5671_v28 = vld [vmem:[#allocation9 + $0x1b0] sm:$0xf0] }
 0x11d   :  { %2843 = vmatpush.bf16.msra.mxu1 %v4650_v51  ;;  %v5632_v51 = vld [vmem:[#allocation9 + $0x7c] sm:$0xf] }
 0x11e   :  { %2911 = vmatpush.bf16.msrb.mxu3 %v4262_v36  ;;  %2871 = vmatpush.bf16.msra.mxu2 %v5098_v55  ;;  %v4094_v36 = vor.u32 %v5646_v24, %v4091_v27  ;;  %v5183_v55 = vld [vmem:[#allocation9 + $0x98c] sm:$0xf0]  ;;  %v4038_v60 = vor.u32 %v5632_v51, %v4035_v53  ;;  %v5127_v24 = vld [vmem:[#allocation9 + $0x91c] sm:$0xf0]  ;;  %v5727_v27 = vld [vmem:[#allocation9 + $0x370] sm:$0xf0] }
 0x11f   :  { %2921 = vmatpush.bf16.msrb.mxu0 %v4598_v48  ;;  %v4455_v48 = vld [vmem:[#allocation9 + $0x3dc] sm:$0xf0]  ;;  %v5186_v63 = vor.u32 %v5919_v54, %v5183_v55  ;;  %v4349_v54 = vld [vmem:[#allocation9 + $0x2e8] sm:$0xf]  ;;  %v5713_v55 = vld [vmem:[#allocation9 + $0x300] sm:$0xf0] }
 0x120   :  { %2844 = vmatmul.bf16.vlgmr.msra.gmra.mxu1 %v6357_v39 }
 0x121   :  { %2892 = vmatpush.bf16.msrb.mxu1 %v4178_v56  ;;  %2872 = vmatmul.bf16.vlgmr.msra.gmra.mxu2 %v6372_v20  ;;  %v4458_v56 = vor.u32 %v5737_v47, %v4455_v48  ;;  %v5839_v47 = vld [vmem:[#allocation9 + $0x6f0] sm:$0xf0]  ;;  %v5043_v48 = vld [vmem:[#allocation9 + $0x874] sm:$0xf0] }
 0x122   :  { %2912 = vmatpush.bf16.msrb.mxu3 %v4234_v52  ;;  %2934 = vmatpush.bf16.msrb.mxu2 %v4850_v62  ;;  %v4738_v52 = vor.u32 %v5807_v45, %v4735_v46  ;;  %v4427_v62 = vld [vmem:[#allocation9 + $0x3a4] sm:$0xf0]  ;;  %v5884_v45 = vld [vmem:[#allocation9 + $0x85c] sm:$0xf]  ;;  %v4853_v46 = vld [vmem:[#allocation9 + $0x6d8] sm:$0xf] }
 0x123   :  { %2922 = vmatpush.bf16.msrb.mxu0 %v4570_v2  ;;  %v5351_v2 = vld [vmem:[#allocation9 + $0xadc] sm:$0xf0]  ;;  %v4854_v53 = vor.u32 %v5839_v47, %v4853_v46  ;;  %v4237_v47 = vld [vmem:[#allocation9 + $0x208] sm:$0xf] }
 0x125   :  { %2893 = vmatpush.bf16.msrb.mxu1 %v4150_v8  ;;  %v4430_v8 = vor.u32 %v5730_v61, %v4427_v62  ;;  %v4825_v61 = vld [vmem:[#allocation9 + $0x6a0] sm:$0xf]  ;;  %v5832_v62 = vld [vmem:[#allocation9 + $0x6b8] sm:$0xf0] }
 0x126   :  { %2913 = vmatpush.bf16.msrb.mxu3 %v4206_v6  ;;  %2935 = vmatpush.bf16.msrb.mxu2 %v4822_v11  ;;  %v4007_v6 = vld [vmem:[#allocation9 + $0x5c] sm:$0xf0]  ;;  %v5354_v11 = vor.u32 %v5961_v0, %v5351_v2  ;;  %v5657_v0 = vld [vmem:[#allocation9 + $0x140] sm:$0xf0]  ;;  %v4350_v2 = vor.u32 %v5713_v55, %v4349_v54 }
 0x127   :  { %2923 = vmatpush.bf16.msrb.mxu0 %v4542_v16  ;;  %v4010_v15 = vor.u32 %v5625_v3, %v4007_v6  ;;  %v5158_v16 = vor.u32 %v5912_v7, %v5155_v5  ;;  %v4826_v3 = vor.u32 %v5832_v62, %v4825_v61  ;;  %v5706_v5 = vld [vmem:[#allocation9 + $0x2c8] sm:$0xf0]  ;;  %v4903_v54 = vld [vmem:[#allocation9 + $0x75c] sm:$0xf0]  ;;  %v4209_v62 = vld [vmem:[#allocation9 + $0x1d0] sm:$0xf] }
 0x129   :  { %2914 = vmatmul.bf16.vlgmr.msrb.gmra.mxu3 %v6345_v1  ;;  %2894 = vmatpush.bf16.msrb.mxu1 %v4122_v22  ;;  %v4651_v22 = vld [vmem:[#allocation9 + $0x564] sm:$0xf0] }
 0x12a   :  { %2962 = vmatpush.bf16.msra.mxu3 %v5298_v9  ;;  %2936 = vmatpush.bf16.msrb.mxu2 %v4794_v25  ;;  %v5793_v9 = vld [vmem:[#allocation9 + $0x584] sm:$0xf]  ;;  %v4405_v25 = vld [vmem:[#allocation9 + $0x358] sm:$0xf] }
 0x12b   :  { %2924 = vmatpush.bf16.msrb.mxu0 %v4514_v32  ;;  %v4682_v21 = vor.u32 %v5793_v9, %v4679_v10  ;;  %v5071_v32 = vld [vmem:[#allocation9 + $0x8ac] sm:$0xf0]  ;;  %v4406_v38 = vor.u32 %v5727_v27, %v4405_v25  ;;  %v5825_v9 = vld [vmem:[#allocation9 + $0x680] sm:$0xf0]  ;;  %v5870_v10 = vld [vmem:[#allocation9 + $0x7ec] sm:$0xf] }
 0x12c   :  { %v5074_v26 = vor.u32 %v5891_v29, %v5071_v32  ;;  %v5863_v25 = vld [vmem:[#allocation9 + $0x7b4] sm:$0xf]  ;;  %v4959_v27 = vld [vmem:[#allocation9 + $0x7cc] sm:$0xf0] }
 0x12d   :  { %2895 = vmatpush.bf16.msrb.mxu1 %v4094_v36  ;;  %v5898_v36 = vld [vmem:[#allocation9 + $0x8cc] sm:$0xf]  ;;  %v5643_v32 = vld [vmem:[#allocation9 + $0xd0] sm:$0xf0] }
 0x12e   :  { %2963 = vmatpush.bf16.msra.mxu3 %v5270_v23  ;;  %2937 = vmatpush.bf16.msrb.mxu2 %v4766_v40  ;;  %v5905_v23 = vld [vmem:[#allocation9 + $0x904] sm:$0xf]  ;;  %v5099_v40 = vld [vmem:[#allocation9 + $0x8e4] sm:$0xf0] }
 0x12f   :  { %2925 = vmatpush.bf16.msrb.mxu0 %v4486_v44  ;;  %v5130_v35 = vor.u32 %v5905_v23, %v5127_v24  ;;  %v4182_v44 = vor.u32 %v5671_v28, %v4181_v34  ;;  %v5102_v51 = vor.u32 %v5898_v36, %v5099_v40  ;;  %v5818_v23 = vld [vmem:[#allocation9 + $0x648] sm:$0xf0]  ;;  %v4098_v24 = vor.u32 %v5650_v14, %v4097_v12  ;;  %v5692_v36 = vld [vmem:[#allocation9 + $0x258] sm:$0xf0]  ;;  %v4629_v14 = vld [vmem:[#allocation9 + $0x518] sm:$0xf] }
 0x130   :  { %v5622_v12 = vld [vmem:[#allocation9 + $0x28] sm:$0xf0] }
 0x131   :  { %2896 = vmatpush.bf16.msrb.mxu1 %v4066_v49  ;;  %v4153_v49 = vld [vmem:[#allocation9 + $0x160] sm:$0xf] }
 0x132   :  { %2964 = vmatpush.bf16.msra.mxu3 %v5242_v37  ;;  %2938 = vmatpush.bf16.msrb.mxu2 %v4738_v52  ;;  %v4654_v37 = vor.u32 %v5786_v19, %v4651_v22  ;;  %v4378_v52 = vor.u32 %v5720_v42, %v4377_v41  ;;  %v4769_v22 = vld [vmem:[#allocation9 + $0x630] sm:$0xf]  ;;  %v5856_v41 = vld [vmem:[#allocation9 + $0x77c] sm:$0xf]  ;;  %v4931_v42 = vld [vmem:[#allocation9 + $0x794] sm:$0xf0] }
 0x133   :  { %2926 = vmatpush.bf16.msrb.mxu0 %v4458_v56  ;;  %v5046_v56 = vor.u32 %v5884_v45, %v5043_v48  ;;  %v4770_v28 = vor.u32 %v5818_v23, %v4769_v22  ;;  %v4934_v48 = vor.u32 %v5856_v41, %v4931_v42  ;;  %v5888_v41 = vld [vmem:[#allocation9 + $0x878] sm:$0xf0] }
 0x135   :  { %2897 = vmatpush.bf16.msrb.mxu1 %v4038_v60  ;;  %v5015_v60 = vld [vmem:[#allocation9 + $0x83c] sm:$0xf0] }
 0x136   :  { %2965 = vmatpush.bf16.msra.mxu3 %v5214_v50  ;;  %2939 = vmatpush.bf16.msrb.mxu2 %v4710_v4  ;;  %v5664_v50 = vld [vmem:[#allocation9 + $0x178] sm:$0xf0]  ;;  %v4321_v4 = vld [vmem:[#allocation9 + $0x2b0] sm:$0xf]  ;;  %v5018_v6 = vor.u32 %v5877_v59, %v5015_v60  ;;  %v5678_v60 = vld [vmem:[#allocation9 + $0x1e8] sm:$0xf0] }
 0x137   :  { %2927 = vmatpush.bf16.msrb.mxu0 %v4430_v8  ;;  %v4154_v57 = vor.u32 %v5664_v50, %v4153_v49  ;;  %v4797_v8 = vld [vmem:[#allocation9 + $0x668] sm:$0xf]  ;;  %v5685_v49 = vld [vmem:[#allocation9 + $0x220] sm:$0xf0]  ;;  %v4713_v50 = vld [vmem:[#allocation9 + $0x5c0] sm:$0xf] }
 0x138   :  { %v4238_v59 = vor.u32 %v5685_v49, %v4237_v47  ;;  %v5937_v47 = vld [vmem:[#allocation9 + $0xa00] sm:$0xf0] }
 0x139   :  { %2898 = vmatpush.bf16.msrb.mxu1 %v4010_v15  ;;  %v4322_v15 = vor.u32 %v5706_v5, %v4321_v4  ;;  %v4875_v4 = vld [vmem:[#allocation9 + $0x724] sm:$0xf0] }
 0x13a   :  { %2966 = vmatpush.bf16.msra.mxu3 %v5186_v63  ;;  %2940 = vmatpush.bf16.msrb.mxu2 %v4682_v21  ;;  %v4125_v63 = vld [vmem:[#allocation9 + $0x128] sm:$0xf]  ;;  %v5699_v21 = vld [vmem:[#allocation9 + $0x290] sm:$0xf0] }
 0x13b   :  { %2982 = vmatpush.bf16.msra.mxu0 %v5354_v11  ;;  %v4126_v7 = vor.u32 %v5657_v0, %v4125_v63  ;;  %v4987_v11 = vld [vmem:[#allocation9 + $0x804] sm:$0xf0]  ;;  %v6404_v18 = vpop.f32.mrf.mxu3  ;;  %v4294_v34 = vor.u32 %v5699_v21, %v4293_v17  ;;  %v5842_v63 = vld [vmem:[#allocation9 + $0x70c] sm:$0xf]  ;;  %v6412_v0 = vpop.f32.mrf.mxu0  ;;  %v5895_v21 = vld [vmem:[#allocation9 + $0x8b0] sm:$0xf0] }
 0x13c   :  { %2928 = vmatmul.bf16.vlgmr.msrb.gmra.mxu0 %v6355_v33  ;;  %v4990_v19 = vor.u32 %v5870_v10, %v4987_v11  ;;  %v5951_v10 = vld [vmem:[#allocation9 + $0xa70] sm:$0xf0]  ;;  %v4878_v22 = vor.u32 %v5842_v63, %v4875_v4  ;;  %v5217_v63 = vld [vmem:[#allocation9 + $0x9b0] sm:$0xf] }
 0x13d   :  { %2899 = vmatpush.bf16.msrb.mxu1 %v3982_v30  ;;  %v6406_v29 = vpop.f32.mrf.mxu1  ;;  %v4265_v30 = vld [vmem:[#allocation9 + $0x240] sm:$0xf]  ;;  %v4545_v4 = vld [vmem:[#allocation9 + $0x470] sm:$0xf] }
 0x13e   :  { %2967 = vmatpush.bf16.msra.mxu3 %v5158_v16  ;;  %2941 = vmatpush.bf16.msrb.mxu2 %v4654_v37  ;;  %v4798_v16 = vor.u32 %v5825_v9, %v4797_v8  ;;  %v4741_v37 = vld [vmem:[#allocation9 + $0x5f8] sm:$0xf]  ;;  %v4266_v45 = vor.u32 %v5692_v36, %v4265_v30  ;;  %v3985_v8 = vld [vmem:[#allocation9 + $0x10] sm:$0xf]  ;;  %v5668_v36 = vld [vmem:[#allocation9 + $0x19c] sm:$0xf] }
 0x13f   :  { %2983 = vmatpush.bf16.msra.mxu0 %v5326_v31  ;;  %v4069_v31 = vld [vmem:[#allocation9 + $0xb8] sm:$0xf] }
 0x140   :  { %2900 = vmatmul.bf16.vlgmr.msrb.gmra.mxu1 %v6342_v58  ;;  %v4070_v40 = vor.u32 %v5643_v32, %v4069_v31  ;;  %v5301_v9 = vld [vmem:[#allocation9 + $0xa58] sm:$0xf]  ;;  %v5273_v32 = vld [vmem:[#allocation9 + $0xa20] sm:$0xf] }
 0x141   :  { %2948 = vmatpush.bf16.msra.mxu1 %v5074_v26  ;;  %2942 = vmatmul.bf16.vlgmr.msrb.gmra.mxu2 %v6357_v39  ;;  %v4041_v26 = vld [vmem:[#allocation9 + $0x80] sm:$0xf]  ;;  %v5302_v23 = vor.u32 %v5951_v10, %v5301_v9  ;;  %v4993_v9 = vld [vmem:[#allocation9 + $0x7f0] sm:$0xf]  ;;  %v5874_v10 = vld [vmem:[#allocation9 + $0x808] sm:$0xf0] }
 0x142   :  { %2968 = vmatpush.bf16.msra.mxu3 %v5130_v35  ;;  %2990 = vmatpush.bf16.msra.mxu2 %v4182_v44  ;;  %v4962_v35 = vor.u32 %v5863_v25, %v4959_v27  ;;  %v5636_v44 = vld [vmem:[#allocation9 + $0x98] sm:$0xf0]  ;;  %v5790_v25 = vld [vmem:[#allocation9 + $0x568] sm:$0xf0]  ;;  %v3986_v27 = vor.u32 %v5622_v12, %v3985_v8  ;;  %v4127_v8 = vld [vmem:[#allocation9 + $0x144] sm:$0xf0] }
 0x143   :  { %3004 = vmatpush.bf16.msrb.mxu0 %v4406_v38  ;;  %v5811_v38 = vld [vmem:[#allocation9 + $0x610] sm:$0xf0]  ;;  %v6410_v55 = vpop.f32.mrf.mxu3  ;;  %v6420_v49 = vpop.f32.mrf.mxu0 }
 0x144   :  { %v4742_v46 = vor.u32 %v5811_v38, %v4741_v37  ;;  %v6416_v11 = vpop.f32.mrf.mxu2  ;;  %v4183_v37 = vld [vmem:[#allocation9 + $0x1b4] sm:$0xf0]  ;;  %v6430_v12 = vld [vmem:[#allocation11] sm:$0x7f] }
 0x145   :  { %2949 = vmatpush.bf16.msra.mxu1 %v5046_v56  ;;  %v4013_v56 = vld [vmem:[#allocation9 + $0x48] sm:$0xf] }
 0x146   :  { %2969 = vmatpush.bf16.msra.mxu3 %v5102_v51  ;;  %2991 = vmatpush.bf16.msra.mxu2 %v4154_v57  ;;  %v5804_v51 = vld [vmem:[#allocation9 + $0x5d8] sm:$0xf0]  ;;  %v5629_v57 = vld [vmem:[#allocation9 + $0x60] sm:$0xf0] }
 0x147   :  { %3005 = vmatpush.bf16.msrb.mxu0 %v4378_v52  ;;  %v4042_v52 = vor.u32 %v5636_v44, %v4041_v26  ;;  %v4714_v61 = vor.u32 %v5804_v51, %v4713_v50  ;;  %v4014_v5 = vor.u32 %v5629_v57, %v4013_v56  ;;  %v5021_v56 = vld [vmem:[#allocation9 + $0x828] sm:$0xf]  ;;  %v5881_v57 = vld [vmem:[#allocation9 + $0x840] sm:$0xf0] }
 0x149   :  { %2970 = vmatmul.bf16.vlgmr.msra.gmra.mxu3 %v6372_v20  ;;  %2950 = vmatpush.bf16.msra.mxu1 %v5018_v6  ;;  %v4685_v6 = vld [vmem:[#allocation9 + $0x588] sm:$0xf] }
 0x14a   :  { %3032 = vmatpush.bf16.msrb.mxu3 %v4854_v53  ;;  %2992 = vmatpush.bf16.msra.mxu2 %v4126_v7  ;;  %v5849_v53 = vld [vmem:[#allocation9 + $0x744] sm:$0xf] }
 0x14b   :  { %3006 = vmatpush.bf16.msrb.mxu0 %v4350_v2  ;;  %v6414_v2 = vpop.f32.mrf.mxu1  ;;  %v5797_v7 = vld [vmem:[#allocation9 + $0x5a0] sm:$0xf0]  ;;  %v6418_v42 = vpop.f32.mrf.mxu3 }
 0x14c   :  { %5370 = vmatmul.msk.bf16.vlgmr.msra.gmra.mxu0 %vm242_vm0, %v6379_v43  ;;  %v4686_v17 = vor.u32 %v5797_v7, %v4685_v6  ;;  %v5022_v6 = vor.u32 %v5881_v57, %v5021_v56  ;;  %v5762_v7 = vld [vmem:[#allocation9 + $0x488] sm:$0xf0]  ;;  %v5133_v57 = vld [vmem:[#allocation9 + $0x908] sm:$0xf] }
 0x14d   :  { %2951 = vmatpush.bf16.msra.mxu1 %v4990_v19  ;;  %v5077_v19 = vld [vmem:[#allocation9 + $0x898] sm:$0xf] }
 0x14e   :  { %3033 = vmatpush.bf16.msrb.mxu3 %v4826_v3  ;;  %2993 = vmatpush.bf16.msra.mxu2 %v4098_v24  ;;  %v4906_v3 = vor.u32 %v5849_v53, %v4903_v54  ;;  %v4657_v24 = vld [vmem:[#allocation9 + $0x550] sm:$0xf]  ;;  %v5078_v30 = vor.u32 %v5895_v21, %v5077_v19  ;;  %v5661_v53 = vld [vmem:[#allocation9 + $0x164] sm:$0xf]  ;;  %v4155_v54 = vld [vmem:[#allocation9 + $0x17c] sm:$0xf0] }
 0x14f   :  { %3007 = vmatpush.bf16.msrb.mxu0 %v4322_v15  ;;  %v5783_v15 = vld [vmem:[#allocation9 + $0x530] sm:$0xf0]  ;;  %v4658_v38 = vor.u32 %v5790_v25, %v4657_v24  ;;  %v4517_v21 = vld [vmem:[#allocation9 + $0x438] sm:$0xf] }
 0x150   :  { %v4630_v31 = vor.u32 %v5783_v15, %v4629_v14  ;;  %v4546_v15 = vor.u32 %v5762_v7, %v4545_v4  ;;  %v5923_v19 = vld [vmem:[#allocation9 + $0x990] sm:$0xf0]  ;;  %v4043_v4 = vld [vmem:[#allocation9 + $0x9c] sm:$0xf0]  ;;  %v4909_v7 = vld [vmem:[#allocation9 + $0x748] sm:$0xf] }
 0x151   :  { %2952 = vmatpush.bf16.msra.mxu1 %v4962_v35  ;;  %v5776_v35 = vld [vmem:[#allocation9 + $0x4f8] sm:$0xf0]  ;;  %v5755_v24 = vld [vmem:[#allocation9 + $0x450] sm:$0xf0] }
 0x152   :  { %3034 = vmatpush.bf16.msrb.mxu3 %v4798_v16  ;;  %2994 = vmatpush.bf16.msra.mxu2 %v4070_v40  ;;  %v4210_v16 = vor.u32 %v5678_v60, %v4209_v62  ;;  %v5049_v40 = vld [vmem:[#allocation9 + $0x860] sm:$0xf]  ;;  %v4158_v60 = vor.u32 %v5661_v53, %v4155_v54  ;;  %v5647_v25 = vld [vmem:[#allocation9 + $0xf4] sm:$0xf] }
 0x153   :  { %3008 = vmatpush.bf16.msrb.mxu0 %v4294_v34  ;;  %v5944_v34 = vld [vmem:[#allocation9 + $0xa38] sm:$0xf0]  ;;  %v6422_v50 = vpop.f32.mrf.mxu1  ;;  %v5050_v51 = vor.u32 %v5888_v41, %v5049_v40  ;;  %v4489_v41 = vld [vmem:[#allocation9 + $0x400] sm:$0xf] }
 0x154   :  { %v5274_v26 = vor.u32 %v5944_v34, %v5273_v32  ;;  %v4965_v32 = vld [vmem:[#allocation9 + $0x7b8] sm:$0xf]  ;;  %v5867_v34 = vld [vmem:[#allocation9 + $0x7d0] sm:$0xf0]  ;;  %v5916_v40 = vld [vmem:[#allocation9 + $0x958] sm:$0xf0] }
 0x155   :  { %2953 = vmatpush.bf16.msra.mxu1 %v4934_v48  ;;  %v4573_v48 = vld [vmem:[#allocation9 + $0x4a8] sm:$0xf] }
 0x156   :  { %3035 = vmatpush.bf16.msrb.mxu3 %v4770_v28  ;;  %2995 = vmatpush.bf16.msra.mxu2 %v4042_v52  ;;  %v4601_v28 = vld [vmem:[#allocation9 + $0x4e0] sm:$0xf]  ;;  %v5769_v52 = vld [vmem:[#allocation9 + $0x4c0] sm:$0xf0] }
 0x157   :  { %3009 = vmatpush.bf16.msrb.mxu0 %v4266_v45  ;;  %v4602_v44 = vor.u32 %v5776_v35, %v4601_v28  ;;  %v4186_v45 = vor.u32 %v5668_v36, %v4183_v37  ;;  %v4574_v62 = vor.u32 %v5769_v52, %v4573_v48  ;;  %v6435_v28 = vpop.f32.mrf.mxu0  ;;  %v4518_v36 = vor.u32 %v5755_v24, %v4517_v21  ;;  %v5860_v52 = vld [vmem:[#allocation9 + $0x798] sm:$0xf0]  ;;  %v5734_v21 = vld [vmem:[#allocation9 + $0x3a8] sm:$0xf0] }
 0x159   :  { %2954 = vmatpush.bf16.msra.mxu1 %v4906_v3  ;;  %v5930_v3 = vld [vmem:[#allocation9 + $0x9c8] sm:$0xf0] }
 0x15a   :  { %3036 = vmatpush.bf16.msrb.mxu3 %v4742_v46  ;;  %2996 = vmatpush.bf16.msra.mxu2 %v4014_v5  ;;  %v5245_v46 = vld [vmem:[#allocation9 + $0x9e8] sm:$0xf]  ;;  %v5654_v5 = vld [vmem:[#allocation9 + $0x12c] sm:$0xf]  ;;  %v5218_v14 = vor.u32 %v5930_v3, %v5217_v63  ;;  %v5741_v63 = vld [vmem:[#allocation9 + $0x3e0] sm:$0xf0] }
 0x15b   :  { %3010 = vmatpush.bf16.msrb.mxu0 %v4238_v59  ;;  %v6426_v59 = vpop.f32.mrf.mxu2  ;;  %v5633_v3 = vld [vmem:[#allocation9 + $0x84] sm:$0xf] }
 0x15d   :  { %2955 = vmatpush.bf16.msra.mxu1 %v4878_v22  ;;  %v6432_v22 = vpop.f32.mrf.mxu3 }
 0x15e   :  { %3037 = vmatpush.bf16.msrb.mxu3 %v4714_v61  ;;  %2997 = vmatpush.bf16.msra.mxu2 %v3986_v27  ;;  %v5246_v61 = vor.u32 %v5937_v47, %v5245_v46  ;;  %v4099_v27 = vld [vmem:[#allocation9 + $0x10c] sm:$0xf0]  ;;  %v5640_v46 = vld [vmem:[#allocation9 + $0xbc] sm:$0xf]  ;;  %v4071_v47 = vld [vmem:[#allocation9 + $0xd4] sm:$0xf0] }
 0x15f   :  { %3011 = vmatpush.bf16.msrb.mxu0 %v4210_v16  ;;  %v4130_v16 = vor.u32 %v5654_v5, %v4127_v8  ;;  %v4102_v37 = vor.u32 %v5647_v25, %v4099_v27  ;;  %v4074_v56 = vor.u32 %v5640_v46, %v4071_v47  ;;  %v782_v8 = vperm.slane %v6430_v12, 1  ;;  %v5846_v25 = vld [vmem:[#allocation9 + $0x728] sm:$0xf0] }
 0x160   :  { %2956 = vmatmul.bf16.vlgmr.msra.gmra.mxu1 %v6370_v13  ;;  %v5626_v27 = vld [vmem:[#allocation9 + $0x4c] sm:$0xf] }
 0x161   :  { %3018 = vmatpush.bf16.msrb.mxu1 %v4630_v31  ;;  %2998 = vmatmul.bf16.vlgmr.msra.gmra.mxu2 %v6342_v58  ;;  %v781_v31 = vperm.slane %v6430_v12, 0  ;;  %v4771_v12 = vld [vmem:[#allocation9 + $0x64c] sm:$0xf0] }
 0x162   :  { %3038 = vmatpush.bf16.msrb.mxu3 %v4686_v17  ;;  %3046 = vmatpush.bf16.msrb.mxu2 %v5078_v30  ;;  %v5189_v17 = vld [vmem:[#allocation9 + $0x978] sm:$0xf]  ;;  %v6437_v30 = vpop.f32.mrf.mxu1 }
 0x163   :  { %3060 = vmatpush.bf16.msra.mxu0 %v5302_v23  ;;  %v4994_v23 = vor.u32 %v5874_v10, %v4993_v9  ;;  %v5190_v35 = vor.u32 %v5923_v19, %v5189_v17  ;;  %v2608_v48 = vadd.f32 %v6404_v18, %v781_v31  ;;  %v5853_v18 = vld [vmem:[#allocation9 + $0x760] sm:$0xf0]  ;;  %v2610_v5 = vadd.f32 %v6410_v55, %v781_v31  ;;  %v4433_v19 = vld [vmem:[#allocation9 + $0x390] sm:$0xf]  ;;  %v4015_v31 = vld [vmem:[#allocation9 + $0x64] sm:$0xf0] }
 0x164   :  { %3012 = vmatmul.bf16.vlgmr.msrb.gmra.mxu0 %v6345_v1  ;;  %v4046_v17 = vor.u32 %v5633_v3, %v4043_v4  ;;  %v4910_v55 = vor.u32 %v5853_v18, %v4909_v7  ;;  %v4434_v47 = vor.u32 %v5734_v21, %v4433_v19  ;;  %v5079_v3 = vld [vmem:[#allocation9 + $0x8b4] sm:$0xf0]  ;;  %v5958_v4 = vld [vmem:[#allocation9 + $0xaa8] sm:$0xf0]  ;;  %v4603_v7 = vld [vmem:[#allocation9 + $0x4fc] sm:$0xf0] }
 0x165   :  { %3019 = vmatpush.bf16.msrb.mxu1 %v4602_v44  ;;  %v4966_v44 = vor.u32 %v5867_v34, %v4965_v32  ;;  %v6443_v9 = vpop.f32.mrf.mxu3  ;;  %v5836_v34 = vld [vmem:[#allocation9 + $0x6dc] sm:$0xf] }
 0x166   :  { %3039 = vmatpush.bf16.msrb.mxu3 %v4658_v38  ;;  %3047 = vmatpush.bf16.msrb.mxu2 %v5050_v51  ;;  %v5161_v38 = vld [vmem:[#allocation9 + $0x940] sm:$0xf] }
 0x167   :  { %3061 = vmatpush.bf16.msra.mxu0 %v5274_v26  ;;  %v2705_v26 = vpop.f32.mrf.mxu2  ;;  %v4937_v51 = vld [vmem:[#allocation9 + $0x780] sm:$0xf]  ;;  %v5162_v53 = vor.u32 %v5916_v40, %v5161_v38 }
 0x168   :  { %v2706_v46 = vadd.f32 %v2705_v26, %v782_v8 }
 0x169   :  { %3040 = vmatmul.bf16.vlgmr.msrb.gmra.mxu3 %v6357_v39  ;;  %3020 = vmatpush.bf16.msrb.mxu1 %v4574_v62  ;;  %v4461_v62 = vld [vmem:[#allocation9 + $0x3c8] sm:$0xf] }
 0x16a   :  { %3088 = vmatpush.bf16.msra.mxu3 %v4186_v45  ;;  %3048 = vmatpush.bf16.msrb.mxu2 %v5022_v6  ;;  %v5748_v45 = vld [vmem:[#allocation9 + $0x418] sm:$0xf0]  ;;  %v2622_v6 = vadd.f32 %v6412_v0, %v2608_v48  ;;  %v6445_v0 = vpop.f32.mrf.mxu0  ;;  %v2719_v24 = vpop.f32.mrf.mxu1  ;;  %v4018_v48 = vor.u32 %v5626_v27, %v4015_v31 }
 0x16b   :  { %3062 = vmatpush.bf16.msra.mxu0 %v5246_v61  ;;  %v4490_v54 = vor.u32 %v5748_v45, %v4489_v41  ;;  %v5909_v61 = vld [vmem:[#allocation9 + $0x920] sm:$0xf0]  ;;  %v4631_v45 = vld [vmem:[#allocation9 + $0x534] sm:$0xf0] }
 0x16c   :  { %v5134_v10 = vor.u32 %v5909_v61, %v5133_v57  ;;  %v2636_v32 = vadd.f32 %v6406_v29, %v2622_v6  ;;  %v5965_v41 = vld [vmem:[#allocation9 + $0xae0] sm:$0xf0]  ;;  %v2720_v57 = vadd.f32 %v2719_v24, %v2706_v46 }
 0x16d   :  { %3021 = vmatpush.bf16.msrb.mxu1 %v4546_v15  ;;  %v5902_v15 = vld [vmem:[#allocation9 + $0x8e8] sm:$0xf0]  ;;  %v5773_v6 = vld [vmem:[#allocation9 + $0x4e4] sm:$0xf] }
 0x16e   :  { %3089 = vmatpush.bf16.msra.mxu3 %v4158_v60  ;;  %3049 = vmatpush.bf16.msrb.mxu2 %v4994_v23  ;;  %v4938_v60 = vor.u32 %v5860_v52, %v4937_v51  ;;  %v4881_v23 = vld [vmem:[#allocation9 + $0x710] sm:$0xf]  ;;  %v5619_v51 = vld [vmem:[#allocation9 + $0x14] sm:$0xf]  ;;  %v2734_v19 = vadd.f32 %v6443_v9, %v2720_v57  ;;  %v4606_v21 = vor.u32 %v5773_v6, %v4603_v7  ;;  %v5885_v24 = vld [vmem:[#allocation9 + $0x864] sm:$0xf] }
 0x16f   :  { %3063 = vmatpush.bf16.msra.mxu0 %v5218_v14  ;;  %v5105_v14 = vld [vmem:[#allocation9 + $0x8d0] sm:$0xf]  ;;  %v2707_v38 = vpop.f32.mrf.mxu2  ;;  %v4882_v29 = vor.u32 %v5846_v25, %v4881_v23  ;;  %v4799_v23 = vld [vmem:[#allocation9 + $0x684] sm:$0xf0]  ;;  %v5808_v57 = vld [vmem:[#allocation9 + $0x5fc] sm:$0xf] }
 0x170   :  { %v5106_v40 = vor.u32 %v5902_v15, %v5105_v14  ;;  %v4407_v14 = vld [vmem:[#allocation9 + $0x374] sm:$0xf0]  ;;  %v5752_v7 = vld [vmem:[#allocation9 + $0x43c] sm:$0xf] }
 0x171   :  { %3022 = vmatpush.bf16.msrb.mxu1 %v4518_v36  ;;  %v5357_v36 = vld [vmem:[#allocation9 + $0xac8] sm:$0xf] }
 0x172   :  { %3090 = vmatpush.bf16.msra.mxu3 %v4130_v16  ;;  %3050 = vmatpush.bf16.msrb.mxu2 %v4966_v44  ;;  %v4462_v16 = vor.u32 %v5741_v63, %v4461_v62  ;;  %v5780_v44 = vld [vmem:[#allocation9 + $0x51c] sm:$0xf]  ;;  %v5358_v61 = vor.u32 %v5965_v41, %v5357_v36  ;;  %v2747_v25 = vpop.f32.mrf.mxu0  ;;  %v2721_v27 = vpop.f32.mrf.mxu1  ;;  %v5717_v36 = vld [vmem:[#allocation9 + $0x324] sm:$0xf] }
 0x173   :  { %3064 = vmatpush.bf16.msra.mxu0 %v5190_v35  ;;  %v4855_v35 = vld [vmem:[#allocation9 + $0x6f4] sm:$0xf0]  ;;  %v4634_v62 = vor.u32 %v5780_v44, %v4631_v45  ;;  %v5892_v63 = vld [vmem:[#allocation9 + $0x89c] sm:$0xf]  ;;  %v5815_v45 = vld [vmem:[#allocation9 + $0x634] sm:$0xf]  ;;  %v2748_v46 = vadd.f32 %v2747_v25, %v2734_v19 }
 0x174   :  { %v4858_v52 = vor.u32 %v5836_v34, %v4855_v35  ;;  %v4575_v34 = vld [vmem:[#allocation9 + $0x4c4] sm:$0xf0]  ;;  %v2708_v35 = vadd.f32 %v2707_v38, %v782_v8  ;;  %v5878_v8 = vld [vmem:[#allocation9 + $0x82c] sm:$0xf]  ;;  %v5801_v19 = vld [vmem:[#allocation9 + $0x5c4] sm:$0xf] }
 0x175   :  { %3023 = vmatpush.bf16.msrb.mxu1 %v4490_v54  ;;  %v5829_v54 = vld [vmem:[#allocation9 + $0x6a4] sm:$0xf]  ;;  %v5023_v38 = vld [vmem:[#allocation9 + $0x844] sm:$0xf0] }
 0x176   :  { %3091 = vmatpush.bf16.msra.mxu3 %v4102_v37  ;;  %3051 = vmatpush.bf16.msrb.mxu2 %v4938_v60  ;;  %v2624_v37 = vadd.f32 %v6420_v49, %v2610_v5  ;;  %v4827_v49 = vld [vmem:[#allocation9 + $0x6bc] sm:$0xf0]  ;;  %v5329_v60 = vld [vmem:[#allocation9 + $0xa90] sm:$0xf] }
 0x177   :  { %3065 = vmatpush.bf16.msra.mxu0 %v5162_v53  ;;  %v3987_v53 = vld [vmem:[#allocation9 + $0x2c] sm:$0xf0]  ;;  %v4830_v15 = vor.u32 %v5829_v54, %v4827_v49  ;;  %v4774_v49 = vor.u32 %v5815_v45, %v4771_v12 }
 0x178   :  { %v2638_v26 = vadd.f32 %v6414_v2, %v2624_v37  ;;  %v3990_v5 = vor.u32 %v5619_v51, %v3987_v53  ;;  %v5330_v2 = vor.u32 %v5958_v4, %v5329_v60  ;;  %v4379_v37 = vld [vmem:[#allocation9 + $0x33c] sm:$0xf0]  ;;  %v5759_v51 = vld [vmem:[#allocation9 + $0x474] sm:$0xf]  ;;  %v4351_v53 = vld [vmem:[#allocation9 + $0x304] sm:$0xf0] }
 0x179   :  { %3024 = vmatpush.bf16.msrb.mxu1 %v4462_v16  ;;  %v5082_v16 = vor.u32 %v5892_v63, %v5079_v3  ;;  %v4743_v63 = vld [vmem:[#allocation9 + $0x614] sm:$0xf0]  ;;  %v5871_v3 = vld [vmem:[#allocation9 + $0x7f4] sm:$0xf] }
 0x17a   :  { %3092 = vmatpush.bf16.msra.mxu3 %v4074_v56  ;;  %3052 = vmatpush.bf16.msrb.mxu2 %v4910_v55  ;;  %v2650_v56 = vadd.f32 %v6416_v11, %v2636_v32  ;;  %v2735_v11 = vpop.f32.mrf.mxu3  ;;  %v2652_v55 = vadd.f32 %v6426_v59, %v2638_v26  ;;  %v5766_v32 = vld [vmem:[#allocation9 + $0x4ac] sm:$0xf]  ;;  %v4995_v26 = vld [vmem:[#allocation9 + $0x80c] sm:$0xf0] }
 0x17b   :  { %3066 = vmatpush.bf16.msra.mxu0 %v5134_v10  ;;  %v5724_v10 = vld [vmem:[#allocation9 + $0x35c] sm:$0xf] }
 0x17c   :  { %v2664_v18 = vadd.f32 %v6418_v42, %v2650_v56  ;;  %v5051_v42 = vld [vmem:[#allocation9 + $0x87c] sm:$0xf0]  ;;  %v4410_v31 = vor.u32 %v5724_v10, %v4407_v14  ;;  %v2666_v59 = vadd.f32 %v6432_v22, %v2652_v55  ;;  %v4547_v22 = vld [vmem:[#allocation9 + $0x48c] sm:$0xf0]  ;;  %v5026_v56 = vor.u32 %v5878_v8, %v5023_v38  ;;  %v4967_v55 = vld [vmem:[#allocation9 + $0x7d4] sm:$0xf0] }
 0x17d   :  { %3025 = vmatpush.bf16.msrb.mxu1 %v4434_v47  ;;  %v5054_v44 = vor.u32 %v5885_v24, %v5051_v42  ;;  %v2722_v47 = vadd.f32 %v2721_v27, %v2708_v35  ;;  %v4550_v60 = vor.u32 %v5759_v51, %v4547_v22  ;;  %v4323_v10 = vld [vmem:[#allocation9 + $0x2cc] sm:$0xf0]  ;;  %v4715_v24 = vld [vmem:[#allocation9 + $0x5dc] sm:$0xf0]  ;;  %v5864_v42 = vld [vmem:[#allocation9 + $0x7bc] sm:$0xf] }
 0x17e   :  { %3093 = vmatpush.bf16.msra.mxu3 %v4046_v17  ;;  %3053 = vmatpush.bf16.msrb.mxu2 %v4882_v29  ;;  %v5822_v17 = vld [vmem:[#allocation9 + $0x66c] sm:$0xf]  ;;  %v2678_v9 = vadd.f32 %v6435_v28, %v2664_v18  ;;  %v4578_v28 = vor.u32 %v5766_v32, %v4575_v34  ;;  %v2680_v54 = vadd.f32 %v6445_v0, %v2666_v59  ;;  %v4519_v18 = vld [vmem:[#allocation9 + $0x454] sm:$0xf0]  ;;  %v5703_v0 = vld [vmem:[#allocation9 + $0x2b4] sm:$0xf] }
 0x17f   :  { %3067 = vmatpush.bf16.msra.mxu0 %v5106_v40  ;;  %v2761_v40 = vpop.f32.mrf.mxu2  ;;  %v4802_v41 = vor.u32 %v5822_v17, %v4799_v23  ;;  %v4998_v17 = vor.u32 %v5871_v3, %v4995_v26  ;;  %v4522_v23 = vor.u32 %v5752_v7, %v4519_v18  ;;  %v4326_v27 = vor.u32 %v5703_v0, %v4323_v10  ;;  %v4491_v32 = vld [vmem:[#allocation9 + $0x41c] sm:$0xf0]  ;;  %v5696_v34 = vld [vmem:[#allocation9 + $0x27c] sm:$0xf]  ;;  %v5794_v59 = vld [vmem:[#allocation9 + $0x58c] sm:$0xf] }
 0x180   :  { %3026 = vmatmul.bf16.vlgmr.msrb.gmra.mxu1 %v6355_v33  ;;  %v6465_v29 = vadd.f32 %v6422_v50, %v2678_v9  ;;  %v2775_v50 = vpop.f32.mrf.mxu1  ;;  %v4295_v9 = vld [vmem:[#allocation9 + $0x294] sm:$0xf0]  ;;  %v5738_v38 = vld [vmem:[#allocation9 + $0x3cc] sm:$0xf]  ;;  %v5689_v51 = vld [vmem:[#allocation9 + $0x244] sm:$0xf] }
 0x181   :  { %3080 = vmatpush.bf16.msra.mxu1 %v5358_v61  ;;  %3054 = vmatmul.bf16.vlgmr.msrb.gmra.mxu2 %v6370_v13  ;;  %v2762_v61 = vadd.f32 %v2761_v40, %v2748_v46  ;;  %v4687_v46 = vld [vmem:[#allocation9 + $0x5a4] sm:$0xf0]  ;;  %v4298_v8 = vor.u32 %v5696_v34, %v4295_v9  ;;  %v5682_v7 = vld [vmem:[#allocation9 + $0x20c] sm:$0xf]  ;;  %v5955_v9 = vld [vmem:[#allocation9 + $0xa94] sm:$0xf] }
 0x182   :  { %3094 = vmatpush.bf16.msra.mxu3 %v4018_v48  ;;  %3116 = vmatpush.bf16.msra.mxu2 %v4634_v62  ;;  %v4382_v48 = vor.u32 %v5717_v36, %v4379_v37  ;;  %v2736_v62 = vadd.f32 %v2735_v11, %v2722_v47  ;;  %v2789_v4 = vpop.f32.mrf.mxu3  ;;  %v3284_v14 = vmul.f32 0.01, %v6465_v29  ;;  %v2749_v11 = vpop.f32.mrf.mxu0  ;;  %v4718_v36 = vor.u32 %v5801_v19, %v4715_v24  ;;  %v5857_v47 = vld [vmem:[#allocation9 + $0x784] sm:$0xf]  ;;  %v4911_v26 = vld [vmem:[#allocation9 + $0x764] sm:$0xf0] }
 0x183   :  { %3130 = vmatpush.bf16.msrb.mxu0 %v4858_v52  ;;  %v5710_v52 = vld [vmem:[#allocation9 + $0x2ec] sm:$0xf]  ;;  %v4970_v37 = vor.u32 %v5864_v42, %v4967_v55  ;;  %v4239_v18 = vld [vmem:[#allocation9 + $0x224] sm:$0xf0]  ;;  %v5665_v42 = vld [vmem:[#allocation9 + $0x180] sm:$0xf0] }
 0x184   :  { %3068 = vmatmul.bf16.vlgmr.msra.gmra.mxu0 %v6372_v20  ;;  %v4354_v6 = vor.u32 %v5710_v52, %v4351_v53  ;;  %v3298_v40 = vmax.f32 %v6465_v29, %v3284_v14  ;;  %v4267_v53 = vld [vmem:[#allocation9 + $0x25c] sm:$0xf0]  ;;  %v5787_v29 = vld [vmem:[#allocation9 + $0x554] sm:$0xf]  ;;  %v5962_v0 = vld [vmem:[#allocation9 + $0xacc] sm:$0xf] }
 0x185   :  { %3081 = vmatpush.bf16.msra.mxu1 %v5330_v2  ;;  %v2750_v2 = vadd.f32 %v2749_v11, %v2736_v62  ;;  %v4435_v62 = vld [vmem:[#allocation9 + $0x3ac] sm:$0xf0]  ;;  %v5359_v10 = vld [vmem:[#allocation9 + $0xae4] sm:$0xf0]  ;;  %v5675_v55 = vld [vmem:[#allocation9 + $0x1d4] sm:$0xf] }
 0x186   :  { %3095 = vmatpush.bf16.msra.mxu3 %v3990_v5  ;;  %3117 = vmatpush.bf16.msra.mxu2 %v4606_v21  ;;  %v2776_v5 = vadd.f32 %v2775_v50, %v2762_v61  ;;  %v5731_v61 = vld [vmem:[#allocation9 + $0x394] sm:$0xf]  ;;  %v4270_v50 = vor.u32 %v5689_v51, %v4267_v53  ;;  %v4161_v24 = vld [vmem:[#allocation9 + $0x168] sm:$0xf]  ;;  %v5941_v51 = vld [vmem:[#allocation9 + $0xa24] sm:$0xf] }
 0x187   :  { %3131 = vmatpush.bf16.msrb.mxu0 %v4830_v15  ;;  %v6470_v15 = vadd.f32 %v6437_v30, %v2680_v54  ;;  %v2763_v25 = vpop.f32.mrf.mxu2  ;;  %v4659_v54 = vld [vmem:[#allocation9 + $0x56c] sm:$0xf0]  ;;  %v5721_v53 = vld [vmem:[#allocation9 + $0x340] sm:$0xf0] }
 0x188   :  { %v2790_v21 = vadd.f32 %v2789_v4, %v2776_v5  ;;  %v2777_v12 = vpop.f32.mrf.mxu1  ;;  %v4189_v4 = vld [vmem:[#allocation9 + $0x1a0] sm:$0xf]  ;;  %v4662_v14 = vor.u32 %v5787_v29, %v4659_v54 }
 0x189   :  { %3102 = vmatpush.bf16.msrb.mxu1 %v4410_v31  ;;  %3096 = vmatmul.bf16.vlgmr.msra.gmra.mxu3 %v6342_v58  ;;  %v5745_v31 = vld [vmem:[#allocation9 + $0x404] sm:$0xf]  ;;  %v6473_v35 = vmul.f32 0.01, %v6470_v15 }
 0x18a   :  { %3144 = vmatpush.bf16.msrb.mxu3 %v5082_v16  ;;  %3118 = vmatpush.bf16.msra.mxu2 %v4578_v28  ;;  %v4746_v16 = vor.u32 %v5808_v57, %v4743_v63  ;;  %v3285_v30 = vmul.f32 0.01, %v2790_v21  ;;  %v4494_v45 = vor.u32 %v5745_v31, %v4491_v32  ;;  %v4939_v28 = vld [vmem:[#allocation9 + $0x79c] sm:$0xf0]  ;;  %v4211_v31 = vld [vmem:[#allocation9 + $0x1ec] sm:$0xf0] }
 0x18b   :  { %3132 = vmatpush.bf16.msrb.mxu0 %v4802_v41  ;;  %v2764_v41 = vadd.f32 %v2763_v25, %v2750_v2  ;;  %v4942_v57 = vor.u32 %v5857_v47, %v4939_v28  ;;  %v3305_v19 = vmax.f32 %v6470_v15, %v6473_v35  ;;  %v4242_v25 = vor.u32 %v5682_v7, %v4239_v18  ;;  %v4637_v32 = vld [vmem:[#allocation9 + $0x520] sm:$0xf]  ;;  %v5303_v35 = vld [vmem:[#allocation9 + $0xa74] sm:$0xf0]  ;;  %v4133_v47 = vld [vmem:[#allocation9 + $0x130] sm:$0xf] }
 0x18c   :  { %v5658_v28 = vld [vmem:[#allocation9 + $0x148] sm:$0xf0]  ;;  %v4077_v7 = vld [vmem:[#allocation9 + $0xc0] sm:$0xf]  ;;  %v5644_v18 = vld [vmem:[#allocation9 + $0xd8] sm:$0xf0] }
 0x18d   :  { %3103 = vmatpush.bf16.msrb.mxu1 %v4382_v48  ;;  %v4463_v48 = vld [vmem:[#allocation9 + $0x3e4] sm:$0xf0]  ;;  %v2778_v52 = vadd.f32 %v2777_v12, %v2764_v41  ;;  %v4162_v41 = vor.u32 %v5665_v42, %v4161_v24  ;;  %v4134_v29 = vor.u32 %v5658_v28, %v4133_v47  ;;  %v5637_v42 = vld [vmem:[#allocation9 + $0xa0] sm:$0xf0]  ;;  %v5163_v47 = vld [vmem:[#allocation9 + $0x95c] sm:$0xf0] }
 0x18e   :  { %3145 = vmatpush.bf16.msrb.mxu3 %v5054_v44  ;;  %3119 = vmatpush.bf16.msra.mxu2 %v4550_v60  ;;  %v3299_v44 = vmax.f32 %v2790_v21, %v3285_v30  ;;  %v5850_v60 = vld [vmem:[#allocation9 + $0x74c] sm:$0xf]  ;;  %v4466_v3 = vor.u32 %v5738_v38, %v4463_v48  ;;  %v4438_v21 = vor.u32 %v5731_v61, %v4435_v62  ;;  %v5784_v30 = vld [vmem:[#allocation9 + $0x538] sm:$0xf0]  ;;  %v4609_v38 = vld [vmem:[#allocation9 + $0x4e8] sm:$0xf] }
 0x18f   :  { %3133 = vmatpush.bf16.msrb.mxu0 %v4774_v49  ;;  %v2791_v49 = vpop.f32.mrf.mxu3  ;;  %v4914_v11 = vor.u32 %v5850_v60, %v4911_v26  ;;  %v5777_v48 = vld [vmem:[#allocation9 + $0x500] sm:$0xf0]  ;;  %v4581_v62 = vld [vmem:[#allocation9 + $0x4b0] sm:$0xf]  ;;  %v5770_v60 = vld [vmem:[#allocation9 + $0x4c8] sm:$0xf0] }
 0x190   :  { %v3312_v22 = vpack.c.bf16 %v3299_v44, %v3298_v40  ;;  %5371 = vmatmul.msk.bf16.vlgmr.msra.gmra.mxu1 %vm242_vm0, %v6379_v43  ;;  %v2792_v63 = vadd.f32 %v2791_v49, %v2778_v52  ;;  %v5728_v40 = vld [vmem:[#allocation9 + $0x378] sm:$0xf0]  ;;  %v4638_v44 = vor.u32 %v5784_v30, %v4637_v32  ;;  %v4385_v52 = vld [vmem:[#allocation9 + $0x328] sm:$0xf]  ;;  %v4610_v54 = vor.u32 %v5777_v48, %v4609_v38  ;;  %v4105_v49 = vld [vmem:[#allocation9 + $0xf8] sm:$0xf]  ;;  %v6486_v30 = vpop.f32.mrf.mxu0 }
 0x191   :  { %3104 = vmatpush.bf16.msrb.mxu1 %v4354_v6  ;;  %v5672_v6 = vld [vmem:[#allocation9 + $0x1b8] sm:$0xf0]  ;;  %v4386_v61 = vor.u32 %v5721_v53, %v4385_v52  ;;  %v4357_v26 = vld [vmem:[#allocation9 + $0x2f0] sm:$0xf]  ;;  %v4049_v24 = vld [vmem:[#allocation9 + $0x88] sm:$0xf] }
 0x192   :  { %3146 = vmatpush.bf16.msrb.mxu3 %v5026_v56  ;;  %3120 = vmatpush.bf16.msra.mxu2 %v4522_v23  ;;  %v4690_v56 = vor.u32 %v5794_v59, %v4687_v46  ;;  %3320 = vst [vmem:[#allocation2] sm:$0xff] %v3312_v22  ;;  %v3292_v5 = vmul.f32 0.01, %v2792_v63  ;;  %v4190_v23 = vor.u32 %v5672_v6, %v4189_v4  ;;  %v4413_v59 = vld [vmem:[#allocation9 + $0x360] sm:$0xf] }
 0x193   :  { %3134 = vmatpush.bf16.msrb.mxu0 %v4746_v16  ;;  %v5843_v16 = vld [vmem:[#allocation9 + $0x714] sm:$0xf]  ;;  %v5275_v22 = vld [vmem:[#allocation9 + $0xa3c] sm:$0xf0]  ;;  %v5714_v4 = vld [vmem:[#allocation9 + $0x308] sm:$0xf0]  ;;  %v4582_v6 = vor.u32 %v5770_v60, %v4581_v62 }
 0x194   :  { %v3306_v2 = vmax.f32 %v2792_v63, %v3292_v5  ;;  %v5934_v63 = vld [vmem:[#allocation9 + $0x9ec] sm:$0xf]  ;;  %v5920_v32 = vld [vmem:[#allocation9 + $0x97c] sm:$0xf]  ;;  %v4273_v28 = vld [vmem:[#allocation9 + $0x248] sm:$0xf] }
 0x195   :  { %3105 = vmatpush.bf16.msrb.mxu1 %v4326_v27  ;;  %v5362_v27 = vor.u32 %v5962_v0, %v5359_v10  ;;  %v4358_v0 = vor.u32 %v5714_v4, %v4357_v26  ;;  %v4553_v10 = vld [vmem:[#allocation9 + $0x478] sm:$0xf]  ;;  %v5742_v52 = vld [vmem:[#allocation9 + $0x3e8] sm:$0xf0]  ;;  %v4245_v62 = vld [vmem:[#allocation9 + $0x210] sm:$0xf] }
 0x196   :  { %3147 = vmatpush.bf16.msrb.mxu3 %v4998_v17  ;;  %3121 = vmatpush.bf16.msra.mxu2 %v4494_v45  ;;  %v4883_v17 = vld [vmem:[#allocation9 + $0x72c] sm:$0xf0]  ;;  %v3316_v34 = vpack.c.bf16 %v3306_v2, %v3305_v19  ;;  %v4214_v45 = vor.u32 %v5675_v55, %v4211_v31  ;;  %v5707_v19 = vld [vmem:[#allocation9 + $0x2d0] sm:$0xf0]  ;;  %v5756_v31 = vld [vmem:[#allocation9 + $0x458] sm:$0xf0] }
 0x197   :  { %3135 = vmatpush.bf16.msrb.mxu0 %v4718_v36  ;;  %v5331_v36 = vld [vmem:[#allocation9 + $0xaac] sm:$0xf0]  ;;  %v4886_v15 = vor.u32 %v5843_v16, %v4883_v17  ;;  %v4329_v17 = vld [vmem:[#allocation9 + $0x2b8] sm:$0xf]  ;;  %v6484_v2 = vpop.f32.mrf.mxu3  ;;  %v5686_v60 = vld [vmem:[#allocation9 + $0x228] sm:$0xf0] }
 0x198   :  { %3325 = vst [vmem:[#allocation2 + $0x1c] sm:$0xff] %v3316_v34  ;;  %v5334_v46 = vor.u32 %v5955_v9, %v5331_v36  ;;  %v5219_v16 = vld [vmem:[#allocation9 + $0x9cc] sm:$0xf0]  ;;  %v5191_v34 = vld [vmem:[#allocation9 + $0x994] sm:$0xf0] }
 0x199   :  { %3106 = vmatpush.bf16.msrb.mxu1 %v4298_v8  ;;  %v4414_v8 = vor.u32 %v5728_v40, %v4413_v59  ;;  %v4301_v9 = vld [vmem:[#allocation9 + $0x280] sm:$0xf]  ;;  %v5700_v36 = vld [vmem:[#allocation9 + $0x298] sm:$0xf0]  ;;  %v5630_v59 = vld [vmem:[#allocation9 + $0x68] sm:$0xf0]  ;;  %v5194_v40 = vor.u32 %v5920_v32, %v5191_v34 }
 0x19a   :  { %3148 = vmatpush.bf16.msrb.mxu3 %v4970_v37  ;;  %3122 = vmatpush.bf16.msra.mxu2 %v4466_v3  ;;  %v5948_v37 = vld [vmem:[#allocation9 + $0xa5c] sm:$0xf]  ;;  %v5247_v3 = vld [vmem:[#allocation9 + $0xa04] sm:$0xf0]  ;;  %v3993_v38 = vld [vmem:[#allocation9 + $0x18] sm:$0xf] }
 0x19b   :  { %3136 = vmatpush.bf16.msrb.mxu0 %v4690_v56  ;;  %v5306_v12 = vor.u32 %v5948_v37, %v5303_v35  ;;  %v5651_v56 = vld [vmem:[#allocation9 + $0x110] sm:$0xf0]  ;;  %v5250_v5 = vor.u32 %v5934_v63, %v5247_v3  ;;  %v4050_v37 = vor.u32 %v5637_v42, %v4049_v24  ;;  %v4021_v35 = vld [vmem:[#allocation9 + $0x50] sm:$0xf]  ;;  %v6492_v3 = vpop.f32.mrf.mxu0  ;;  %v5840_v24 = vld [vmem:[#allocation9 + $0x6f8] sm:$0xf0] }
 0x19d   :  { %3107 = vmatpush.bf16.msrb.mxu1 %v4270_v50  ;;  %v4106_v50 = vor.u32 %v5651_v56, %v4105_v49  ;;  %v5085_v49 = vld [vmem:[#allocation9 + $0x8a0] sm:$0xf]  ;;  %v5896_v56 = vld [vmem:[#allocation9 + $0x8b8] sm:$0xf0] }
 0x19e   :  { %3149 = vmatpush.bf16.msrb.mxu3 %v4942_v57  ;;  %3123 = vmatpush.bf16.msra.mxu2 %v4438_v21  ;;  %v5278_v57 = vor.u32 %v5941_v51, %v5275_v22  ;;  %v4078_v21 = vor.u32 %v5644_v18, %v4077_v7  ;;  %v5623_v51 = vld [vmem:[#allocation9 + $0x30] sm:$0xf0]  ;;  %v4469_v22 = vld [vmem:[#allocation9 + $0x3d0] sm:$0xf]  ;;  %v5086_v4 = vor.u32 %v5896_v56, %v5085_v49  ;;  %v5057_v7 = vld [vmem:[#allocation9 + $0x868] sm:$0xf] }
 0x19f   :  { %3137 = vmatpush.bf16.msrb.mxu0 %v4662_v14  ;;  %v5763_v14 = vld [vmem:[#allocation9 + $0x490] sm:$0xf0]  ;;  %v6490_v53 = vpop.f32.mrf.mxu3  ;;  %v3994_v63 = vor.u32 %v5623_v51, %v3993_v38  ;;  %v4470_v26 = vor.u32 %v5742_v52, %v4469_v22  ;;  %v5001_v38 = vld [vmem:[#allocation9 + $0x7f8] sm:$0xf]  ;;  %v4805_v52 = vld [vmem:[#allocation9 + $0x670] sm:$0xf] }
 0x1a0   :  { %v5989_v22 = vld [vmem:[#allocation12 + $0x78] sm:$0xff]  ;;  %v5938_v56 = vld [vmem:[#allocation9 + $0xa08] sm:$0xf0] }
 0x1a1   :  { %3108 = vmatpush.bf16.msrb.mxu1 %v4242_v25  ;;  %3124 = vmatmul.bf16.vlgmr.msra.gmra.mxu2 %v6355_v33  ;;  %v4330_v25 = vor.u32 %v5707_v19, %v4329_v17  ;;  %v5679_v17 = vld [vmem:[#allocation9 + $0x1f0] sm:$0xf0]  ;;  %v5365_v19 = vld [vmem:[#allocation9 + $0xad0] sm:$0xf] }
 0x1a2   :  { %3150 = vmatpush.bf16.msrb.mxu3 %v4914_v11  ;;  %3178 = vmatpush.bf16.msrb.mxu2 %v5362_v27  ;;  %v5927_v11 = vld [vmem:[#allocation9 + $0x9b4] sm:$0xf]  ;;  %v4525_v27 = vld [vmem:[#allocation9 + $0x440] sm:$0xf]  ;;  %v5253_v49 = vld [vmem:[#allocation9 + $0x9f0] sm:$0xf] }
 0x1a3   :  { %3186 = vmatpush.bf16.msra.mxu0 %v4190_v23  ;;  %v4554_v23 = vor.u32 %v5763_v14, %v4553_v10  ;;  %v5222_v55 = vor.u32 %v5927_v11, %v5219_v16  ;;  %v5899_v10 = vld [vmem:[#allocation9 + $0x8d4] sm:$0xf]  ;;  %v5107_v14 = vld [vmem:[#allocation9 + $0x8ec] sm:$0xf0]  ;;  %v6494_v11 = vpop.f32.mrf.mxu2  ;;  %v4217_v16 = vld [vmem:[#allocation9 + $0x1d8] sm:$0xf] }
 0x1a4   :  { %3138 = vmatmul.bf16.vlgmr.msrb.gmra.mxu0 %v6357_v39  ;;  %v4218_v32 = vor.u32 %v5679_v17, %v4217_v16  ;;  %v5987_v17 = vld [vmem:[#allocation12 + $0x68] sm:$0xff] }
 0x1a5   :  { %3109 = vmatpush.bf16.msrb.mxu1 %v4214_v45  ;;  %v5749_v45 = vld [vmem:[#allocation9 + $0x420] sm:$0xf0] }
 0x1a6   :  { %3151 = vmatpush.bf16.msrb.mxu3 %v4886_v15  ;;  %3179 = vmatpush.bf16.msrb.mxu2 %v5334_v46  ;;  %v4526_v15 = vor.u32 %v5756_v31, %v4525_v27  ;;  %v5913_v46 = vld [vmem:[#allocation9 + $0x944] sm:$0xf]  ;;  %v5952_v27 = vld [vmem:[#allocation9 + $0xa78] sm:$0xf0]  ;;  %v5110_v31 = vor.u32 %v5899_v10, %v5107_v14  ;;  %v4945_v10 = vld [vmem:[#allocation9 + $0x788] sm:$0xf] }
 0x1a7   :  { %3187 = vmatpush.bf16.msra.mxu0 %v4162_v41  ;;  %v4302_v41 = vor.u32 %v5700_v36, %v4301_v9  ;;  %v5029_v36 = vld [vmem:[#allocation9 + $0x830] sm:$0xf]  ;;  %v5861_v14 = vld [vmem:[#allocation9 + $0x7a0] sm:$0xf0] }
 0x1a8   :  { %3110 = vmatmul.bf16.vlgmr.msrb.gmra.mxu1 %v6345_v1 }
 0x1a9   :  { %3158 = vmatpush.bf16.msra.mxu1 %v5306_v12  ;;  %3152 = vmatmul.bf16.vlgmr.msrb.gmra.mxu3 %v6370_v13  ;;  %v5693_v12 = vld [vmem:[#allocation9 + $0x260] sm:$0xf0] }
 0x1aa   :  { %3214 = vmatpush.bf16.msra.mxu3 %v4638_v44  ;;  %3200 = vmatpush.bf16.msra.mxu2 %v4414_v8  ;;  %v4497_v44 = vld [vmem:[#allocation9 + $0x408] sm:$0xf]  ;;  %v4022_v8 = vor.u32 %v5630_v59, %v4021_v35  ;;  %v6497_v35 = vpop.f32.mrf.mxu3 }
 0x1ab   :  { %3188 = vmatpush.bf16.msra.mxu0 %v4134_v29  ;;  %v4498_v48 = vor.u32 %v5749_v45, %v4497_v44  ;;  %v5166_v29 = vor.u32 %v5913_v46, %v5163_v47  ;;  %v5833_v44 = vld [vmem:[#allocation9 + $0x6c0] sm:$0xf0]  ;;  %v6499_v45 = vpop.f32.mrf.mxu0  ;;  %v6501_v46 = vpop.f32.mrf.mxu1  ;;  %v5281_v47 = vld [vmem:[#allocation9 + $0xa28] sm:$0xf] }
 0x1ad   :  { %3159 = vmatpush.bf16.msra.mxu1 %v5278_v57  ;;  %v5906_v57 = vld [vmem:[#allocation9 + $0x90c] sm:$0xf] }
 0x1ae   :  { %3215 = vmatpush.bf16.msra.mxu3 %v4610_v54  ;;  %3201 = vmatpush.bf16.msra.mxu2 %v4386_v61  ;;  %v4274_v54 = vor.u32 %v5693_v12, %v4273_v28  ;;  %v5135_v61 = vld [vmem:[#allocation9 + $0x924] sm:$0xf0]  ;;  %v5945_v28 = vld [vmem:[#allocation9 + $0xa40] sm:$0xf0] }
 0x1af   :  { %3189 = vmatpush.bf16.msra.mxu0 %v4106_v50  ;;  %v4441_v50 = vld [vmem:[#allocation9 + $0x398] sm:$0xf]  ;;  %v5138_v18 = vor.u32 %v5906_v57, %v5135_v61  ;;  %v5282_v51 = vor.u32 %v5945_v28, %v5281_v47 }
 0x1b1   :  { %3160 = vmatpush.bf16.msra.mxu1 %v5250_v5  ;;  %5372 = vmatmul.msk.bf16.vlgmr.msrb.gmra.mxu2 %vm242_vm0, %v6379_v43  ;;  %v4246_v5 = vor.u32 %v5686_v60, %v4245_v62  ;;  %v4973_v62 = vld [vmem:[#allocation9 + $0x7c0] sm:$0xf]  ;;  %v5868_v60 = vld [vmem:[#allocation9 + $0x7d8] sm:$0xf0] }
 0x1b2   :  { %3216 = vmatpush.bf16.msra.mxu3 %v4582_v6  ;;  %3202 = vmatpush.bf16.msra.mxu2 %v4358_v0  ;;  %v5735_v6 = vld [vmem:[#allocation9 + $0x3b0] sm:$0xf0]  ;;  %v5889_v0 = vld [vmem:[#allocation9 + $0x880] sm:$0xf0] }
 0x1b3   :  { %3190 = vmatpush.bf16.msra.mxu0 %v4078_v21  ;;  %v5966_v21 = vld [vmem:[#allocation9 + $0xae8] sm:$0xf0]  ;;  %v4442_v42 = vor.u32 %v5735_v6, %v4441_v50  ;;  %v5225_v50 = vld [vmem:[#allocation9 + $0x9b8] sm:$0xf]  ;;  %v5931_v6 = vld [vmem:[#allocation9 + $0x9d0] sm:$0xf0] }
 0x1b4   :  { %v5366_v34 = vor.u32 %v5966_v21, %v5365_v19  ;;  %v5226_v16 = vor.u32 %v5931_v6, %v5225_v50  ;;  %v4749_v19 = vld [vmem:[#allocation9 + $0x600] sm:$0xf]  ;;  %v5812_v21 = vld [vmem:[#allocation9 + $0x618] sm:$0xf0]  ;;  %v5791_v50 = vld [vmem:[#allocation9 + $0x570] sm:$0xf0] }
 0x1b5   :  { %3161 = vmatpush.bf16.msra.mxu1 %v5222_v55  ;;  %v5058_v55 = vor.u32 %v5889_v0, %v5057_v7  ;;  %v6508_v7 = vpop.f32.mrf.mxu3  ;;  %v5113_v6 = vld [vmem:[#allocation9 + $0x8d8] sm:$0xf] }
 0x1b6   :  { %3217 = vmatpush.bf16.msra.mxu3 %v4554_v23  ;;  %3203 = vmatpush.bf16.msra.mxu2 %v4330_v25  ;;  %v4861_v23 = vld [vmem:[#allocation9 + $0x6e0] sm:$0xf] }
 0x1b7   :  { %3191 = vmatpush.bf16.msra.mxu0 %v4050_v37  ;;  %v5309_v25 = vld [vmem:[#allocation9 + $0xa60] sm:$0xf]  ;;  %v4862_v9 = vor.u32 %v5840_v24, %v4861_v23  ;;  %v5882_v37 = vld [vmem:[#allocation9 + $0x848] sm:$0xf0] }
 0x1b8   :  { %v5310_v59 = vor.u32 %v5952_v27, %v5309_v25  ;;  %v5197_v24 = vld [vmem:[#allocation9 + $0x980] sm:$0xf]  ;;  %v4750_v25 = vor.u32 %v5812_v21, %v4749_v19  ;;  %v4917_v27 = vld [vmem:[#allocation9 + $0x750] sm:$0xf] }
 0x1b9   :  { %3162 = vmatpush.bf16.msra.mxu1 %v5194_v40  ;;  %v5959_v40 = vld [vmem:[#allocation9 + $0xab0] sm:$0xf0]  ;;  %v5983_v21 = vld [vmem:[#allocation12 + $0x48] sm:$0xff] }
 0x1ba   :  { %3218 = vmatpush.bf16.msra.mxu3 %v4526_v15  ;;  %3204 = vmatpush.bf16.msra.mxu2 %v4302_v41  ;;  %v5337_v15 = vld [vmem:[#allocation9 + $0xa98] sm:$0xf]  ;;  %v4833_v41 = vld [vmem:[#allocation9 + $0x6a8] sm:$0xf] }
 0x1bb   :  { %3192 = vmatpush.bf16.msra.mxu0 %v4022_v8  ;;  %v5338_v12 = vor.u32 %v5959_v40, %v5337_v15  ;;  %v4834_v8 = vor.u32 %v5833_v44, %v4833_v41  ;;  %v5805_v15 = vld [vmem:[#allocation9 + $0x5e0] sm:$0xf0] }
 0x1bc   :  { %v5917_v40 = vld [vmem:[#allocation9 + $0x960] sm:$0xf0] }
 0x1bd   :  { %3163 = vmatpush.bf16.msra.mxu1 %v5166_v29  ;;  %v5826_v29 = vld [vmem:[#allocation9 + $0x688] sm:$0xf0]  ;;  %v2915_v41 = vpop.f32.mrf.mxu3 }
 0x1be   :  { %3219 = vmatpush.bf16.msra.mxu3 %v4498_v48  ;;  %3205 = vmatpush.bf16.msra.mxu2 %v4274_v54  ;;  %v5875_v48 = vld [vmem:[#allocation9 + $0x810] sm:$0xf0]  ;;  %v6504_v54 = vpop.f32.mrf.mxu2  ;;  %v4806_v61 = vor.u32 %v5826_v29, %v4805_v52  ;;  %v4693_v52 = vld [vmem:[#allocation9 + $0x590] sm:$0xf]  ;;  %v5798_v29 = vld [vmem:[#allocation9 + $0x5a8] sm:$0xf0] }
 0x1bf   :  { %3193 = vmatpush.bf16.msra.mxu0 %v3994_v63  ;;  %v5002_v57 = vor.u32 %v5875_v48, %v5001_v38  ;;  %v5988_v63 = vld [vmem:[#allocation12 + $0x70] sm:$0xff] }
 0x1c1   :  { %3164 = vmatpush.bf16.msra.mxu1 %v5138_v18  ;;  %v6510_v18 = vpop.f32.mrf.mxu0 }
 0x1c2   :  { %3220 = vmatpush.bf16.msra.mxu3 %v4470_v26  ;;  %3206 = vmatpush.bf16.msra.mxu2 %v4246_v5  ;;  %v4777_v26 = vld [vmem:[#allocation9 + $0x638] sm:$0xf]  ;;  %v6512_v5 = vpop.f32.mrf.mxu1 }
 0x1c3   :  { %3242 = vmatpush.bf16.msrb.mxu0 %v5086_v4  ;;  %v5819_v4 = vld [vmem:[#allocation9 + $0x650] sm:$0xf0] }
 0x1c4   :  { %3194 = vmatmul.bf16.vlgmr.msra.gmra.mxu0 %v6342_v58  ;;  %v5030_v58 = vor.u32 %v5882_v37, %v5029_v36  ;;  %v4778_v0 = vor.u32 %v5819_v4, %v4777_v26  ;;  %v5986_v36 = vld [vmem:[#allocation12 + $0x60] sm:$0xff]  ;;  %v4721_v37 = vld [vmem:[#allocation9 + $0x5c8] sm:$0xf] }
 0x1c5   :  { %3165 = vmatpush.bf16.msra.mxu1 %v5110_v31  ;;  %v5854_v31 = vld [vmem:[#allocation9 + $0x768] sm:$0xf0]  ;;  %v4665_v4 = vld [vmem:[#allocation9 + $0x558] sm:$0xf] }
 0x1c6   :  { %3221 = vmatpush.bf16.msra.mxu3 %v4442_v42  ;;  %3207 = vmatpush.bf16.msra.mxu2 %v4218_v32  ;;  %v6514_v23 = vpop.f32.mrf.mxu2  ;;  %v5924_v42 = vld [vmem:[#allocation9 + $0x998] sm:$0xf0]  ;;  %v6516_v32 = vld [vmem:[#allocation11] sm:$0x7f]  ;;  %v4918_v44 = vor.u32 %v5854_v31, %v4917_v27  ;;  %v5984_v26 = vld [vmem:[#allocation12 + $0x50] sm:$0xff] }
 0x1c7   :  { %3243 = vmatpush.bf16.msrb.mxu0 %v5058_v55  ;;  %v4946_v55 = vor.u32 %v5861_v14, %v4945_v10  ;;  %v784_v48 = vperm.slane %v6516_v32, 3  ;;  %v5996_v10 = vld [vmem:[#allocation12 + $0xb0] sm:$0xff]  ;;  %v5995_v27 = vld [vmem:[#allocation12 + $0xa8] sm:$0xff] }
 0x1c8   :  { %3166 = vmatmul.bf16.vlgmr.msra.gmra.mxu1 %v6372_v20 }
 0x1c9   :  { %3228 = vmatpush.bf16.msrb.mxu1 %v4862_v9  ;;  %3222 = vmatmul.bf16.vlgmr.msra.gmra.mxu3 %v6355_v33  ;;  %v5254_v33 = vor.u32 %v5938_v56, %v5253_v49  ;;  %v5198_v9 = vor.u32 %v5924_v42, %v5197_v24  ;;  %v2929_v47 = vpop.f32.mrf.mxu0  ;;  %v5141_v49 = vld [vmem:[#allocation9 + $0x910] sm:$0xf]  ;;  %v5910_v56 = vld [vmem:[#allocation9 + $0x928] sm:$0xf0] }
 0x1ca   :  { %3276 = vmatpush.bf16.msrb.mxu3 %v5366_v34  ;;  %3256 = vmatpush.bf16.msrb.mxu2 %v5310_v59  ;;  %v783_v34 = vperm.slane %v6516_v32, 2  ;;  %v5169_v59 = vld [vmem:[#allocation9 + $0x948] sm:$0xf]  ;;  %v2901_v28 = vpop.f32.mrf.mxu1 }
 0x1cb   :  { %3208 = vmatmul.bf16.vlgmr.msra.gmra.mxu2 %v6345_v1  ;;  %3244 = vmatpush.bf16.msrb.mxu0 %v5030_v58  ;;  %v4974_v1 = vor.u32 %v5868_v60, %v4973_v62  ;;  %v4722_v58 = vor.u32 %v5805_v15, %v4721_v37  ;;  %v5997_v60 = vld [vmem:[#allocation12 + $0xb8] sm:$0xff]  ;;  %v6004_v37 = vld [vmem:[#allocation12 + $0xf0] sm:$0xff] }
 0x1cc   :  { %v2804_v38 = vadd.f32 %v6486_v30, %v783_v34  ;;  %v4694_v30 = vor.u32 %v5798_v29, %v4693_v52  ;;  %v6002_v52 = vld [vmem:[#allocation12 + $0xe0] sm:$0xff] }
 0x1cd   :  { %3229 = vmatpush.bf16.msrb.mxu1 %v4834_v8  ;;  %v5847_v8 = vld [vmem:[#allocation9 + $0x730] sm:$0xf0] }
 0x1ce   :  { %3277 = vmatpush.bf16.msrb.mxu3 %v5338_v12  ;;  %3257 = vmatpush.bf16.msrb.mxu2 %v5282_v51  ;;  %v4889_v12 = vld [vmem:[#allocation9 + $0x718] sm:$0xf]  ;;  %v5170_v51 = vor.u32 %v5917_v40, %v5169_v59  ;;  %v6524_v62 = vpop.f32.mrf.mxu2 }
 0x1cf   :  { %3245 = vmatpush.bf16.msrb.mxu0 %v5002_v57  ;;  %v2818_v57 = vadd.f32 %v6494_v11, %v2804_v38  ;;  %v2806_v11 = vadd.f32 %v6492_v3, %v783_v34 }
 0x1d1   :  { %3230 = vmatpush.bf16.msrb.mxu1 %v4806_v61  ;;  %v4890_v61 = vor.u32 %v5847_v8, %v4889_v12  ;;  %v2931_v24 = vpop.f32.mrf.mxu0  ;;  %v2820_v3 = vadd.f32 %v6504_v54, %v2806_v11  ;;  %v5378_v54 = vld [vmem:[#allocation2 + $0x1c] sm:$0xf0]  ;;  %v5976_v11 = vld [vmem:[#allocation12 + $0x10] sm:$0xff] }
 0x1d2   :  { %3794 = vmatpush.bf16.msra.mxu3 %v5989_v22  ;;  %3258 = vmatpush.bf16.msrb.mxu2 %v5254_v33  ;;  %v5985_v22 = vld [vmem:[#allocation12 + $0x58] sm:$0xff]  ;;  %v2902_v33 = vadd.f32 %v2901_v28, %v784_v48  ;;  %v2903_v42 = vpop.f32.mrf.mxu1 }
 0x1d3   :  { %3246 = vmatpush.bf16.msrb.mxu0 %v4974_v1  ;;  %v2832_v1 = vadd.f32 %v6484_v2, %v2818_v57  ;;  %v5981_v2 = vld [vmem:[#allocation12 + $0x38] sm:$0xff]  ;;  %v2904_v34 = vadd.f32 %v2903_v42, %v784_v48  ;;  %v2834_v15 = vadd.f32 %v6490_v53, %v2820_v3  ;;  %v6003_v53 = vld [vmem:[#allocation12 + $0xe8] sm:$0xff]  ;;  %v5970_v3 = vld [vmem:[#allocation2 + $0x18] sm:$0xf0] }
 0x1d5   :  { %3231 = vmatpush.bf16.msrb.mxu1 %v4778_v0  ;;  %v4666_v0 = vor.u32 %v5791_v50, %v4665_v4  ;;  %v2846_v14 = vadd.f32 %v6501_v46, %v2832_v1  ;;  %v2848_v59 = vadd.f32 %v6512_v5, %v2834_v15 }
 0x1d6   :  { %3795 = vmatpush.bf16.msra.mxu3 %v5988_v63  ;;  %3259 = vmatpush.bf16.msrb.mxu2 %v5226_v16  ;;  %v5142_v63 = vor.u32 %v5910_v56, %v5141_v49  ;;  %v2917_v16 = vpop.f32.mrf.mxu3 }
 0x1d7   :  { %3247 = vmatpush.bf16.msrb.mxu0 %v4946_v55  ;;  %v6005_v55 = vld [vmem:[#allocation12 + $0xf8] sm:$0xff]  ;;  %v2860_v46 = vadd.f32 %v6499_v45, %v2846_v14  ;;  %v5994_v45 = vld [vmem:[#allocation12 + $0xa0] sm:$0xff]  ;;  %v2862_v5 = vadd.f32 %v6510_v18, %v2848_v59 }
 0x1d8   :  { %v6001_v18 = vld [vmem:[#allocation12 + $0xd8] sm:$0xff] }
 0x1d9   :  { %3232 = vmatpush.bf16.msrb.mxu1 %v4750_v25  ;;  %5373 = vmatmul.msk.bf16.vlgmr.msrb.gmra.mxu3 %vm242_vm0, %v6379_v43  ;;  %v5903_v43 = vld [vmem:[#allocation9 + $0x8f0] sm:$0xf0]  ;;  %v2943_v25 = vpop.f32.mrf.mxu2  ;;  %v2985_v8 = vpop.f32.mrf.mxu0  ;;  %v2876_v49 = vadd.f32 %v6524_v62, %v2862_v5  ;;  %v6011_v5 = vld [vmem:[#allocation12 + $0x128] sm:$0xff] }
 0x1da   :  { %3796 = vmatpush.bf16.msra.mxu3 %v5987_v17  ;;  %3260 = vmatpush.bf16.msrb.mxu2 %v5198_v9  ;;  %v2916_v17 = vadd.f32 %v2915_v41, %v2902_v33  ;;  %v5114_v19 = vor.u32 %v5903_v43, %v5113_v6  ;;  %v5982_v9 = vld [vmem:[#allocation12 + $0x40] sm:$0xff]  ;;  %v2918_v41 = vadd.f32 %v2917_v16, %v2904_v34  ;;  %v5991_v6 = vld [vmem:[#allocation12 + $0x88] sm:$0xff] }
 0x1db   :  { %3248 = vmatpush.bf16.msrb.mxu0 %v4918_v44  ;;  %v5967_v44 = vld [vmem:[#allocation2 + $0x4] sm:$0xf]  ;;  %v5990_v16 = vld [vmem:[#allocation12 + $0x80] sm:$0xff] }
 0x1dc   :  { %v2930_v31 = vadd.f32 %v2929_v47, %v2916_v17  ;;  %v2932_v38 = vadd.f32 %v2931_v24, %v2918_v41 }
 0x1dd   :  { %3233 = vmatpush.bf16.msrb.mxu1 %v4722_v58  ;;  %v2957_v28 = vpop.f32.mrf.mxu1  ;;  %v5381_v58 = vor.u32 %v5967_v44, %v5378_v54 }
 0x1de   :  { %3797 = vmatpush.bf16.msra.mxu3 %v5986_v36  ;;  %3261 = vmatpush.bf16.msrb.mxu2 %v5170_v51  ;;  %v5980_v36 = vld [vmem:[#allocation12 + $0x30] sm:$0xff]  ;;  %v2944_v40 = vadd.f32 %v2943_v25, %v2930_v31  ;;  %v2971_v47 = vpop.f32.mrf.mxu3  ;;  %v5376_v25 = vld [vmem:[#allocation2] sm:$0xf] }
 0x1df   :  { %3249 = vmatpush.bf16.msrb.mxu0 %v4890_v61 }
 0x1e0   :  { %v2958_v12 = vadd.f32 %v2957_v28, %v2944_v40  ;;  %v6021_v28 = vld [vmem:[#allocation12 + $0x178] sm:$0xff] }
 0x1e1   :  { %3234 = vmatpush.bf16.msrb.mxu1 %v4694_v30  ;;  %v2945_v51 = vpop.f32.mrf.mxu2  ;;  %v2987_v1 = vpop.f32.mrf.mxu0 }
 0x1e2   :  { %3798 = vmatpush.bf16.msra.mxu3 %v5985_v22  ;;  %3262 = vmatpush.bf16.msrb.mxu2 %v5142_v63  ;;  %v2972_v48 = vadd.f32 %v2971_v47, %v2958_v12  ;;  %v5978_v22 = vld [vmem:[#allocation12 + $0x20] sm:$0xff]  ;;  %v2946_v57 = vadd.f32 %v2945_v51, %v2932_v38  ;;  %v2890_v63 = vadd.f32 %v6508_v7, %v2876_v49  ;;  %v5975_v7 = vld [vmem:[#allocation12 + $0x8] sm:$0xff]  ;;  %v6013_v47 = vld [vmem:[#allocation12 + $0x138] sm:$0xff]  ;;  %v785_v51 = vperm.slane %v6516_v32, 4 }
 0x1e3   :  { %3808 = vmatpush.bf16.msra.mxu0 %v5997_v60  ;;  %v5977_v60 = vld [vmem:[#allocation12 + $0x18] sm:$0xff]  ;;  %v6019_v38 = vld [vmem:[#allocation12 + $0x168] sm:$0xff] }
 0x1e4   :  { %3250 = vmatmul.bf16.vlgmr.msrb.gmra.mxu0 %v6370_v13  ;;  %v2874_v13 = vadd.f32 %v6514_v23, %v2860_v46  ;;  %v5979_v23 = vld [vmem:[#allocation12 + $0x28] sm:$0xff]  ;;  %v2986_v56 = vadd.f32 %v2985_v8, %v2972_v48 }
 0x1e5   :  { %3235 = vmatpush.bf16.msrb.mxu1 %v4666_v0  ;;  %v2959_v30 = vpop.f32.mrf.mxu1  ;;  %v6000_v0 = vld [vmem:[#allocation12 + $0xd0] sm:$0xff] }
 0x1e6   :  { %3799 = vmatpush.bf16.msra.mxu3 %v5984_v26  ;;  %3263 = vmatpush.bf16.msrb.mxu2 %v5114_v19  ;;  %v3287_v61 = vmul.f32 0.01, %v2986_v56  ;;  %v2960_v4 = vadd.f32 %v2959_v30, %v2946_v57  ;;  %v2973_v50 = vpop.f32.mrf.mxu3  ;;  %v5999_v19 = vld [vmem:[#allocation12 + $0xc8] sm:$0xff]  ;;  %v6009_v57 = vld [vmem:[#allocation12 + $0x118] sm:$0xff] }
 0x1e7   :  { %3809 = vmatpush.bf16.msra.mxu0 %v5996_v10  ;;  %v3293_v10 = vmul.f32 0.01, %v2890_v63 }
 0x1e8   :  { %3236 = vmatmul.bf16.vlgmr.msrb.gmra.mxu1 %v6357_v39  ;;  %v2888_v39 = vadd.f32 %v6497_v35, %v2874_v13  ;;  %v5992_v35 = vld [vmem:[#allocation12 + $0x90] sm:$0xff]  ;;  %v3301_v26 = vmax.f32 %v2986_v56, %v3287_v61  ;;  %v2974_v62 = vadd.f32 %v2973_v50, %v2960_v4  ;;  %v786_v56 = vperm.slane %v6516_v32, 5  ;;  %v6017_v61 = vld [vmem:[#allocation12 + $0x158] sm:$0xff] }
 0x1e9   :  { %3780 = vmatpush.bf16.msra.mxu1 %v5981_v2  ;;  %3264 = vmatmul.bf16.vlgmr.msrb.gmra.mxu2 %v6372_v20  ;;  %v5993_v20 = vld [vmem:[#allocation12 + $0x98] sm:$0xff]  ;;  %v5974_v2 = vld [vmem:[#allocation12] sm:$0xff]  ;;  %v2999_v13 = vpop.f32.mrf.mxu2  ;;  %v3013_v59 = vpop.f32.mrf.mxu0  ;;  %v6008_v4 = vld [vmem:[#allocation12 + $0x110] sm:$0xff] }
 0x1ea   :  { %3800 = vmatpush.bf16.msra.mxu3 %v5983_v21  ;;  %3822 = vmatpush.bf16.msra.mxu2 %v6005_v55  ;;  %v3286_v29 = vmul.f32 0.01, %v2888_v39  ;;  %v2988_v14 = vadd.f32 %v2987_v1, %v2974_v62  ;;  %v3307_v21 = vmax.f32 %v2890_v63, %v3293_v10  ;;  %v5998_v55 = vld [vmem:[#allocation12 + $0xc0] sm:$0xff]  ;;  %v3000_v49 = vadd.f32 %v2999_v13, %v785_v51  ;;  %v6016_v50 = vld [vmem:[#allocation12 + $0x150] sm:$0xff]  ;;  %v6007_v62 = vld [vmem:[#allocation12 + $0x108] sm:$0xff] }
 0x1eb   :  { %3810 = vmatpush.bf16.msra.mxu0 %v5995_v27  ;;  %v5377_v27 = vor.u32 %v5970_v3, %v5376_v25  ;;  %v6015_v1 = vld [vmem:[#allocation12 + $0x148] sm:$0xff] }
 0x1ec   :  { %v3300_v33 = vmax.f32 %v2888_v39, %v3286_v29  ;;  %v3294_v17 = vmul.f32 0.01, %v2988_v14  ;;  %v6020_v39 = vld [vmem:[#allocation12 + $0x170] sm:$0xff] }
 0x1ed   :  { %3781 = vmatpush.bf16.msra.mxu1 %v5980_v36 }
 0x1ee   :  { %3801 = vmatpush.bf16.msra.mxu3 %v5982_v9  ;;  %3823 = vmatpush.bf16.msra.mxu2 %v6004_v37  ;;  %v3313_v43 = vpack.c.bf16 %v3301_v26, %v3300_v33  ;;  %v3308_v24 = vmax.f32 %v2988_v14, %v3294_v17  ;;  %v3041_v40 = vpop.f32.mrf.mxu3 }
 0x1ef   :  { %3811 = vmatpush.bf16.msra.mxu0 %v5994_v45 }
 0x1f0   :  { %3321 = vst [vmem:[#allocation2 + $0x8] sm:$0xff] %v3313_v43  ;;  %v3317_v42 = vpack.c.bf16 %v3308_v24, %v3307_v21  ;;  %v6014_v21 = vld [vmem:[#allocation12 + $0x140] sm:$0xff] }
 0x1f1   :  { %3802 = vmatmul.bf16.vlgmr.msra.gmra.mxu3 %v5381_v58  ;;  %3782 = vmatpush.bf16.msra.mxu1 %v5979_v23  ;;  %v3001_v54 = vpop.f32.mrf.mxu2  ;;  %v3015_v58 = vpop.f32.mrf.mxu0 }
 0x1f2   :  { %3824 = vmatpush.bf16.msra.mxu2 %v6003_v53  ;;  %3326 = vst [vmem:[#allocation2 + $0x24] sm:$0xff] %v3317_v42  ;;  %3850 = vmatpush.bf16.msrb.mxu3 %v6021_v28  ;;  %v6012_v53 = vld [vmem:[#allocation12 + $0x130] sm:$0xff] }
 0x1f3   :  { %3812 = vmatpush.bf16.msra.mxu0 %v5993_v20 }
 0x1f5   :  { %3783 = vmatpush.bf16.msra.mxu1 %v5978_v22  ;;  %v6010_v22 = vld [vmem:[#allocation12 + $0x120] sm:$0xff] }
 0x1f6   :  { %3825 = vmatpush.bf16.msra.mxu2 %v6002_v52  ;;  %v3043_v23 = vpop.f32.mrf.mxu3  ;;  %3851 = vmatpush.bf16.msrb.mxu3 %v6020_v39  ;;  %v6018_v52 = vld [vmem:[#allocation12 + $0x160] sm:$0xff] }
 0x1f7   :  { %3813 = vmatpush.bf16.msra.mxu0 %v5992_v35  ;;  %v5384_v46 = vld [vmem:[#allocation2 + $0x8] sm:$0xf]  ;;  %v5968_v34 = vld [vmem:[#allocation2 + $0xc] sm:$0xf] }
 0x1f9   :  { %3784 = vmatpush.bf16.msra.mxu1 %v5977_v60  ;;  %v5971_v31 = vld [vmem:[#allocation2 + $0x20] sm:$0xf0]  ;;  %v5386_v9 = vld [vmem:[#allocation2 + $0x24] sm:$0xf0]  ;;  %v3014_v60 = vadd.f32 %v3013_v59, %v3000_v49 }
 0x1fa   :  { %3826 = vmatpush.bf16.msra.mxu2 %v6001_v18  ;;  %v5385_v36 = vor.u32 %v5971_v31, %v5384_v46  ;;  %v5389_v37 = vor.u32 %v5968_v34, %v5386_v9  ;;  %3852 = vmatpush.bf16.msrb.mxu3 %v6019_v38 }
 0x1fb   :  { %3814 = vmatpush.bf16.msra.mxu0 %v5991_v6  ;;  %v3002_v6 = vadd.f32 %v3001_v54, %v785_v51 }
 0x1fd   :  { %3785 = vmatpush.bf16.msra.mxu1 %v5976_v11  ;;  %v3027_v15 = vpop.f32.mrf.mxu1  ;;  %v3016_v17 = vadd.f32 %v3015_v58, %v3002_v6 }
 0x1fe   :  { %3827 = vmatpush.bf16.msra.mxu2 %v6000_v0  ;;  %3853 = vmatpush.bf16.msrb.mxu3 %v6018_v52  ;;  %v3028_v63 = vadd.f32 %v3027_v15, %v3014_v60 }
 0x1ff   :  { %3815 = vmatpush.bf16.msra.mxu0 %v5990_v16 }
 0x200   :  { %v3042_v11 = vadd.f32 %v3041_v40, %v3028_v63 }
 0x201   :  { %3786 = vmatpush.bf16.msra.mxu1 %v5975_v7  ;;  %v3069_v8 = vpop.f32.mrf.mxu0 }
 0x202   :  { %3828 = vmatpush.bf16.msra.mxu2 %v5999_v19  ;;  %3816 = vmatmul.bf16.vlgmr.msra.gmra.mxu0 %v5385_v36  ;;  %v6006_v19 = vld [vmem:[#allocation12 + $0x100] sm:$0xff] }
 0x203   :  { %3854 = vmatpush.bf16.msrb.mxu3 %v6017_v61 }
 0x204   :  { %v3055_v41 = vpop.f32.mrf.mxu2 }
 0x205   :  { %3787 = vmatpush.bf16.msra.mxu1 %v5974_v2  ;;  %v3029_v45 = vpop.f32.mrf.mxu1  ;;  %v3056_v16 = vadd.f32 %v3055_v41, %v3042_v11 }
 0x206   :  { %3829 = vmatpush.bf16.msra.mxu2 %v5998_v55  ;;  %v3030_v42 = vadd.f32 %v3029_v45, %v3016_v17 }
 0x207   :  { %3855 = vmatpush.bf16.msrb.mxu3 %v6016_v50  ;;  %v3070_v3 = vadd.f32 %v3069_v8, %v3056_v16 }
 0x208   :  { %3788 = vmatmul.bf16.vlgmr.msra.gmra.mxu1 %v5377_v27  ;;  %v3044_v25 = vadd.f32 %v3043_v23, %v3030_v42 }
 0x209   :  { %3830 = vmatmul.bf16.vlgmr.msra.gmra.mxu2 %v5389_v37  ;;  %3836 = vmatpush.bf16.msrb.mxu1 %v6013_v47  ;;  %v3071_v30 = vpop.f32.mrf.mxu0 }
 0x20b   :  { %3856 = vmatpush.bf16.msrb.mxu3 %v6015_v1 }
 0x20c   :  { %v3057_v12 = vpop.f32.mrf.mxu2  ;;  %v3097_v48 = vpop.f32.mrf.mxu3 }
 0x20d   :  { %v6541_v44 = vpop.f32.mrf.mxu1  ;;  %3837 = vmatpush.bf16.msrb.mxu1 %v6012_v53  ;;  %v3098_v18 = vadd.f32 %v3097_v48, %v786_v56  ;;  %v3058_v36 = vadd.f32 %v3057_v12, %v3044_v25 }
 0x20e   :  { %v3084_v27 = vadd.f32 %v6541_v44, %v3070_v3 }
 0x20f   :  { %3857 = vmatpush.bf16.msrb.mxu3 %v6014_v21  ;;  %v3072_v45 = vadd.f32 %v3071_v30, %v3058_v36 }
 0x210   :  { %v3288_v15 = vmul.f32 0.01, %v3084_v27 }
 0x211   :  { %3838 = vmatpush.bf16.msrb.mxu1 %v6011_v5 }
 0x212   :  { %v3302_v47 = vmax.f32 %v3084_v27, %v3288_v15 }
 0x214   :  { %v3099_v33 = vpop.f32.mrf.mxu3 }
 0x215   :  { %v6543_v20 = vpop.f32.mrf.mxu1  ;;  %3839 = vmatpush.bf16.msrb.mxu1 %v6010_v22  ;;  %v3100_v7 = vadd.f32 %v3099_v33, %v786_v56  ;;  %v787_v56 = vperm.slane %v6516_v32, 6 }
 0x216   :  { %v3086_v28 = vadd.f32 %v6543_v20, %v3072_v45 }
 0x218   :  { %v3295_v5 = vmul.f32 0.01, %v3086_v28 }
 0x219   :  { %3840 = vmatpush.bf16.msrb.mxu1 %v6009_v57 }
 0x21a   :  { %v3309_v51 = vmax.f32 %v3086_v28, %v3295_v5 }
 0x21d   :  { %3841 = vmatpush.bf16.msrb.mxu1 %v6008_v4 }
 0x221   :  { %v3139_v10 = vpop.f32.mrf.mxu0  ;;  %3842 = vmatpush.bf16.msrb.mxu1 %v6007_v62 }
 0x224   :  { %v3125_v29 = vpop.f32.mrf.mxu2 }
 0x225   :  { %v3111_v35 = vpop.f32.mrf.mxu1  ;;  %3843 = vmatpush.bf16.msrb.mxu1 %v6006_v19 }
 0x226   :  { %v3112_v26 = vadd.f32 %v3111_v35, %v3098_v18  ;;  %v6023_v35 = vld [vmem:[#allocation12 + $0x188] sm:$0xff] }
 0x227   :  { %3870 = vmatpush.bf16.msrb.mxu0 %v6023_v35 }
 0x228   :  { %v3126_v0 = vadd.f32 %v3125_v29, %v3112_v26  ;;  %v6022_v26 = vld [vmem:[#allocation12 + $0x180] sm:$0xff] }
 0x229   :  { %v3141_v13 = vpop.f32.mrf.mxu0 }
 0x22a   :  { %v3140_v2 = vadd.f32 %v3139_v10, %v3126_v0 }
 0x22b   :  { %3871 = vmatpush.bf16.msrb.mxu0 %v6022_v26 }
 0x22c   :  { %v3127_v43 = vpop.f32.mrf.mxu2  ;;  %v3153_v24 = vpop.f32.mrf.mxu3 }
 0x22d   :  { %v3113_v14 = vpop.f32.mrf.mxu1  ;;  %v3154_v46 = vadd.f32 %v3153_v24, %v3140_v2 }
 0x22e   :  { %v3114_v55 = vadd.f32 %v3113_v14, %v3100_v7 }
 0x230   :  { %v3128_v31 = vadd.f32 %v3127_v43, %v3114_v55 }
 0x232   :  { %v3142_v54 = vadd.f32 %v3141_v13, %v3128_v31 }
 0x234   :  { %v3181_v34 = vpop.f32.mrf.mxu2  ;;  %v3155_v40 = vpop.f32.mrf.mxu3 }
 0x235   :  { %v3156_v58 = vadd.f32 %v3155_v40, %v3142_v54 }
 0x23c   :  { %v3183_v8 = vpop.f32.mrf.mxu2 }
 0x241   :  { %v3195_v48 = vpop.f32.mrf.mxu0 }
 0x242   :  { %v3196_v20 = vadd.f32 %v3195_v48, %v787_v56 }
 0x245   :  { %v3167_v9 = vpop.f32.mrf.mxu1 }
 0x246   :  { %v3168_v37 = vadd.f32 %v3167_v9, %v3154_v46 }
 0x248   :  { %v3182_v59 = vadd.f32 %v3181_v34, %v3168_v37 }
 0x249   :  { %v3197_v57 = vpop.f32.mrf.mxu0 }
 0x24a   :  { %v3289_v41 = vmul.f32 0.01, %v3182_v59  ;;  %v3198_v32 = vadd.f32 %v3197_v57, %v787_v56 }
 0x24c   :  { %v3303_v23 = vmax.f32 %v3182_v59, %v3289_v41  ;;  %v3223_v52 = vpop.f32.mrf.mxu3  ;;  %v6038_v41 = vld [vmem:[#allocation14] ss:$0 sm:$0xff] }
 0x24d   :  { %v3169_v53 = vpop.f32.mrf.mxu1 }
 0x24e   :  { %v3314_v44 = vpack.c.bf16 %v3303_v23, %v3302_v47  ;;  %v3170_v39 = vadd.f32 %v3169_v53, %v3156_v58  ;;  %v3209_v49 = vpop.f32.mrf.mxu2 }
 0x24f   :  { %v3210_v61 = vadd.f32 %v3209_v49, %v3196_v20 }
 0x250   :  { %3322 = vst [vmem:[#allocation2 + $0x10] sm:$0xff] %v3314_v44  ;;  %v3184_v12 = vadd.f32 %v3183_v8, %v3170_v39 }
 0x251   :  { %v3224_v43 = vadd.f32 %v3223_v52, %v3210_v61 }
 0x252   :  { %v3296_v38 = vmul.f32 0.01, %v3184_v12 }
 0x254   :  { %v3310_v22 = vmax.f32 %v3184_v12, %v3296_v38  ;;  %v3225_v18 = vpop.f32.mrf.mxu3 }
 0x256   :  { %v3318_v29 = vpack.c.bf16 %v3310_v22, %v3309_v51  ;;  %v3211_v6 = vpop.f32.mrf.mxu2 }
 0x257   :  { %v5392_v30 = vld [vmem:[#allocation2 + $0x10] sm:$0xf]  ;;  %v5969_v60 = vld [vmem:[#allocation2 + $0x14] sm:$0xf]  ;;  %v3212_v0 = vadd.f32 %v3211_v6, %v3198_v32 }
 0x258   :  { %3327 = vst [vmem:[#allocation2 + $0x2c] sm:$0xff] %v3318_v29 }
 0x259   :  { %v3226_v7 = vadd.f32 %v3225_v18, %v3212_v0 }
 0x25c   :  { %v3279_v14 = vpop.f32.mrf.mxu3 }
 0x25f   :  { %v5972_v33 = vld [vmem:[#allocation2 + $0x28] sm:$0xf0]  ;;  %v5394_v63 = vld [vmem:[#allocation2 + $0x2c] sm:$0xf0] }
 0x260   :  { %v5393_v4 = vor.u32 %v5972_v33, %v5392_v30  ;;  %v5397_v50 = vor.u32 %v5969_v60, %v5394_v63 }
 0x261   :  { %v3251_v11 = vpop.f32.mrf.mxu0 }
 0x262   :  { %3844 = vmatmul.bf16.vlgmr.msrb.gmra.mxu1 %v5393_v4  ;;  %3858 = vmatmul.bf16.vlgmr.msrb.gmra.mxu3 %v5397_v50 }
 0x264   :  { %v3281_v31 = vpop.f32.mrf.mxu3 }
 0x265   :  { %v3237_v62 = vpop.f32.mrf.mxu1 }
 0x266   :  { %v3238_v1 = vadd.f32 %v3237_v62, %v3224_v43 }
 0x268   :  { %v3252_v10 = vadd.f32 %v3251_v11, %v3238_v1 }
 0x269   :  { %v3253_v2 = vpop.f32.mrf.mxu0 }
 0x26c   :  { %v3265_v16 = vpop.f32.mrf.mxu2 }
 0x26d   :  { %v3266_v17 = vadd.f32 %v3265_v16, %v3252_v10  ;;  %v3239_v19 = vpop.f32.mrf.mxu1 }
 0x26e   :  { %v3240_v24 = vadd.f32 %v3239_v19, %v3226_v7 }
 0x26f   :  { %v3280_v21 = vadd.f32 %v3279_v14, %v3266_v17 }
 0x270   :  { %v3254_v3 = vadd.f32 %v3253_v2, %v3240_v24 }
 0x271   :  { %v3290_v42 = vmul.f32 0.01, %v3280_v21 }
 0x273   :  { %v3304_v55 = vmax.f32 %v3280_v21, %v3290_v42 }
 0x274   :  { %v3267_v25 = vpop.f32.mrf.mxu2  ;;  %v3803_v40 = vpop.f32.mrf.mxu3 }
 0x275   :  { %v3315_v27 = vpack.c.bf16 %v3304_v55, %v3304_v55  ;;  %v3268_v46 = vadd.f32 %v3267_v25, %v3254_v3 }
 0x277   :  { %3324 = vst.msk [vmem:[#allocation2 + $0x18] sm:$0xf] %vm3323_vm1, %v3315_v27  ;;  %v3282_v34 = vadd.f32 %v3281_v31, %v3268_v46 }
 0x279   :  { %v3297_v9 = vmul.f32 0.01, %v3282_v34 }
 0x27b   :  { %v3311_v36 = vmax.f32 %v3282_v34, %v3297_v9 }
 0x27c   :  { %v3805_v28 = vpop.f32.mrf.mxu3 }
 0x27d   :  { %v3319_v37 = vpack.c.bf16 %v3311_v36, %v3311_v36 }
 0x27e   :  { %v5400_v13 = vld [vmem:[#allocation2 + $0x18] sm:$0xf] }
 0x27f   :  { %3328 = vst.msk [vmem:[#allocation2 + $0x34] sm:$0xf] %vm3323_vm1, %v3319_v37  ;;  %v3817_v45 = vpop.f32.mrf.mxu0 }
 0x285   :  { %v3789_v59 = vpop.f32.mrf.mxu1 }
 0x286   :  { %v5973_v15 = vld [vmem:[#allocation2 + $0x30] sm:$0xf0]  ;;  %v3790_v58 = vadd.f32 %v6038_v41, %v3789_v59 }
 0x287   :  { %v5401_v54 = vor.u32 %v5973_v15, %v5400_v13  ;;  %v3819_v44 = vpop.f32.mrf.mxu0 }
 0x288   :  { %v3804_v53 = vadd.f32 %v3803_v40, %v3790_v58 }
 0x289   :  { %5602 = vmatmul.msk.bf16.vlgmr.msrb.gmra.mxu0 %vm242_vm0, %v5401_v54 }
 0x28a   :  { %v3818_v8 = vadd.f32 %v3817_v45, %v3804_v53 }
 0x28c   :  { %v3831_v23 = vpop.f32.mrf.mxu2 }
 0x28d   :  { %v3791_v47 = vpop.f32.mrf.mxu1  ;;  %v3832_v38 = vadd.f32 %v3831_v23, %v3818_v8 }
 0x28e   :  { %v3792_v12 = vadd.f32 %v6038_v41, %v3791_v47 }
 0x290   :  { %v3806_v51 = vadd.f32 %v3805_v28, %v3792_v12 }
 0x292   :  { %v3820_v49 = vadd.f32 %v3819_v44, %v3806_v51 }
 0x294   :  { %v3833_v52 = vpop.f32.mrf.mxu2 }
 0x295   :  { %v3834_v35 = vadd.f32 %v3833_v52, %v3820_v49 }
 0x2df   :  { %v3845_v39 = vpop.f32.mrf.mxu1 }
 0x2e0   :  { %v3846_v48 = vadd.f32 %v3845_v39, %v3832_v38 }
 0x2e5   :  { %v3859_v5 = vpop.f32.mrf.mxu3 }
 0x2e6   :  { %v3860_v22 = vadd.f32 %v3859_v5, %v3846_v48 }
 0x2e7   :  { %v3847_v20 = vpop.f32.mrf.mxu1 }
 0x2e8   :  { %v3848_v30 = vadd.f32 %v3847_v20, %v3834_v35 }
 0x2ed   :  { %v3861_v61 = vpop.f32.mrf.mxu3 }
 0x2ee   :  { %v3862_v60 = vadd.f32 %v3861_v61, %v3848_v30 }
 0x306   :  { %v3873_v29 = vpop.f32.mrf.mxu0 }
 0x307   :  { %v3874_v56 = vadd.f32 %v3873_v29, %v3860_v22 }
 0x309   :  { %v3878_v57 = vmax.f32 %v3874_v56, 0.0 }
 0x30b   :  { %3880 = vst [vmem:[#allocation15] sm:$0xff] %v3878_v57 }
 0x30e   :  { %v3875_v18 = vpop.f32.mrf.mxu0 }
 0x30f   :  { %v3876_v33 = vadd.f32 %v3875_v18, %v3862_v60 }
 0x311   :  { %v3879_v63 = vmax.f32 %v3876_v33, 0.0 }
 0x313   :  { %3881 = vst [vmem:[#allocation15 + $0x8] sm:$0xff] %v3879_v63 }
 0x314   :  { %3894 = dma.vmem_to_hbm [thread:$0]  %s3887_s6, 256, %s3889_s1, [#allocation5], %s6250_s23, %s6250_s23, %s6251_s24  }
 0x315   :  { %6240 = dma.done.wait [#allocation5], 256  }
 0x316   :  { %6241 = vsyncadd [#allocation5], 4294967040 }
 0x317   :  { %3899 = vsyncpa [#allocation4], 1 }
 0x318   :  { %3900 = vsyncpa [#allocation7], 1 }
 0x319   :  { %3901 = vsyncpa [#allocation10], 1 }
 0x31a   :  { %3902 = vsyncpa [#allocation13], 1 }
 0x31b   :  { %3903 = vsyncpa [#allocation5], 1 }

</bundles_post_ra>
